<compile_context>
chip_gen: v6e
topology: v6e:2x2x1
jax: 0.10.0
libtpu: 0.0.40
codegen_flags: <defaults>
</compile_context>

<pallas_src>
import functools

import jax
import jax.numpy as jnp
from jax import lax
from jax.experimental import pallas as pl
from jax.experimental.pallas import tpu as pltpu


def _round_up(x, m):
    return (x + m - 1) // m * m


# ----------------------------------------------------------------------------------
# Generic parallel matmul+bias kernel (used for the input and output projections).
# ----------------------------------------------------------------------------------
def _matmul_bias_kernel(x_ref, w_ref, b_ref, o_ref):
    # MXU operands in the weight dtype (bf16 on v6e/v7x), f32 accumulation, f32 out.
    x = x_ref[...].astype(w_ref.dtype)
    o_ref[...] = (jnp.dot(x, w_ref[...], preferred_element_type=jnp.float32)
                  + b_ref[...]).astype(o_ref.dtype)


def _pallas_matmul_bias(x, w, b, *, tm_max=256, tn_max=512):
    """[M, K] @ [K, N] + [1, N] -> [M, N] f32 with a parallel (M, N) Pallas grid."""
    M, K = x.shape
    _, N = w.shape
    tm = min(tm_max, _round_up(M, 8))
    tn = min(tn_max, _round_up(N, 128))
    Mp, Np = _round_up(M, tm), _round_up(N, tn)
    if Mp != M:
        x = jnp.pad(x, ((0, Mp - M), (0, 0)))
    if Np != N:
        w = jnp.pad(w, ((0, 0), (0, Np - N)))
        b = jnp.pad(b, ((0, 0), (0, Np - N)))
    out = pl.pallas_call(
        _matmul_bias_kernel,
        out_shape=jax.ShapeDtypeStruct((Mp, Np), jnp.float32),
        grid_spec=pltpu.PrefetchScalarGridSpec(
            num_scalar_prefetch=0,
            grid=(Mp // tm, Np // tn),
            in_specs=[
                pl.BlockSpec((tm, K), lambda i, j: (i, 0)),   # activations
                pl.BlockSpec((K, tn), lambda i, j: (0, j)),   # weights
                pl.BlockSpec((1, tn), lambda i, j: (0, j)),   # bias
            ],
            out_specs=pl.BlockSpec((tm, tn), lambda i, j: (i, j)),
        ),
        compiler_params=pltpu.CompilerParams(
            dimension_semantics=("parallel", "parallel")),
    )(x, w, b)
    return out[:M, :N]


# ----------------------------------------------------------------------------------
# Sequential LSTM recurrence: single kernel invocation, unrolled in-kernel time loop.
# ----------------------------------------------------------------------------------
def _lstm_recurrence_kernel(gx_ref, w_hh_ref, h_all_ref):
    """gx_ref:    [Bp, T, 4*Hp] f32  pre-projected gates (x @ W_ih + b), VMEM resident
       w_hh_ref:  [Hp, 4*Hp]         recurrent weights (mxu dtype), VMEM resident
       h_all_ref: [Bp, T, Hp]  f32   hidden state at every step (fed to vocab proj.)"""
    Bp, T, four_hp = gx_ref.shape
    Hp = four_hp // 4
    w_hh = w_hh_ref[...]
    h = jnp.zeros((Bp, Hp), jnp.float32)
    c = jnp.zeros((Bp, Hp), jnp.float32)
    # T is small and static here -> fully unrolled with static indexing; for long
    # sequences chunk the time axis through an "arbitrary" grid dimension instead.
    for t in range(T):
        gates = gx_ref[:, t, :] + jnp.dot(h.astype(w_hh.dtype), w_hh,
                                          preferred_element_type=jnp.float32)
        # Hp is a multiple of 128 -> each gate slice is a 128-lane-aligned block.
        i_g = jax.nn.sigmoid(gates[:, 0 * Hp:1 * Hp])
        f_g = jax.nn.sigmoid(gates[:, 1 * Hp:2 * Hp])
        g_g = jnp.tanh(gates[:, 2 * Hp:3 * Hp])
        o_g = jax.nn.sigmoid(gates[:, 3 * Hp:4 * Hp])
        c = f_g * c + i_g * g_g
        h = o_g * jnp.tanh(c)
        h_all_ref[:, t, :] = h


# ----------------------------------------------------------------------------------
# Wrapper = DecoderRNN.forward
# ----------------------------------------------------------------------------------
def decoder_forward(features, captions, params, mxu_dtype=jnp.bfloat16):
    """features [B, E] f32, captions [B, S] i32 -> logits [B, S, V] f32 (batch_first)."""
    emb, w_ih, w_hh = params["embedding"], params["w_ih"], params["w_hh"]
    b, w_out, b_out = params["b"], params["w_out"], params["b_out"]

    B, E = features.shape
    S = captions.shape[1]
    H = w_hh.shape[0]
    V = w_out.shape[1]

    Bp = _round_up(B, 8)       # sublane alignment for the recurrent matmul M dim
    Hp = _round_up(H, 128)     # lane alignment so gate slices don't split a vreg
    Vp = _round_up(V, 128)

    # --- gate-block padding: place each of the 4 gates at a 128-aligned lane offset.
    # Padded lanes get zero weights/bias => i=f=o=0.5, g=0 => padded c/h stay exactly 0,
    # so the real H lanes evolve identically to the unpadded LSTM.
    def pad_gate_blocks(m, rows_to):
        rows = m.shape[0]
        out = jnp.zeros((rows_to, 4 * Hp), jnp.float32)
        for g in range(4):
            out = out.at[:rows, g * Hp:g * Hp + H].set(m[:, g * H:(g + 1) * H])
        return out

    w_ih_p = pad_gate_blocks(w_ih, E).astype(mxu_dtype)                 # [E, 4Hp]
    w_hh_p = pad_gate_blocks(w_hh, Hp).astype(mxu_dtype)                # [Hp, 4Hp]
    b_p = pad_gate_blocks(b, 1)                                          # [1, 4Hp] f32
    w_out_p = jnp.zeros((Hp, Vp), jnp.float32).at[:H, :V].set(w_out).astype(mxu_dtype)
    b_out_p = jnp.zeros((1, Vp), jnp.float32).at[:, :V].set(b_out)

    # --- embedding lookup + <image feature, word embeddings> sequence (plain XLA) ---
    # TODO(synk): embedding gather stays in XLA (data-dependent gather; no rectangular BlockSpec).
    embeds = jnp.take(emb, captions[:, :-1], axis=0)                     # [B, S-1, E]
    inputs = jnp.concatenate([features[:, None, :], embeds], axis=1)     # [B, S, E]
    inputs = inputs.astype(jnp.float32)
    if Bp != B:
        inputs = jnp.pad(inputs, ((0, Bp - B), (0, 0), (0, 0)))

    # --- 1. input projection for ALL time steps at once (big parallel MXU matmul) ---
    gx = _pallas_matmul_bias(inputs.reshape(Bp * S, E), w_ih_p, b_p)     # [Bp*S, 4Hp] f32
    gx = gx.reshape(Bp, S, 4 * Hp)

    # --- 2. sequential recurrence: one pallas_call, whole slab + weights in VMEM ----
    h_all = pl.pallas_call(
        _lstm_recurrence_kernel,
        out_shape=jax.ShapeDtypeStruct((Bp, S, Hp), jnp.float32),
        grid_spec=pltpu.PrefetchScalarGridSpec(
            num_scalar_prefetch=0,
            grid=(1,),   # single invocation: no per-step grid/DMA overhead
            in_specs=[
                pl.BlockSpec((Bp, S, 4 * Hp), lambda i: (0, 0, 0)),
                pl.BlockSpec((Hp, 4 * Hp), lambda i: (0, 0)),
            ],
            out_specs=pl.BlockSpec((Bp, S, Hp), lambda i: (0, 0, 0)),
        ),
        compiler_params=pltpu.CompilerParams(
            dimension_semantics=("arbitrary",)),
    )(gx, w_hh_p)

    # --- 3. vocab projection for ALL time steps at once (big parallel MXU matmul) ---
    logits = _pallas_matmul_bias(h_all.reshape(Bp * S, Hp), w_out_p, b_out_p)  # [Bp*S, Vp]
    return logits.reshape(Bp, S, Vp)[:B, :, :V]     # batch-first, no transposes


# ----------------------------------------------------------------------------------
# Pure-JAX reference (lax.scan) mirroring the kernel's MXU-operand dtype.
# ----------------------------------------------------------------------------------
def decoder_forward_reference(features, captions, params, mxu_dtype=jnp.bfloat16):
    H = params["w_hh"].shape[0]
    B = features.shape[0]
    w_ih = params["w_ih"].astype(mxu_dtype)
    w_hh = params["w_hh"].astype(mxu_dtype)
    w_out = params["w_out"].astype(mxu_dtype)

    embeds = jnp.take(params["embedding"], captions[:, :-1], axis=0)
    inputs = jnp.concatenate([features[:, None, :], embeds], axis=1)

    gx = (jnp.dot(inputs.astype(mxu_dtype), w_ih, preferred_element_type=jnp.float32)
          + params["b"][0])                                              # [B, S, 4H]

    def step(carry, gx_t):
        h, c = carry
        gates = gx_t + jnp.dot(h.astype(mxu_dtype), w_hh,
                               preferred_element_type=jnp.float32)
        i = jax.nn.sigmoid(gates[:, 0 * H:1 * H])
        f = jax.nn.sigmoid(gates[:, 1 * H:2 * H])
        g = jnp.tanh(gates[:, 2 * H:3 * H])
        o = jax.nn.sigmoid(gates[:, 3 * H:4 * H])
        c = f * c + i * g
        h = o * jnp.tanh(c)
        return (h, c), h

    init = (jnp.zeros((B, H), jnp.float32), jnp.zeros((B, H), jnp.float32))
    _, hs = lax.scan(step, init, jnp.transpose(gx, (1, 0, 2)))           # [S, B, H] f32
    logits = (jnp.dot(hs.astype(mxu_dtype), w_out, preferred_element_type=jnp.float32)
              + params["b_out"][0])
    return jnp.transpose(logits, (1, 0, 2))


def init_params(key, embed_size, hidden_size, vocab_size):
    """Deterministic synthetic parameter init (torch-like uniform ranges)."""
    k = 1.0 / jnp.sqrt(jnp.float32(hidden_size))
    keys = jax.random.split(key, 7)
    u = lambda kk, shape, scale: jax.random.uniform(
        kk, shape, jnp.float32, minval=-scale, maxval=scale)
    return {
        "embedding": u(keys[0], (vocab_size, embed_size), 1.0),
        "w_ih": u(keys[1], (embed_size, 4 * hidden_size), k),
        "w_hh": u(keys[2], (hidden_size, 4 * hidden_size), k),
        # combined b_ih + b_hh
        "b": u(keys[3], (1, 4 * hidden_size), k) + u(keys[4], (1, 4 * hidden_size), k),
        "w_out": u(keys[5], (hidden_size, vocab_size), k),
        "b_out": u(keys[6], (1, vocab_size), k),
    }


if __name__ == "__main__":
    batch, seq = 8, 8
    embed_size, hidden_size, vocab_size = 32, 32, 128

    root = jax.random.PRNGKey(0)
    k_param, k_feat, k_cap = jax.random.split(root, 3)
    params = init_params(k_param, embed_size, hidden_size, vocab_size)
    features = jax.random.normal(k_feat, (batch, embed_size), jnp.float32)
    captions = jax.random.randint(k_cap, (batch, seq), 0, vocab_size, jnp.int32)

    # Check both the all-f32 path and the recommended bf16-MXU-operand path.
    for mxu_dtype in (jnp.float32, jnp.bfloat16):
        fwd = jax.jit(functools.partial(decoder_forward, params=params,
                                        mxu_dtype=mxu_dtype))
        out = jax.block_until_ready(fwd(features, captions))
        ref = decoder_forward_reference(features, captions, params, mxu_dtype=mxu_dtype)
        assert out.shape == (batch, seq, vocab_size), out.shape
        max_err = float(jnp.max(jnp.abs(out - ref)))
        assert max_err < 5e-3, f"{mxu_dtype.__name__}: mismatch vs reference: {max_err}"

    print("KERNEL_OK")
</pallas_src>

<mosaic_0001>
module attributes {stable_mosaic.version = 11 : i64} {
  func.func @_matmul_bias_kernel(%arg0: i32, %arg1: i32, %arg2: memref<64x32xf32, #tpu.memory_space<vmem>>, %arg3: memref<32x512xf32, #tpu.memory_space<vmem>>, %arg4: memref<1x512xf32, #tpu.memory_space<vmem>>, %arg5: memref<64x512xf32, #tpu.memory_space<vmem>>) attributes {dimension_semantics = [#tpu.dimension_semantics<parallel>, #tpu.dimension_semantics<parallel>], iteration_bounds = array<i64: 1, 1>, scalar_prefetch = 0 : i64, scratch_operands = 0 : i64, tpu.core_type = #tpu.core_type<tc>, window_params = [{transform_indices = @transform_0, window_bounds = array<i64: 64, 32>}, {transform_indices = @transform_1, window_bounds = array<i64: 32, 512>}, {transform_indices = @transform_2, window_bounds = array<i64: 1, 512>}, {transform_indices = @transform_3, window_bounds = array<i64: 64, 512>}]} {
    %c0 = arith.constant 0 : index
    %c0_0 = arith.constant 0 : index
    %0 = vector.load %arg2[%c0, %c0_0] : memref<64x32xf32, #tpu.memory_space<vmem>>, vector<64x32xf32>
    %c0_1 = arith.constant 0 : index
    %c0_2 = arith.constant 0 : index
    %1 = vector.load %arg3[%c0_1, %c0_2] : memref<32x512xf32, #tpu.memory_space<vmem>>, vector<32x512xf32>
    %cst = arith.constant dense<0.000000e+00> : vector<64x512xf32>
    %2 = tpu.matmul %0, %1, %cst {dimension_numbers = #tpu.dot_dimension_numbers<[1], [0], [0], [1], [0, 0, 1, 1], [], []>} : vector<64x32xf32>, vector<32x512xf32>, vector<64x512xf32> -> vector<64x512xf32>
    %c0_3 = arith.constant 0 : index
    %c0_4 = arith.constant 0 : index
    %3 = vector.load %arg4[%c0_3, %c0_4] : memref<1x512xf32, #tpu.memory_space<vmem>>, vector<1x512xf32>
    %4 = vector.broadcast %3 : vector<1x512xf32> to vector<64x512xf32>
    %5 = arith.addf %2, %4 : vector<64x512xf32>
    %c0_5 = arith.constant 0 : index
    %c0_6 = arith.constant 0 : index
    %6 = vector.load %arg5[%c0_5, %c0_6] : memref<64x512xf32, #tpu.memory_space<vmem>>, vector<64x512xf32>
    tpu.vector_store %arg5[%c0_5, %c0_6], %5 {strides = array<i32>} : memref<64x512xf32, #tpu.memory_space<vmem>>, vector<64x512xf32>,
    return
  }
  func.func @transform_0(%arg0: i32, %arg1: i32) -> (i32, i32) {
    %c0_i32 = arith.constant 0 : i32
    %c0_i32_0 = arith.constant 0 : i32
    return %arg0, %c0_i32 : i32, i32
  }
  func.func @transform_1(%arg0: i32, %arg1: i32) -> (i32, i32) {
    %c0_i32 = arith.constant 0 : i32
    %c0_i32_0 = arith.constant 0 : i32
    return %c0_i32, %arg1 : i32, i32
  }
  func.func @transform_2(%arg0: i32, %arg1: i32) -> (i32, i32) {
    %c0_i32 = arith.constant 0 : i32
    %c0_i32_0 = arith.constant 0 : i32
    return %c0_i32, %arg1 : i32, i32
  }
  func.func @transform_3(%arg0: i32, %arg1: i32) -> (i32, i32) {
    %c0_i32 = arith.constant 0 : i32
    return %arg0, %arg1 : i32, i32
  }
}

module attributes {stable_mosaic.version = 11 : i64} {
  func.func @_matmul_bias_kernel(%arg0: i32, %arg1: i32, %arg2: memref<64x128xf32, #tpu.memory_space<vmem>>, %arg3: memref<128x128xf32, #tpu.memory_space<vmem>>, %arg4: memref<1x128xf32, #tpu.memory_space<vmem>>, %arg5: memref<64x128xf32, #tpu.memory_space<vmem>>) attributes {dimension_semantics = [#tpu.dimension_semantics<parallel>, #tpu.dimension_semantics<parallel>], iteration_bounds = array<i64: 1, 1>, scalar_prefetch = 0 : i64, scratch_operands = 0 : i64, tpu.core_type = #tpu.core_type<tc>, window_params = [{transform_indices = @transform_0, window_bounds = array<i64: 64, 128>}, {transform_indices = @transform_1, window_bounds = array<i64: 128, 128>}, {transform_indices = @transform_2, window_bounds = array<i64: 1, 128>}, {transform_indices = @transform_3, window_bounds = array<i64: 64, 128>}]} {
    %c0 = arith.constant 0 : index
    %c0_0 = arith.constant 0 : index
    %0 = vector.load %arg2[%c0, %c0_0] : memref<64x128xf32, #tpu.memory_space<vmem>>, vector<64x128xf32>
    %c0_1 = arith.constant 0 : index
    %c0_2 = arith.constant 0 : index
    %1 = vector.load %arg3[%c0_1, %c0_2] : memref<128x128xf32, #tpu.memory_space<vmem>>, vector<128x128xf32>
    %cst = arith.constant dense<0.000000e+00> : vector<64x128xf32>
    %2 = tpu.matmul %0, %1, %cst {dimension_numbers = #tpu.dot_dimension_numbers<[1], [0], [0], [1], [0, 0, 1, 1], [], []>} : vector<64x128xf32>, vector<128x128xf32>, vector<64x128xf32> -> vector<64x128xf32>
    %c0_3 = arith.constant 0 : index
    %c0_4 = arith.constant 0 : index
    %3 = vector.load %arg4[%c0_3, %c0_4] : memref<1x128xf32, #tpu.memory_space<vmem>>, vector<1x128xf32>
    %4 = vector.broadcast %3 : vector<1x128xf32> to vector<64x128xf32>
    %5 = arith.addf %2, %4 : vector<64x128xf32>
    %c0_5 = arith.constant 0 : index
    %c0_6 = arith.constant 0 : index
    %6 = vector.load %arg5[%c0_5, %c0_6] : memref<64x128xf32, #tpu.memory_space<vmem>>, vector<64x128xf32>
    tpu.vector_store %arg5[%c0_5, %c0_6], %5 {strides = array<i32>} : memref<64x128xf32, #tpu.memory_space<vmem>>, vector<64x128xf32>,
    return
  }
  func.func @transform_0(%arg0: i32, %arg1: i32) -> (i32, i32) {
    %c0_i32 = arith.constant 0 : i32
    %c0_i32_0 = arith.constant 0 : i32
    return %arg0, %c0_i32 : i32, i32
  }
  func.func @transform_1(%arg0: i32, %arg1: i32) -> (i32, i32) {
    %c0_i32 = arith.constant 0 : i32
    %c0_i32_0 = arith.constant 0 : i32
    return %c0_i32, %arg1 : i32, i32
  }
  func.func @transform_2(%arg0: i32, %arg1: i32) -> (i32, i32) {
    %c0_i32 = arith.constant 0 : i32
    %c0_i32_0 = arith.constant 0 : i32
    return %c0_i32, %arg1 : i32, i32
  }
  func.func @transform_3(%arg0: i32, %arg1: i32) -> (i32, i32) {
    %c0_i32 = arith.constant 0 : i32
    return %arg0, %arg1 : i32, i32
  }
}

module attributes {stable_mosaic.version = 11 : i64} {
  func.func @_lstm_recurrence_kernel(%arg0: i32, %arg1: memref<8x8x512xf32, #tpu.memory_space<vmem>>, %arg2: memref<128x512xf32, #tpu.memory_space<vmem>>, %arg3: memref<8x8x128xf32, #tpu.memory_space<vmem>>) attributes {dimension_semantics = [#tpu.dimension_semantics<arbitrary>], iteration_bounds = array<i64: 1>, scalar_prefetch = 0 : i64, scratch_operands = 0 : i64, tpu.core_type = #tpu.core_type<tc>, window_params = [{pipeline_mode = #tpu.pipeline_mode<synchronous>, transform_indices = @transform_0, window_bounds = array<i64: 8, 8, 512>}, {pipeline_mode = #tpu.pipeline_mode<synchronous>, transform_indices = @transform_1, window_bounds = array<i64: 128, 512>}, {pipeline_mode = #tpu.pipeline_mode<synchronous>, transform_indices = @transform_2, window_bounds = array<i64: 8, 8, 128>}]} {
    %c0 = arith.constant 0 : index
    %c0_0 = arith.constant 0 : index
    %0 = vector.load %arg2[%c0, %c0_0] : memref<128x512xf32, #tpu.memory_space<vmem>>, vector<128x512xf32>
    %cst = arith.constant 0.000000e+00 : f32
    %1 = vector.broadcast %cst : f32 to vector<8x128xf32>
    %cst_1 = arith.constant 0.000000e+00 : f32
    %2 = vector.broadcast %cst_1 : f32 to vector<8x128xf32>
    %c0_2 = arith.constant 0 : index
    %c0_3 = arith.constant 0 : index
    %c0_4 = arith.constant 0 : index
    %3 = vector.load %arg1[%c0_2, %c0_3, %c0_4] : memref<8x8x512xf32, #tpu.memory_space<vmem>>, vector<8x1x512xf32>
    %4 = vector.shape_cast %3 : vector<8x1x512xf32> to vector<8x512xf32>
    %cst_5 = arith.constant dense<0.000000e+00> : vector<8x512xf32>
    %5 = tpu.matmul %1, %0, %cst_5 {dimension_numbers = #tpu.dot_dimension_numbers<[1], [0], [0], [1], [0, 0, 1, 1], [], []>} : vector<8x128xf32>, vector<128x512xf32>, vector<8x512xf32> -> vector<8x512xf32>
    %6 = arith.addf %4, %5 : vector<8x512xf32>
    %7 = vector.extract_strided_slice %6 {offsets = [0, 0], sizes = [8, 128], strides = [1, 1]} : vector<8x512xf32> to vector<8x128xf32>
    %8 = arith.negf %7 : vector<8x128xf32>
    %9 = math.exp %8 : vector<8x128xf32>
    %cst_6 = arith.constant 1.000000e+00 : f32
    %10 = vector.broadcast %cst_6 : f32 to vector<8x128xf32>
    %11 = arith.addf %10, %9 : vector<8x128xf32>
    %12 = arith.divf %10, %11 : vector<8x128xf32>
    %13 = vector.extract_strided_slice %6 {offsets = [0, 128], sizes = [8, 128], strides = [1, 1]} : vector<8x512xf32> to vector<8x128xf32>
    %14 = arith.negf %13 : vector<8x128xf32>
    %15 = math.exp %14 : vector<8x128xf32>
    %cst_7 = arith.constant 1.000000e+00 : f32
    %16 = vector.broadcast %cst_7 : f32 to vector<8x128xf32>
    %17 = arith.addf %16, %15 : vector<8x128xf32>
    %18 = arith.divf %16, %17 : vector<8x128xf32>
    %19 = vector.extract_strided_slice %6 {offsets = [0, 256], sizes = [8, 128], strides = [1, 1]} : vector<8x512xf32> to vector<8x128xf32>
    %20 = math.tanh %19 : vector<8x128xf32>
    %21 = vector.extract_strided_slice %6 {offsets = [0, 384], sizes = [8, 128], strides = [1, 1]} : vector<8x512xf32> to vector<8x128xf32>
    %22 = arith.negf %21 : vector<8x128xf32>
    %23 = math.exp %22 : vector<8x128xf32>
    %cst_8 = arith.constant 1.000000e+00 : f32
    %24 = vector.broadcast %cst_8 : f32 to vector<8x128xf32>
    %25 = arith.addf %24, %23 : vector<8x128xf32>
    %26 = arith.divf %24, %25 : vector<8x128xf32>
    %27 = arith.mulf %18, %2 : vector<8x128xf32>
    %28 = arith.mulf %12, %20 : vector<8x128xf32>
    %29 = arith.addf %27, %28 : vector<8x128xf32>
    %30 = math.tanh %29 : vector<8x128xf32>
    %31 = arith.mulf %26, %30 : vector<8x128xf32>
    %c0_9 = arith.constant 0 : index
    %c0_10 = arith.constant 0 : index
    %c0_11 = arith.constant 0 : index
    %32 = vector.load %arg3[%c0_9, %c0_10, %c0_11] : memref<8x8x128xf32, #tpu.memory_space<vmem>>, vector<8x1x128xf32>
    %33 = vector.shape_cast %32 : vector<8x1x128xf32> to vector<8x128xf32>
    %34 = vector.shape_cast %31 : vector<8x128xf32> to vector<8x1x128xf32>
    tpu.vector_store %arg3[%c0_9, %c0_10, %c0_11], %34 {strides = array<i32>} : memref<8x8x128xf32, #tpu.memory_space<vmem>>, vector<8x1x128xf32>,
    %c0_12 = arith.constant 0 : index
    %c1 = arith.constant 1 : index
    %c0_13 = arith.constant 0 : index
    %35 = vector.load %arg1[%c0_12, %c1, %c0_13] : memref<8x8x512xf32, #tpu.memory_space<vmem>>, vector<8x1x512xf32>
    %36 = vector.shape_cast %35 : vector<8x1x512xf32> to vector<8x512xf32>
    %cst_14 = arith.constant dense<0.000000e+00> : vector<8x512xf32>
    %37 = tpu.matmul %31, %0, %cst_14 {dimension_numbers = #tpu.dot_dimension_numbers<[1], [0], [0], [1], [0, 0, 1, 1], [], []>} : vector<8x128xf32>, vector<128x512xf32>, vector<8x512xf32> -> vector<8x512xf32>
    %38 = arith.addf %36, %37 : vector<8x512xf32>
    %39 = vector.extract_strided_slice %38 {offsets = [0, 0], sizes = [8, 128], strides = [1, 1]} : vector<8x512xf32> to vector<8x128xf32>
    %40 = arith.negf %39 : vector<8x128xf32>
    %41 = math.exp %40 : vector<8x128xf32>
    %cst_15 = arith.constant 1.000000e+00 : f32
    %42 = vector.broadcast %cst_15 : f32 to vector<8x128xf32>
    %43 = arith.addf %42, %41 : vector<8x128xf32>
    %44 = arith.divf %42, %43 : vector<8x128xf32>
    %45 = vector.extract_strided_slice %38 {offsets = [0, 128], sizes = [8, 128], strides = [1, 1]} : vector<8x512xf32> to vector<8x128xf32>
    %46 = arith.negf %45 : vector<8x128xf32>
    %47 = math.exp %46 : vector<8x128xf32>
    %cst_16 = arith.constant 1.000000e+00 : f32
    %48 = vector.broadcast %cst_16 : f32 to vector<8x128xf32>
    %49 = arith.addf %48, %47 : vector<8x128xf32>
    %50 = arith.divf %48, %49 : vector<8x128xf32>
    %51 = vector.extract_strided_slice %38 {offsets = [0, 256], sizes = [8, 128], strides = [1, 1]} : vector<8x512xf32> to vector<8x128xf32>
    %52 = math.tanh %51 : vector<8x128xf32>
    %53 = vector.extract_strided_slice %38 {offsets = [0, 384], sizes = [8, 128], strides = [1, 1]} : vector<8x512xf32> to vector<8x128xf32>
    %54 = arith.negf %53 : vector<8x128xf32>
    %55 = math.exp %54 : vector<8x128xf32>
    %cst_17 = arith.constant 1.000000e+00 : f32
    %56 = vector.broadcast %cst_17 : f32 to vector<8x128xf32>
    %57 = arith.addf %56, %55 : vector<8x128xf32>
    %58 = arith.divf %56, %57 : vector<8x128xf32>
    %59 = arith.mulf %50, %29 : vector<8x128xf32>
    %60 = arith.mulf %44, %52 : vector<8x128xf32>
    %61 = arith.addf %59, %60 : vector<8x128xf32>
    %62 = math.tanh %61 : vector<8x128xf32>
    %63 = arith.mulf %58, %62 : vector<8x128xf32>
    %c0_18 = arith.constant 0 : index
    %c1_19 = arith.constant 1 : index
    %c0_20 = arith.constant 0 : index
    %64 = vector.load %arg3[%c0_18, %c1_19, %c0_20] : memref<8x8x128xf32, #tpu.memory_space<vmem>>, vector<8x1x128xf32>
    %65 = vector.shape_cast %64 : vector<8x1x128xf32> to vector<8x128xf32>
    %66 = vector.shape_cast %63 : vector<8x128xf32> to vector<8x1x128xf32>
    tpu.vector_store %arg3[%c0_18, %c1_19, %c0_20], %66 {strides = array<i32>} : memref<8x8x128xf32, #tpu.memory_space<vmem>>, vector<8x1x128xf32>,
    %c0_21 = arith.constant 0 : index
    %c2 = arith.constant 2 : index
    %c0_22 = arith.constant 0 : index
    %67 = vector.load %arg1[%c0_21, %c2, %c0_22] : memref<8x8x512xf32, #tpu.memory_space<vmem>>, vector<8x1x512xf32>
    %68 = vector.shape_cast %67 : vector<8x1x512xf32> to vector<8x512xf32>
    %cst_23 = arith.constant dense<0.000000e+00> : vector<8x512xf32>
    %69 = tpu.matmul %63, %0, %cst_23 {dimension_numbers = #tpu.dot_dimension_numbers<[1], [0], [0], [1], [0, 0, 1, 1], [], []>} : vector<8x128xf32>, vector<128x512xf32>, vector<8x512xf32> -> vector<8x512xf32>
    %70 = arith.addf %68, %69 : vector<8x512xf32>
    %71 = vector.extract_strided_slice %70 {offsets = [0, 0], sizes = [8, 128], strides = [1, 1]} : vector<8x512xf32> to vector<8x128xf32>
    %72 = arith.negf %71 : vector<8x128xf32>
    %73 = math.exp %72 : vector<8x128xf32>
    %cst_24 = arith.constant 1.000000e+00 : f32
    %74 = vector.broadcast %cst_24 : f32 to vector<8x128xf32>
    %75 = arith.addf %74, %73 : vector<8x128xf32>
    %76 = arith.divf %74, %75 : vector<8x128xf32>
    %77 = vector.extract_strided_slice %70 {offsets = [0, 128], sizes = [8, 128], strides = [1, 1]} : vector<8x512xf32> to vector<8x128xf32>
    %78 = arith.negf %77 : vector<8x128xf32>
    %79 = math.exp %78 : vector<8x128xf32>
    %cst_25 = arith.constant 1.000000e+00 : f32
    %80 = vector.broadcast %cst_25 : f32 to vector<8x128xf32>
    %81 = arith.addf %80, %79 : vector<8x128xf32>
    %82 = arith.divf %80, %81 : vector<8x128xf32>
    %83 = vector.extract_strided_slice %70 {offsets = [0, 256], sizes = [8, 128], strides = [1, 1]} : vector<8x512xf32> to vector<8x128xf32>
    %84 = math.tanh %83 : vector<8x128xf32>
    %85 = vector.extract_strided_slice %70 {offsets = [0, 384], sizes = [8, 128], strides = [1, 1]} : vector<8x512xf32> to vector<8x128xf32>
    %86 = arith.negf %85 : vector<8x128xf32>
    %87 = math.exp %86 : vector<8x128xf32>
    %cst_26 = arith.constant 1.000000e+00 : f32
    %88 = vector.broadcast %cst_26 : f32 to vector<8x128xf32>
    %89 = arith.addf %88, %87 : vector<8x128xf32>
    %90 = arith.divf %88, %89 : vector<8x128xf32>
    %91 = arith.mulf %82, %61 : vector<8x128xf32>
    %92 = arith.mulf %76, %84 : vector<8x128xf32>
    %93 = arith.addf %91, %92 : vector<8x128xf32>
    %94 = math.tanh %93 : vector<8x128xf32>
    %95 = arith.mulf %90, %94 : vector<8x128xf32>
    %c0_27 = arith.constant 0 : index
    %c2_28 = arith.constant 2 : index
    %c0_29 = arith.constant 0 : index
    %96 = vector.load %arg3[%c0_27, %c2_28, %c0_29] : memref<8x8x128xf32, #tpu.memory_space<vmem>>, vector<8x1x128xf32>
    %97 = vector.shape_cast %96 : vector<8x1x128xf32> to vector<8x128xf32>
    %98 = vector.shape_cast %95 : vector<8x128xf32> to vector<8x1x128xf32>
    tpu.vector_store %arg3[%c0_27, %c2_28, %c0_29], %98 {strides = array<i32>} : memref<8x8x128xf32, #tpu.memory_space<vmem>>, vector<8x1x128xf32>,
    %c0_30 = arith.constant 0 : index
    %c3 = arith.constant 3 : index
    %c0_31 = arith.constant 0 : index
    %99 = vector.load %arg1[%c0_30, %c3, %c0_31] : memref<8x8x512xf32, #tpu.memory_space<vmem>>, vector<8x1x512xf32>
    %100 = vector.shape_cast %99 : vector<8x1x512xf32> to vector<8x512xf32>
    %cst_32 = arith.constant dense<0.000000e+00> : vector<8x512xf32>
    %101 = tpu.matmul %95, %0, %cst_32 {dimension_numbers = #tpu.dot_dimension_numbers<[1], [0], [0], [1], [0, 0, 1, 1], [], []>} : vector<8x128xf32>, vector<128x512xf32>, vector<8x512xf32> -> vector<8x512xf32>
    %102 = arith.addf %100, %101 : vector<8x512xf32>
    %103 = vector.extract_strided_slice %102 {offsets = [0, 0], sizes = [8, 128], strides = [1, 1]} : vector<8x512xf32> to vector<8x128xf32>
    %104 = arith.negf %103 : vector<8x128xf32>
    %105 = math.exp %104 : vector<8x128xf32>
    %cst_33 = arith.constant 1.000000e+00 : f32
    %106 = vector.broadcast %cst_33 : f32 to vector<8x128xf32>
    %107 = arith.addf %106, %105 : vector<8x128xf32>
    %108 = arith.divf %106, %107 : vector<8x128xf32>
    %109 = vector.extract_strided_slice %102 {offsets = [0, 128], sizes = [8, 128], strides = [1, 1]} : vector<8x512xf32> to vector<8x128xf32>
    %110 = arith.negf %109 : vector<8x128xf32>
    %111 = math.exp %110 : vector<8x128xf32>
    %cst_34 = arith.constant 1.000000e+00 : f32
    %112 = vector.broadcast %cst_34 : f32 to vector<8x128xf32>
    %113 = arith.addf %112, %111 : vector<8x128xf32>
    %114 = arith.divf %112, %113 : vector<8x128xf32>
    %115 = vector.extract_strided_slice %102 {offsets = [0, 256], sizes = [8, 128], strides = [1, 1]} : vector<8x512xf32> to vector<8x128xf32>
    %116 = math.tanh %115 : vector<8x128xf32>
    %117 = vector.extract_strided_slice %102 {offsets = [0, 384], sizes = [8, 128], strides = [1, 1]} : vector<8x512xf32> to vector<8x128xf32>
    %118 = arith.negf %117 : vector<8x128xf32>
    %119 = math.exp %118 : vector<8x128xf32>
    %cst_35 = arith.constant 1.000000e+00 : f32
    %120 = vector.broadcast %cst_35 : f32 to vector<8x128xf32>
    %121 = arith.addf %120, %119 : vector<8x128xf32>
    %122 = arith.divf %120, %121 : vector<8x128xf32>
    %123 = arith.mulf %114, %93 : vector<8x128xf32>
    %124 = arith.mulf %108, %116 : vector<8x128xf32>
    %125 = arith.addf %123, %124 : vector<8x128xf32>
    %126 = math.tanh %125 : vector<8x128xf32>
    %127 = arith.mulf %122, %126 : vector<8x128xf32>
    %c0_36 = arith.constant 0 : index
    %c3_37 = arith.constant 3 : index
    %c0_38 = arith.constant 0 : index
    %128 = vector.load %arg3[%c0_36, %c3_37, %c0_38] : memref<8x8x128xf32, #tpu.memory_space<vmem>>, vector<8x1x128xf32>
    %129 = vector.shape_cast %128 : vector<8x1x128xf32> to vector<8x128xf32>
    %130 = vector.shape_cast %127 : vector<8x128xf32> to vector<8x1x128xf32>
    tpu.vector_store %arg3[%c0_36, %c3_37, %c0_38], %130 {strides = array<i32>} : memref<8x8x128xf32, #tpu.memory_space<vmem>>, vector<8x1x128xf32>,
    %c0_39 = arith.constant 0 : index
    %c4 = arith.constant 4 : index
    %c0_40 = arith.constant 0 : index
    %131 = vector.load %arg1[%c0_39, %c4, %c0_40] : memref<8x8x512xf32, #tpu.memory_space<vmem>>, vector<8x1x512xf32>
    %132 = vector.shape_cast %131 : vector<8x1x512xf32> to vector<8x512xf32>
    %cst_41 = arith.constant dense<0.000000e+00> : vector<8x512xf32>
    %133 = tpu.matmul %127, %0, %cst_41 {dimension_numbers = #tpu.dot_dimension_numbers<[1], [0], [0], [1], [0, 0, 1, 1], [], []>} : vector<8x128xf32>, vector<128x512xf32>, vector<8x512xf32> -> vector<8x512xf32>
    %134 = arith.addf %132, %133 : vector<8x512xf32>
    %135 = vector.extract_strided_slice %134 {offsets = [0, 0], sizes = [8, 128], strides = [1, 1]} : vector<8x512xf32> to vector<8x128xf32>
    %136 = arith.negf %135 : vector<8x128xf32>
    %137 = math.exp %136 : vector<8x128xf32>
    %cst_42 = arith.constant 1.000000e+00 : f32
    %138 = vector.broadcast %cst_42 : f32 to vector<8x128xf32>
    %139 = arith.addf %138, %137 : vector<8x128xf32>
    %140 = arith.divf %138, %139 : vector<8x128xf32>
    %141 = vector.extract_strided_slice %134 {offsets = [0, 128], sizes = [8, 128], strides = [1, 1]} : vector<8x512xf32> to vector<8x128xf32>
    %142 = arith.negf %141 : vector<8x128xf32>
    %143 = math.exp %142 : vector<8x128xf32>
    %cst_43 = arith.constant 1.000000e+00 : f32
    %144 = vector.broadcast %cst_43 : f32 to vector<8x128xf32>
    %145 = arith.addf %144, %143 : vector<8x128xf32>
    %146 = arith.divf %144, %145 : vector<8x128xf32>
    %147 = vector.extract_strided_slice %134 {offsets = [0, 256], sizes = [8, 128], strides = [1, 1]} : vector<8x512xf32> to vector<8x128xf32>
    %148 = math.tanh %147 : vector<8x128xf32>
    %149 = vector.extract_strided_slice %134 {offsets = [0, 384], sizes = [8, 128], strides = [1, 1]} : vector<8x512xf32> to vector<8x128xf32>
    %150 = arith.negf %149 : vector<8x128xf32>
    %151 = math.exp %150 : vector<8x128xf32>
    %cst_44 = arith.constant 1.000000e+00 : f32
    %152 = vector.broadcast %cst_44 : f32 to vector<8x128xf32>
    %153 = arith.addf %152, %151 : vector<8x128xf32>
    %154 = arith.divf %152, %153 : vector<8x128xf32>
    %155 = arith.mulf %146, %125 : vector<8x128xf32>
    %156 = arith.mulf %140, %148 : vector<8x128xf32>
    %157 = arith.addf %155, %156 : vector<8x128xf32>
    %158 = math.tanh %157 : vector<8x128xf32>
    %159 = arith.mulf %154, %158 : vector<8x128xf32>
    %c0_45 = arith.constant 0 : index
    %c4_46 = arith.constant 4 : index
    %c0_47 = arith.constant 0 : index
    %160 = vector.load %arg3[%c0_45, %c4_46, %c0_47] : memref<8x8x128xf32, #tpu.memory_space<vmem>>, vector<8x1x128xf32>
    %161 = vector.shape_cast %160 : vector<8x1x128xf32> to vector<8x128xf32>
    %162 = vector.shape_cast %159 : vector<8x128xf32> to vector<8x1x128xf32>
    tpu.vector_store %arg3[%c0_45, %c4_46, %c0_47], %162 {strides = array<i32>} : memref<8x8x128xf32, #tpu.memory_space<vmem>>, vector<8x1x128xf32>,
    %c0_48 = arith.constant 0 : index
    %c5 = arith.constant 5 : index
    %c0_49 = arith.constant 0 : index
    %163 = vector.load %arg1[%c0_48, %c5, %c0_49] : memref<8x8x512xf32, #tpu.memory_space<vmem>>, vector<8x1x512xf32>
    %164 = vector.shape_cast %163 : vector<8x1x512xf32> to vector<8x512xf32>
    %cst_50 = arith.constant dense<0.000000e+00> : vector<8x512xf32>
    %165 = tpu.matmul %159, %0, %cst_50 {dimension_numbers = #tpu.dot_dimension_numbers<[1], [0], [0], [1], [0, 0, 1, 1], [], []>} : vector<8x128xf32>, vector<128x512xf32>, vector<8x512xf32> -> vector<8x512xf32>
    %166 = arith.addf %164, %165 : vector<8x512xf32>
    %167 = vector.extract_strided_slice %166 {offsets = [0, 0], sizes = [8, 128], strides = [1, 1]} : vector<8x512xf32> to vector<8x128xf32>
    %168 = arith.negf %167 : vector<8x128xf32>
    %169 = math.exp %168 : vector<8x128xf32>
    %cst_51 = arith.constant 1.000000e+00 : f32
    %170 = vector.broadcast %cst_51 : f32 to vector<8x128xf32>
    %171 = arith.addf %170, %169 : vector<8x128xf32>
    %172 = arith.divf %170, %171 : vector<8x128xf32>
    %173 = vector.extract_strided_slice %166 {offsets = [0, 128], sizes = [8, 128], strides = [1, 1]} : vector<8x512xf32> to vector<8x128xf32>
    %174 = arith.negf %173 : vector<8x128xf32>
    %175 = math.exp %174 : vector<8x128xf32>
    %cst_52 = arith.constant 1.000000e+00 : f32
    %176 = vector.broadcast %cst_52 : f32 to vector<8x128xf32>
    %177 = arith.addf %176, %175 : vector<8x128xf32>
    %178 = arith.divf %176, %177 : vector<8x128xf32>
    %179 = vector.extract_strided_slice %166 {offsets = [0, 256], sizes = [8, 128], strides = [1, 1]} : vector<8x512xf32> to vector<8x128xf32>
    %180 = math.tanh %179 : vector<8x128xf32>
    %181 = vector.extract_strided_slice %166 {offsets = [0, 384], sizes = [8, 128], strides = [1, 1]} : vector<8x512xf32> to vector<8x128xf32>
    %182 = arith.negf %181 : vector<8x128xf32>
    %183 = math.exp %182 : vector<8x128xf32>
    %cst_53 = arith.constant 1.000000e+00 : f32
    %184 = vector.broadcast %cst_53 : f32 to vector<8x128xf32>
    %185 = arith.addf %184, %183 : vector<8x128xf32>
    %186 = arith.divf %184, %185 : vector<8x128xf32>
    %187 = arith.mulf %178, %157 : vector<8x128xf32>
    %188 = arith.mulf %172, %180 : vector<8x128xf32>
    %189 = arith.addf %187, %188 : vector<8x128xf32>
    %190 = math.tanh %189 : vector<8x128xf32>
    %191 = arith.mulf %186, %190 : vector<8x128xf32>
    %c0_54 = arith.constant 0 : index
    %c5_55 = arith.constant 5 : index
    %c0_56 = arith.constant 0 : index
    %192 = vector.load %arg3[%c0_54, %c5_55, %c0_56] : memref<8x8x128xf32, #tpu.memory_space<vmem>>, vector<8x1x128xf32>
    %193 = vector.shape_cast %192 : vector<8x1x128xf32> to vector<8x128xf32>
    %194 = vector.shape_cast %191 : vector<8x128xf32> to vector<8x1x128xf32>
    tpu.vector_store %arg3[%c0_54, %c5_55, %c0_56], %194 {strides = array<i32>} : memref<8x8x128xf32, #tpu.memory_space<vmem>>, vector<8x1x128xf32>,
    %c0_57 = arith.constant 0 : index
    %c6 = arith.constant 6 : index
    %c0_58 = arith.constant 0 : index
    %195 = vector.load %arg1[%c0_57, %c6, %c0_58] : memref<8x8x512xf32, #tpu.memory_space<vmem>>, vector<8x1x512xf32>
    %196 = vector.shape_cast %195 : vector<8x1x512xf32> to vector<8x512xf32>
    %cst_59 = arith.constant dense<0.000000e+00> : vector<8x512xf32>
    %197 = tpu.matmul %191, %0, %cst_59 {dimension_numbers = #tpu.dot_dimension_numbers<[1], [0], [0], [1], [0, 0, 1, 1], [], []>} : vector<8x128xf32>, vector<128x512xf32>, vector<8x512xf32> -> vector<8x512xf32>
    %198 = arith.addf %196, %197 : vector<8x512xf32>
    %199 = vector.extract_strided_slice %198 {offsets = [0, 0], sizes = [8, 128], strides = [1, 1]} : vector<8x512xf32> to vector<8x128xf32>
    %200 = arith.negf %199 : vector<8x128xf32>
    %201 = math.exp %200 : vector<8x128xf32>
    %cst_60 = arith.constant 1.000000e+00 : f32
    %202 = vector.broadcast %cst_60 : f32 to vector<8x128xf32>
    %203 = arith.addf %202, %201 : vector<8x128xf32>
    %204 = arith.divf %202, %203 : vector<8x128xf32>
    %205 = vector.extract_strided_slice %198 {offsets = [0, 128], sizes = [8, 128], strides = [1, 1]} : vector<8x512xf32> to vector<8x128xf32>
    %206 = arith.negf %205 : vector<8x128xf32>
    %207 = math.exp %206 : vector<8x128xf32>
    %cst_61 = arith.constant 1.000000e+00 : f32
    %208 = vector.broadcast %cst_61 : f32 to vector<8x128xf32>
    %209 = arith.addf %208, %207 : vector<8x128xf32>
    %210 = arith.divf %208, %209 : vector<8x128xf32>
    %211 = vector.extract_strided_slice %198 {offsets = [0, 256], sizes = [8, 128], strides = [1, 1]} : vector<8x512xf32> to vector<8x128xf32>
    %212 = math.tanh %211 : vector<8x128xf32>
    %213 = vector.extract_strided_slice %198 {offsets = [0, 384], sizes = [8, 128], strides = [1, 1]} : vector<8x512xf32> to vector<8x128xf32>
    %214 = arith.negf %213 : vector<8x128xf32>
    %215 = math.exp %214 : vector<8x128xf32>
    %cst_62 = arith.constant 1.000000e+00 : f32
    %216 = vector.broadcast %cst_62 : f32 to vector<8x128xf32>
    %217 = arith.addf %216, %215 : vector<8x128xf32>
    %218 = arith.divf %216, %217 : vector<8x128xf32>
    %219 = arith.mulf %210, %189 : vector<8x128xf32>
    %220 = arith.mulf %204, %212 : vector<8x128xf32>
    %221 = arith.addf %219, %220 : vector<8x128xf32>
    %222 = math.tanh %221 : vector<8x128xf32>
    %223 = arith.mulf %218, %222 : vector<8x128xf32>
    %c0_63 = arith.constant 0 : index
    %c6_64 = arith.constant 6 : index
    %c0_65 = arith.constant 0 : index
    %224 = vector.load %arg3[%c0_63, %c6_64, %c0_65] : memref<8x8x128xf32, #tpu.memory_space<vmem>>, vector<8x1x128xf32>
    %225 = vector.shape_cast %224 : vector<8x1x128xf32> to vector<8x128xf32>
    %226 = vector.shape_cast %223 : vector<8x128xf32> to vector<8x1x128xf32>
    tpu.vector_store %arg3[%c0_63, %c6_64, %c0_65], %226 {strides = array<i32>} : memref<8x8x128xf32, #tpu.memory_space<vmem>>, vector<8x1x128xf32>,
    %c0_66 = arith.constant 0 : index
    %c7 = arith.constant 7 : index
    %c0_67 = arith.constant 0 : index
    %227 = vector.load %arg1[%c0_66, %c7, %c0_67] : memref<8x8x512xf32, #tpu.memory_space<vmem>>, vector<8x1x512xf32>
    %228 = vector.shape_cast %227 : vector<8x1x512xf32> to vector<8x512xf32>
    %cst_68 = arith.constant dense<0.000000e+00> : vector<8x512xf32>
    %229 = tpu.matmul %223, %0, %cst_68 {dimension_numbers = #tpu.dot_dimension_numbers<[1], [0], [0], [1], [0, 0, 1, 1], [], []>} : vector<8x128xf32>, vector<128x512xf32>, vector<8x512xf32> -> vector<8x512xf32>
    %230 = arith.addf %228, %229 : vector<8x512xf32>
    %231 = vector.extract_strided_slice %230 {offsets = [0, 0], sizes = [8, 128], strides = [1, 1]} : vector<8x512xf32> to vector<8x128xf32>
    %232 = arith.negf %231 : vector<8x128xf32>
    %233 = math.exp %232 : vector<8x128xf32>
    %cst_69 = arith.constant 1.000000e+00 : f32
    %234 = vector.broadcast %cst_69 : f32 to vector<8x128xf32>
    %235 = arith.addf %234, %233 : vector<8x128xf32>
    %236 = arith.divf %234, %235 : vector<8x128xf32>
    %237 = vector.extract_strided_slice %230 {offsets = [0, 128], sizes = [8, 128], strides = [1, 1]} : vector<8x512xf32> to vector<8x128xf32>
    %238 = arith.negf %237 : vector<8x128xf32>
    %239 = math.exp %238 : vector<8x128xf32>
    %cst_70 = arith.constant 1.000000e+00 : f32
    %240 = vector.broadcast %cst_70 : f32 to vector<8x128xf32>
    %241 = arith.addf %240, %239 : vector<8x128xf32>
    %242 = arith.divf %240, %241 : vector<8x128xf32>
    %243 = vector.extract_strided_slice %230 {offsets = [0, 256], sizes = [8, 128], strides = [1, 1]} : vector<8x512xf32> to vector<8x128xf32>
    %244 = math.tanh %243 : vector<8x128xf32>
    %245 = vector.extract_strided_slice %230 {offsets = [0, 384], sizes = [8, 128], strides = [1, 1]} : vector<8x512xf32> to vector<8x128xf32>
    %246 = arith.negf %245 : vector<8x128xf32>
    %247 = math.exp %246 : vector<8x128xf32>
    %cst_71 = arith.constant 1.000000e+00 : f32
    %248 = vector.broadcast %cst_71 : f32 to vector<8x128xf32>
    %249 = arith.addf %248, %247 : vector<8x128xf32>
    %250 = arith.divf %248, %249 : vector<8x128xf32>
    %251 = arith.mulf %242, %221 : vector<8x128xf32>
    %252 = arith.mulf %236, %244 : vector<8x128xf32>
    %253 = arith.addf %251, %252 : vector<8x128xf32>
    %254 = math.tanh %253 : vector<8x128xf32>
    %255 = arith.mulf %250, %254 : vector<8x128xf32>
    %c0_72 = arith.constant 0 : index
    %c7_73 = arith.constant 7 : index
    %c0_74 = arith.constant 0 : index
    %256 = vector.load %arg3[%c0_72, %c7_73, %c0_74] : memref<8x8x128xf32, #tpu.memory_space<vmem>>, vector<8x1x128xf32>
    %257 = vector.shape_cast %256 : vector<8x1x128xf32> to vector<8x128xf32>
    %258 = vector.shape_cast %255 : vector<8x128xf32> to vector<8x1x128xf32>
    tpu.vector_store %arg3[%c0_72, %c7_73, %c0_74], %258 {strides = array<i32>} : memref<8x8x128xf32, #tpu.memory_space<vmem>>, vector<8x1x128xf32>,
    return
  }
  func.func @transform_0(%arg0: i32) -> (i32, i32, i32) {
    %c0_i32 = arith.constant 0 : i32
    %c0_i32_0 = arith.constant 0 : i32
    %c0_i32_1 = arith.constant 0 : i32
    %c0_i32_2 = arith.constant 0 : i32
    return %c0_i32, %c0_i32_0, %c0_i32_1 : i32, i32, i32
  }
  func.func @transform_1(%arg0: i32) -> (i32, i32) {
    %c0_i32 = arith.constant 0 : i32
    %c0_i32_0 = arith.constant 0 : i32
    %c0_i32_1 = arith.constant 0 : i32
    return %c0_i32, %c0_i32_0 : i32, i32
  }
  func.func @transform_2(%arg0: i32) -> (i32, i32, i32) {
    %c0_i32 = arith.constant 0 : i32
    %c0_i32_0 = arith.constant 0 : i32
    %c0_i32_1 = arith.constant 0 : i32
    %c0_i32_2 = arith.constant 0 : i32
    return %c0_i32, %c0_i32_0, %c0_i32_1 : i32, i32, i32
  }
}

</mosaic_0001>

<bundles_post_ra>
// kernel: decoder_forward.5
= control target key start
LH: loop header
LB: loop body
LE: loop exit
PB: predicated region body
PF: predicated region fallthrough
CT: control target
= control target key end

     0   :  { %s402_s0 = inlined_call_operand.vmem [shape: f32[64,128], index: 0, kind: input, shape index: {}]   ;;  %s403_s1 = inlined_call_operand.vmem [shape: f32[128,128], index: 1, kind: input, shape index: {}]   ;;  %s404_s2 = inlined_call_operand.vmem [shape: f32[1,128], index: 2, kind: input, shape index: {}]   ;;  %s405_s3 = inlined_call_operand.hbm [shape: f32[64,128], index: 3, kind: output, shape index: {}]  }
   0x1   :  { %v38_v0 = vld [vmem:[%s403_s1 + $0x78] sm:$0xff]  ;;  %v37_v1 = vld [vmem:[%s403_s1 + $0x70] sm:$0xff]  ;;  %v36_v2 = vld [vmem:[%s403_s1 + $0x68] sm:$0xff] }
   0x2   :  { %200 = vmatprep.subr.mxu0 %v38_v0  ;;  %244 = vmatprep.subr.mxu1 %v38_v0  ;;  %v35_v3 = vld [vmem:[%s403_s1 + $0x60] sm:$0xff]  ;;  %v34_v4 = vld [vmem:[%s403_s1 + $0x58] sm:$0xff]  ;;  %v33_v5 = vld [vmem:[%s403_s1 + $0x50] sm:$0xff] }
   0x3   :  { %201 = vmatpush3.msra.mxu0 %v38_v0  ;;  %260 = vmatpush3.msra.mxu1 %v38_v0 }
   0x4   :  { %202 = vmatprep.subr.mxu0 %v37_v1  ;;  %245 = vmatprep.subr.mxu1 %v37_v1 }
   0x5   :  { %203 = vmatpush3.msra.mxu0 %v37_v1  ;;  %261 = vmatpush3.msra.mxu1 %v37_v1 }
   0x6   :  { %204 = vmatprep.subr.mxu0 %v36_v2  ;;  %246 = vmatprep.subr.mxu1 %v36_v2 }
   0x7   :  { %205 = vmatpush3.msra.mxu0 %v36_v2  ;;  %262 = vmatpush3.msra.mxu1 %v36_v2 }
   0x8   :  { %206 = vmatprep.subr.mxu0 %v35_v3  ;;  %247 = vmatprep.subr.mxu1 %v35_v3 }
   0x9   :  { %207 = vmatpush3.msra.mxu0 %v35_v3  ;;  %263 = vmatpush3.msra.mxu1 %v35_v3 }
   0xa   :  { %8 = vsyncpa [#allocation3], 0  ;;  %208 = vmatprep.subr.mxu0 %v34_v4  ;;  %248 = vmatprep.subr.mxu1 %v34_v4  ;;  %v32_v6 = vld [vmem:[%s403_s1 + $0x48] sm:$0xff]  ;;  %v31_v7 = vld [vmem:[%s403_s1 + $0x40] sm:$0xff]  ;;  %s301_s7 = smov [#allocation2]  }
   0xb   :  { %209 = vmatpush3.msra.mxu0 %v34_v4  ;;  %264 = vmatpush3.msra.mxu1 %v34_v4  ;;  %v30_v8 = vld [vmem:[%s403_s1 + $0x38] sm:$0xff]  ;;  %v29_v9 = vld [vmem:[%s403_s1 + $0x30] sm:$0xff]  ;;  %v28_v10 = vld [vmem:[%s403_s1 + $0x28] sm:$0xff]  ;;  %s164_s8 = sshll.u32 %s301_s7, 4  ;;  %s165_s8 = int_to_ptr.vmem [resolvable:$true] %s164_s8 }
   0xc   :  { %210 = vmatprep.subr.mxu0 %v33_v5  ;;  %249 = vmatprep.subr.mxu1 %v33_v5  ;;  %v27_v11 = vld [vmem:[%s403_s1 + $0x20] sm:$0xff]  ;;  %v26_v12 = vld [vmem:[%s403_s1 + $0x18] sm:$0xff]  ;;  %v25_v13 = vld [vmem:[%s403_s1 + $0x10] sm:$0xff]  ;;  %p284_p1 = scmp.lt.s32.totalorder %s165_s8, %s165_s8 }
   0xd   :  { %211 = vmatpush3.msra.mxu0 %v33_v5  ;;  %265 = vmatpush3.msra.mxu1 %v33_v5  ;;  %v24_v14 = vld [vmem:[%s403_s1 + $0x8] sm:$0xff]  ;;  %v23_v15 = vld [vmem:[%s403_s1] sm:$0xff]  ;;  %v17_v20 = vld [vmem:[%s402_s0 + $0x10] sm:$0xff] }
   0xe   :  { %212 = vmatprep.subr.mxu0 %v32_v6  ;;  %250 = vmatprep.subr.mxu1 %v32_v6  ;;  %v15_v16 = vld [vmem:[%s402_s0] sm:$0xff]  ;;  %v16_v18 = vld [vmem:[%s402_s0 + $0x8] sm:$0xff]  ;;  %v21_v21 = vld [vmem:[%s402_s0 + $0x30] sm:$0xff] }
   0xf   :  { %213 = vmatpush3.msra.mxu0 %v32_v6  ;;  %266 = vmatpush3.msra.mxu1 %v32_v6  ;;  %v19_v17 = vld [vmem:[%s402_s0 + $0x20] sm:$0xff]  ;;  %v20_v19 = vld [vmem:[%s402_s0 + $0x28] sm:$0xff]  ;;  %v18_v22 = vld [vmem:[%s402_s0 + $0x18] sm:$0xff] }
  0x10   :  { %214 = vmatprep.subr.mxu0 %v31_v7  ;;  %251 = vmatprep.subr.mxu1 %v31_v7  ;;  %v22_v23 = vld [vmem:[%s402_s0 + $0x38] sm:$0xff]  ;;  %v175_v24 = vld [vmem:[%s404_s2] ss:$0 sm:$0xff]  ;;  %s279_s0 = scalar_lea.vmem %s165_s8, 1024 }
  0x11   :  { %215 = vmatpush3.msra.mxu0 %v31_v7  ;;  %267 = vmatpush3.msra.mxu1 %v31_v7  ;;  %p280_p0 = scmp.ne.s32.totalorder %s165_s8, %s279_s0  ;;  %p285_p2 = scmp.lt.s32.totalorder %s279_s0, %s279_s0 }
  0x12   :  { %216 = vmatprep.subr.mxu0 %v30_v8  ;;  %252 = vmatprep.subr.mxu1 %v30_v8 }
  0x13   :  { %217 = vmatpush3.msra.mxu0 %v30_v8  ;;  %268 = vmatpush3.msra.mxu1 %v30_v8  ;;  %p286_p3 = por %p285_p2, %p284_p1 }
  0x14   :  { %218 = vmatprep.subr.mxu0 %v29_v9  ;;  %253 = vmatprep.subr.mxu1 %v29_v9 }
  0x15   :  { %219 = vmatpush3.msra.mxu0 %v29_v9  ;;  %269 = vmatpush3.msra.mxu1 %v29_v9  ;;  %p287_p4 = pnand %p286_p3, %p280_p0 }
  0x16   :  { %220 = vmatprep.subr.mxu0 %v28_v10  ;;  %254 = vmatprep.subr.mxu1 %v28_v10 }
  0x17   :  { %221 = vmatpush3.msra.mxu0 %v28_v10  ;;  %270 = vmatpush3.msra.mxu1 %v28_v10 }
  0x18   :  { %222 = vmatprep.subr.mxu0 %v27_v11  ;;  %255 = vmatprep.subr.mxu1 %v27_v11 }
  0x19   :  { %223 = vmatpush3.msra.mxu0 %v27_v11  ;;  %271 = vmatpush3.msra.mxu1 %v27_v11 }
  0x1a   :  { %224 = vmatprep.subr.mxu0 %v26_v12  ;;  %256 = vmatprep.subr.mxu1 %v26_v12 }
  0x1b   :  { %225 = vmatpush3.msra.mxu0 %v26_v12  ;;  %272 = vmatpush3.msra.mxu1 %v26_v12 }
  0x1c   :  { %226 = vmatprep.subr.mxu0 %v25_v13  ;;  %257 = vmatprep.subr.mxu1 %v25_v13 }
  0x1d   :  { %227 = vmatpush3.msra.mxu0 %v25_v13  ;;  %273 = vmatpush3.msra.mxu1 %v25_v13 }
  0x1e   :  { %228 = vmatprep.subr.mxu0 %v24_v14  ;;  %258 = vmatprep.subr.mxu1 %v24_v14 }
  0x1f   :  { %229 = vmatpush3.msra.mxu0 %v24_v14  ;;  %274 = vmatpush3.msra.mxu1 %v24_v14 }
  0x20   :  { %230 = vmatprep.subr.mxu0 %v23_v15  ;;  %259 = vmatprep.subr.mxu1 %v23_v15 }
  0x21   :  { %231 = vmatpush3.msra.mxu0 %v23_v15  ;;  %275 = vmatpush3.msra.mxu1 %v23_v15 }
  0x22   :  { %232 = vmatprep.mubr.f32.mxu0 %v15_v16  ;;  %238 = vmatprep.mubr.f32.mxu1 %v19_v17 }
  0x23   :  { %233 = vmatmul.mubr.f32.vlgmr.msra.gmra.mxu0 %v16_v18  ;;  %239 = vmatmul.mubr.f32.vlgmr.msra.gmra.mxu1 %v20_v19 }
  0x24   :  { %235 = vmatprep.mubr.f32.mxu0 %v17_v20  ;;  %241 = vmatprep.mubr.f32.mxu1 %v21_v21 }
  0x27   :  { %236 = vmatmul.mubr.f32.gmra.mxu0 %v18_v22  ;;  %242 = vmatmul.mubr.f32.gmra.mxu1 %v22_v23 }
  0xe3   :  { %v234_v25 = vpop.f32.mrf.mxu0  ;;  %v240_v26 = vpop.f32.mrf.mxu1 }
  0xe4   :  { %v118_v27 = vadd.f32 %v234_v25, %v175_v24  ;;  %v138_v28 = vadd.f32 %v240_v26, %v175_v24 }
  0xe5   :  { %v112_v29 = vpop.f32.mrf.mxu0  ;;  %v132_v30 = vpop.f32.mrf.mxu1 }
  0xe6   :  { %152 = vst [vmem:[#allocation2 + $0x8] sm:$0xff] %v118_v27  ;;  %156 = vst [vmem:[#allocation2 + $0x28] sm:$0xff] %v138_v28  ;;  %v113_v31 = vadd.f32 %v175_v24, %v112_v29  ;;  %v133_v32 = vadd.f32 %v175_v24, %v132_v30 }
  0xe7   :  { %v237_v33 = vpop.f32.mrf.mxu0  ;;  %v243_v34 = vpop.f32.mrf.mxu1 }
  0xe8   :  { %151 = vst [vmem:[#allocation2] sm:$0xff] %v113_v31  ;;  %155 = vst [vmem:[#allocation2 + $0x20] sm:$0xff] %v133_v32  ;;  %v128_v35 = vadd.f32 %v237_v33, %v175_v24  ;;  %v148_v36 = vadd.f32 %v243_v34, %v175_v24 }
  0xe9   :  { %v122_v37 = vpop.f32.mrf.mxu0  ;;  %v142_v38 = vpop.f32.mrf.mxu1 }
  0xea   :  { %154 = vst [vmem:[#allocation2 + $0x18] sm:$0xff] %v128_v35  ;;  %158 = vst [vmem:[#allocation2 + $0x38] sm:$0xff] %v148_v36  ;;  %v123_v39 = vadd.f32 %v175_v24, %v122_v37  ;;  %v143_v40 = vadd.f32 %v175_v24, %v142_v38 }
  0xec   :  { %153 = vst [vmem:[#allocation2 + $0x10] sm:$0xff] %v123_v39  ;;  %157 = vst [vmem:[#allocation2 + $0x30] sm:$0xff] %v143_v40 }
  0xed   :  { %290 = shalt.err (!%p287_p4)
}
  0xee   :  { %s302_s2 = smov 128   ;;  %s303_s9 = smov 8  }
  0xef   :  { %170 = dma.vmem_to_hbm [thread:$0]  %s165_s8, 1024, %s405_s3, [#allocation3], %s302_s2, %s302_s2, %s303_s9  }
  0xf0   :  { %299 = dma.done.wait [#allocation3], 1024  }
  0xf1   :  { %300 = vsyncadd [#allocation3], 4294966272 }
  0xf2   :  { %174 = vsyncpa [#allocation3], 1 }

// kernel: decoder_forward.3
= control target key start
LH: loop header
LB: loop body
LE: loop exit
PB: predicated region body
PF: predicated region fallthrough
CT: control target
= control target key end

     0   :  { %v364_v3 = vmov 0.0   ;;  %vm60_vm0 = vcmask 261120   ;;  %v40_v25 = vlaneseq  ;;  %s628_s1 = inlined_call_operand.vmem [shape: f32[32,512], index: 1, kind: input, shape index: {}]   ;;  %s629_s0 = inlined_call_operand.vmem [shape: f32[64,32], index: 0, kind: input, shape index: {}]   ;;  %s630_s2 = inlined_call_operand.vmem [shape: f32[1,512], index: 2, kind: input, shape index: {}]   ;;  %s631_s3 = inlined_call_operand.vmem [shape: f32[64,512], index: 3, kind: output, shape index: {}]  }
   0x1   :  { %v35_v0 = vld [vmem:[%s628_s1 + $0x68] sm:$0xff]  ;;  %v37_v1 = vld [vmem:[%s628_s1 + $0x78] sm:$0xff]  ;;  %v34_v2 = vld [vmem:[%s628_s1 + $0x60] sm:$0xff]  ;;  %149 = vmatprep.mubr.f32.mxu0 %v364_v3  ;;  %262 = vmatprep.mubr.f32.mxu1 %v364_v3 }
   0x2   :  { %109 = vmatprep.subr.mxu0 %v35_v0  ;;  %222 = vmatprep.subr.mxu1 %v37_v1  ;;  %v36_v4 = vld [vmem:[%s628_s1 + $0x70] sm:$0xff]  ;;  %v31_v5 = vld [vmem:[%s628_s1 + $0x48] sm:$0xff]  ;;  %v33_v6 = vld [vmem:[%s628_s1 + $0x58] sm:$0xff]  ;;  %v41_v26 = vshrl.u32 %v40_v25, 7 }
   0x3   :  { %110 = vmatpush1.msra.mxu0 %v34_v2  ;;  %223 = vmatpush1.msra.mxu1 %v36_v4  ;;  %v30_v7 = vld [vmem:[%s628_s1 + $0x40] sm:$0xff]  ;;  %v32_v8 = vld [vmem:[%s628_s1 + $0x50] sm:$0xff]  ;;  %v27_v9 = vld [vmem:[%s628_s1 + $0x28] sm:$0xff] }
   0x4   :  { %111 = vmatprep.subr.mxu0 %v31_v5  ;;  %224 = vmatprep.subr.mxu1 %v33_v6  ;;  %v29_v10 = vld [vmem:[%s628_s1 + $0x38] sm:$0xff]  ;;  %v26_v11 = vld [vmem:[%s628_s1 + $0x20] sm:$0xff]  ;;  %v28_v12 = vld [vmem:[%s628_s1 + $0x30] sm:$0xff]  ;;  %v42_v27 = vsub.s32 0, %v41_v26  ;;  %v50_v28 = vsub.s32 2, %v41_v26  ;;  %v46_v30 = vsub.s32 1, %v41_v26 }
   0x5   :  { %112 = vmatpush1.msra.mxu0 %v30_v7  ;;  %225 = vmatpush1.msra.mxu1 %v32_v8  ;;  %v23_v13 = vld [vmem:[%s628_s1 + $0x8] sm:$0xff]  ;;  %v25_v14 = vld [vmem:[%s628_s1 + $0x18] sm:$0xff]  ;;  %v22_v15 = vld [vmem:[%s628_s1] sm:$0xff]  ;;  %v54_v31 = vsub.s32 3, %v41_v26 }
   0x6   :  { %113 = vmatprep.subr.mxu0 %v27_v9  ;;  %226 = vmatprep.subr.mxu1 %v29_v10  ;;  %v24_v16 = vld [vmem:[%s628_s1 + $0x10] sm:$0xff]  ;;  %v14_v17 = vld [vmem:[%s629_s0] sm:$0xff]  ;;  %v15_v18 = vld [vmem:[%s629_s0 + $0x8] sm:$0xff] }
   0x7   :  { %114 = vmatpush1.msra.mxu0 %v26_v11  ;;  %227 = vmatpush1.msra.mxu1 %v28_v12  ;;  %v16_v19 = vld [vmem:[%s629_s0 + $0x10] sm:$0xff]  ;;  %v17_v20 = vld [vmem:[%s629_s0 + $0x18] sm:$0xff]  ;;  %v18_v21 = vld [vmem:[%s629_s0 + $0x20] sm:$0xff] }
   0x8   :  { %115 = vmatprep.subr.mxu0 %v23_v13  ;;  %228 = vmatprep.subr.mxu1 %v25_v14  ;;  %v19_v22 = vld [vmem:[%s629_s0 + $0x28] sm:$0xff]  ;;  %v20_v23 = vld [vmem:[%s629_s0 + $0x30] sm:$0xff]  ;;  %v21_v24 = vld [vmem:[%s629_s0 + $0x38] sm:$0xff] }
   0x9   :  { %116 = vmatpush1.msra.mxu0 %v22_v15  ;;  %229 = vmatpush1.msra.mxu1 %v24_v16  ;;  %v38_v29 = vld [vmem:[%s630_s2] sm:$0xf] }
   0xa   :  { %347 = vmatmul.mubr.msk.f32.vlgmr.msra.gmra.mxu0 %vm60_vm0, %v14_v17  ;;  %355 = vmatmul.mubr.msk.f32.vlgmr.msra.gmra.mxu1 %vm60_vm0, %v14_v17  ;;  %v492_v32 = vrot.slane %v38_v29, %v42_v27  ;;  %v494_v33 = vrot.slane %v38_v29, %v50_v28  ;;  %v496_v34 = vrot.slane %v38_v29, %v46_v30 }
   0xb   :  { %155 = vmatprep.mubr.f32.mxu0 %v364_v3  ;;  %268 = vmatprep.mubr.f32.mxu1 %v364_v3  ;;  %v498_v35 = vrot.slane %v38_v29, %v54_v31 }
   0xe   :  { %348 = vmatmul.mubr.msk.f32.gmra.mxu0 %vm60_vm0, %v15_v18  ;;  %356 = vmatmul.mubr.msk.f32.gmra.mxu1 %vm60_vm0, %v15_v18 }
   0xf   :  { %161 = vmatprep.mubr.f32.mxu0 %v364_v3  ;;  %274 = vmatprep.mubr.f32.mxu1 %v364_v3 }
  0x12   :  { %349 = vmatmul.mubr.msk.f32.gmra.mxu0 %vm60_vm0, %v16_v19  ;;  %357 = vmatmul.mubr.msk.f32.gmra.mxu1 %vm60_vm0, %v16_v19 }
  0x13   :  { %167 = vmatprep.mubr.f32.mxu0 %v364_v3  ;;  %280 = vmatprep.mubr.f32.mxu1 %v364_v3 }
  0x16   :  { %350 = vmatmul.mubr.msk.f32.gmra.mxu0 %vm60_vm0, %v17_v20  ;;  %358 = vmatmul.mubr.msk.f32.gmra.mxu1 %vm60_vm0, %v17_v20 }
  0x17   :  { %173 = vmatprep.mubr.f32.mxu0 %v364_v3  ;;  %286 = vmatprep.mubr.f32.mxu1 %v364_v3 }
  0x1a   :  { %351 = vmatmul.mubr.msk.f32.gmra.mxu0 %vm60_vm0, %v18_v21  ;;  %359 = vmatmul.mubr.msk.f32.gmra.mxu1 %vm60_vm0, %v18_v21 }
  0x1b   :  { %179 = vmatprep.mubr.f32.mxu0 %v364_v3  ;;  %292 = vmatprep.mubr.f32.mxu1 %v364_v3 }
  0x1e   :  { %352 = vmatmul.mubr.msk.f32.gmra.mxu0 %vm60_vm0, %v19_v22  ;;  %360 = vmatmul.mubr.msk.f32.gmra.mxu1 %vm60_vm0, %v19_v22 }
  0x1f   :  { %185 = vmatprep.mubr.f32.mxu0 %v364_v3  ;;  %298 = vmatprep.mubr.f32.mxu1 %v364_v3 }
  0x22   :  { %353 = vmatmul.mubr.msk.f32.gmra.mxu0 %vm60_vm0, %v20_v23  ;;  %361 = vmatmul.mubr.msk.f32.gmra.mxu1 %vm60_vm0, %v20_v23 }
  0x23   :  { %191 = vmatprep.mubr.f32.mxu0 %v364_v3  ;;  %304 = vmatprep.mubr.f32.mxu1 %v364_v3 }
  0x26   :  { %354 = vmatmul.mubr.msk.f32.gmra.mxu0 %vm60_vm0, %v21_v24  ;;  %362 = vmatmul.mubr.msk.f32.gmra.mxu1 %vm60_vm0, %v21_v24 }
  0xca   :  { %v151_v36 = vpop.f32.mrf.mxu0  ;;  %v264_v37 = vpop.f32.mrf.mxu1 }
  0xcb   :  { %v152_v38 = vadd.f32 %v151_v36, %v492_v32  ;;  %v265_v39 = vadd.f32 %v264_v37, %v494_v33 }
  0xcc   :  { %v153_v40 = vpop.f32.mrf.mxu0  ;;  %v266_v41 = vpop.f32.mrf.mxu1 }
  0xcd   :  { %311 = vst [vmem:[%s631_s3] sm:$0xff] %v152_v38  ;;  %313 = vst [vmem:[%s631_s3 + $0x10] sm:$0xff] %v265_v39  ;;  %v154_v42 = vadd.f32 %v153_v40, %v496_v34  ;;  %v267_v43 = vadd.f32 %v266_v41, %v498_v35 }
  0xce   :  { %v157_v44 = vpop.f32.mrf.mxu0  ;;  %v270_v45 = vpop.f32.mrf.mxu1 }
  0xcf   :  { %312 = vst [vmem:[%s631_s3 + $0x8] sm:$0xff] %v154_v42  ;;  %314 = vst [vmem:[%s631_s3 + $0x18] sm:$0xff] %v267_v43  ;;  %v158_v46 = vadd.f32 %v157_v44, %v492_v32  ;;  %v271_v47 = vadd.f32 %v270_v45, %v494_v33 }
  0xd0   :  { %v159_v48 = vpop.f32.mrf.mxu0  ;;  %v272_v49 = vpop.f32.mrf.mxu1 }
  0xd1   :  { %315 = vst [vmem:[%s631_s3 + $0x20] sm:$0xff] %v158_v46  ;;  %317 = vst [vmem:[%s631_s3 + $0x30] sm:$0xff] %v271_v47  ;;  %v160_v50 = vadd.f32 %v159_v48, %v496_v34  ;;  %v273_v51 = vadd.f32 %v272_v49, %v498_v35 }
  0xd2   :  { %v163_v52 = vpop.f32.mrf.mxu0  ;;  %v276_v53 = vpop.f32.mrf.mxu1 }
  0xd3   :  { %316 = vst [vmem:[%s631_s3 + $0x28] sm:$0xff] %v160_v50  ;;  %318 = vst [vmem:[%s631_s3 + $0x38] sm:$0xff] %v273_v51  ;;  %v164_v54 = vadd.f32 %v163_v52, %v492_v32  ;;  %v277_v55 = vadd.f32 %v276_v53, %v494_v33 }
  0xd4   :  { %v165_v56 = vpop.f32.mrf.mxu0  ;;  %v278_v57 = vpop.f32.mrf.mxu1 }
  0xd5   :  { %319 = vst [vmem:[%s631_s3 + $0x40] sm:$0xff] %v164_v54  ;;  %321 = vst [vmem:[%s631_s3 + $0x50] sm:$0xff] %v277_v55  ;;  %v166_v58 = vadd.f32 %v165_v56, %v496_v34  ;;  %v279_v59 = vadd.f32 %v278_v57, %v498_v35 }
  0xd6   :  { %v169_v60 = vpop.f32.mrf.mxu0  ;;  %v282_v61 = vpop.f32.mrf.mxu1 }
  0xd7   :  { %320 = vst [vmem:[%s631_s3 + $0x48] sm:$0xff] %v166_v58  ;;  %322 = vst [vmem:[%s631_s3 + $0x58] sm:$0xff] %v279_v59  ;;  %v170_v62 = vadd.f32 %v169_v60, %v492_v32  ;;  %v283_v63 = vadd.f32 %v282_v61, %v494_v33 }
  0xd8   :  { %v171_v0 = vpop.f32.mrf.mxu0  ;;  %v284_v1 = vpop.f32.mrf.mxu1 }
  0xd9   :  { %323 = vst [vmem:[%s631_s3 + $0x60] sm:$0xff] %v170_v62  ;;  %325 = vst [vmem:[%s631_s3 + $0x70] sm:$0xff] %v283_v63  ;;  %v172_v2 = vadd.f32 %v171_v0, %v496_v34  ;;  %v285_v3 = vadd.f32 %v284_v1, %v498_v35 }
  0xda   :  { %v175_v4 = vpop.f32.mrf.mxu0  ;;  %v288_v5 = vpop.f32.mrf.mxu1 }
  0xdb   :  { %324 = vst [vmem:[%s631_s3 + $0x68] sm:$0xff] %v172_v2  ;;  %326 = vst [vmem:[%s631_s3 + $0x78] sm:$0xff] %v285_v3  ;;  %v176_v6 = vadd.f32 %v175_v4, %v492_v32  ;;  %v289_v7 = vadd.f32 %v288_v5, %v494_v33 }
  0xdc   :  { %v177_v8 = vpop.f32.mrf.mxu0  ;;  %v290_v9 = vpop.f32.mrf.mxu1 }
  0xdd   :  { %327 = vst [vmem:[%s631_s3 + $0x80] sm:$0xff] %v176_v6  ;;  %329 = vst [vmem:[%s631_s3 + $0x90] sm:$0xff] %v289_v7  ;;  %v178_v10 = vadd.f32 %v177_v8, %v496_v34  ;;  %v291_v11 = vadd.f32 %v290_v9, %v498_v35 }
  0xde   :  { %v181_v12 = vpop.f32.mrf.mxu0  ;;  %v294_v13 = vpop.f32.mrf.mxu1 }
  0xdf   :  { %328 = vst [vmem:[%s631_s3 + $0x88] sm:$0xff] %v178_v10  ;;  %330 = vst [vmem:[%s631_s3 + $0x98] sm:$0xff] %v291_v11  ;;  %v182_v14 = vadd.f32 %v181_v12, %v492_v32  ;;  %v295_v15 = vadd.f32 %v294_v13, %v494_v33 }
  0xe0   :  { %v183_v16 = vpop.f32.mrf.mxu0  ;;  %v296_v17 = vpop.f32.mrf.mxu1 }
  0xe1   :  { %331 = vst [vmem:[%s631_s3 + $0xa0] sm:$0xff] %v182_v14  ;;  %333 = vst [vmem:[%s631_s3 + $0xb0] sm:$0xff] %v295_v15  ;;  %v184_v18 = vadd.f32 %v183_v16, %v496_v34  ;;  %v297_v19 = vadd.f32 %v296_v17, %v498_v35 }
  0xe2   :  { %v187_v20 = vpop.f32.mrf.mxu0  ;;  %v300_v21 = vpop.f32.mrf.mxu1 }
  0xe3   :  { %332 = vst [vmem:[%s631_s3 + $0xa8] sm:$0xff] %v184_v18  ;;  %334 = vst [vmem:[%s631_s3 + $0xb8] sm:$0xff] %v297_v19  ;;  %v188_v22 = vadd.f32 %v187_v20, %v492_v32  ;;  %v301_v23 = vadd.f32 %v300_v21, %v494_v33 }
  0xe4   :  { %v189_v24 = vpop.f32.mrf.mxu0  ;;  %v302_v25 = vpop.f32.mrf.mxu1 }
  0xe5   :  { %335 = vst [vmem:[%s631_s3 + $0xc0] sm:$0xff] %v188_v22  ;;  %337 = vst [vmem:[%s631_s3 + $0xd0] sm:$0xff] %v301_v23  ;;  %v190_v26 = vadd.f32 %v189_v24, %v496_v34  ;;  %v303_v27 = vadd.f32 %v302_v25, %v498_v35 }
  0xe6   :  { %v193_v28 = vpop.f32.mrf.mxu0  ;;  %v306_v29 = vpop.f32.mrf.mxu1 }
  0xe7   :  { %336 = vst [vmem:[%s631_s3 + $0xc8] sm:$0xff] %v190_v26  ;;  %338 = vst [vmem:[%s631_s3 + $0xd8] sm:$0xff] %v303_v27  ;;  %v194_v30 = vadd.f32 %v193_v28, %v492_v32  ;;  %v307_v31 = vadd.f32 %v306_v29, %v494_v33 }
  0xe8   :  { %v195_v36 = vpop.f32.mrf.mxu0  ;;  %v308_v37 = vpop.f32.mrf.mxu1 }
  0xe9   :  { %339 = vst [vmem:[%s631_s3 + $0xe0] sm:$0xff] %v194_v30  ;;  %341 = vst [vmem:[%s631_s3 + $0xf0] sm:$0xff] %v307_v31  ;;  %v196_v38 = vadd.f32 %v195_v36, %v496_v34  ;;  %v309_v39 = vadd.f32 %v308_v37, %v498_v35 }
  0xeb   :  { %340 = vst [vmem:[%s631_s3 + $0xe8] sm:$0xff] %v196_v38  ;;  %342 = vst [vmem:[%s631_s3 + $0xf8] sm:$0xff] %v309_v39 }

// kernel: decoder_forward.4
= control target key start
LH: loop header
LB: loop body
LE: loop exit
PB: predicated region body
PF: predicated region fallthrough
CT: control target
= control target key end

     0   :  { %v8849_v3 = vmov 0.0   ;;  %s8846_s1 = inlined_call_operand.vmem [shape: f32[128,512], index: 1, kind: input, shape index: {}]   ;;  %s8847_s0 = inlined_call_operand.vmem [shape: f32[8,8,512], index: 0, kind: input, shape index: {}]   ;;  %s8848_s2 = inlined_call_operand.vmem [shape: f32[8,8,128], index: 2, kind: output, shape index: {}]  }
   0x1   :  { %v5993_v0 = vld [vmem:[%s8846_s1 + $0x1e8] sm:$0xff]  ;;  %v5998_v1 = vld [vmem:[%s8846_s1 + $0x1f8] sm:$0xff]  ;;  %v6003_v2 = vld [vmem:[%s8846_s1 + $0x1e0] sm:$0xff]  ;;  %154 = vmatprep.mubr.f32.mxu0 %v8849_v3  ;;  %225 = vmatprep.mubr.f32.mxu1 %v8849_v3 }
   0x2   :  { %90 = vmatprep.subr.mxu0 %v5993_v0  ;;  %161 = vmatprep.subr.mxu1 %v5998_v1  ;;  %v6012_v4 = vld [vmem:[%s8846_s1 + $0x1f0] sm:$0xff]  ;;  %v6017_v5 = vld [vmem:[%s8846_s1 + $0x1c8] sm:$0xff]  ;;  %v6022_v6 = vld [vmem:[%s8846_s1 + $0x1d8] sm:$0xff] }
   0x3   :  { %91 = vmatpush1.msra.mxu0 %v6003_v2  ;;  %162 = vmatpush1.msra.mxu1 %v6012_v4  ;;  %v6029_v7 = vld [vmem:[%s8846_s1 + $0x1c0] sm:$0xff]  ;;  %v6034_v8 = vld [vmem:[%s8846_s1 + $0x1d0] sm:$0xff]  ;;  %v6039_v9 = vld [vmem:[%s8846_s1 + $0x1a8] sm:$0xff] }
   0x4   :  { %92 = vmatprep.subr.mxu0 %v6017_v5  ;;  %163 = vmatprep.subr.mxu1 %v6022_v6  ;;  %v6046_v10 = vld [vmem:[%s8846_s1 + $0x1b8] sm:$0xff]  ;;  %v6051_v11 = vld [vmem:[%s8846_s1 + $0x1a0] sm:$0xff]  ;;  %v6056_v12 = vld [vmem:[%s8846_s1 + $0x1b0] sm:$0xff] }
   0x5   :  { %93 = vmatpush1.msra.mxu0 %v6029_v7  ;;  %164 = vmatpush1.msra.mxu1 %v6034_v8  ;;  %v6063_v13 = vld [vmem:[%s8846_s1 + $0x188] sm:$0xff]  ;;  %v6068_v14 = vld [vmem:[%s8846_s1 + $0x198] sm:$0xff]  ;;  %v6075_v15 = vld [vmem:[%s8846_s1 + $0x180] sm:$0xff] }
   0x6   :  { %94 = vmatprep.subr.mxu0 %v6039_v9  ;;  %165 = vmatprep.subr.mxu1 %v6046_v10  ;;  %v6080_v16 = vld [vmem:[%s8846_s1 + $0x190] sm:$0xff]  ;;  %v6087_v17 = vld [vmem:[%s8846_s1 + $0x168] sm:$0xff]  ;;  %v6092_v18 = vld [vmem:[%s8846_s1 + $0x178] sm:$0xff] }
   0x7   :  { %95 = vmatpush1.msra.mxu0 %v6051_v11  ;;  %166 = vmatpush1.msra.mxu1 %v6056_v12  ;;  %v6099_v19 = vld [vmem:[%s8846_s1 + $0x160] sm:$0xff]  ;;  %v6104_v20 = vld [vmem:[%s8846_s1 + $0x170] sm:$0xff]  ;;  %v6111_v21 = vld [vmem:[%s8846_s1 + $0x148] sm:$0xff] }
   0x8   :  { %96 = vmatprep.subr.mxu0 %v6063_v13  ;;  %167 = vmatprep.subr.mxu1 %v6068_v14  ;;  %v6116_v22 = vld [vmem:[%s8846_s1 + $0x158] sm:$0xff]  ;;  %v6123_v23 = vld [vmem:[%s8846_s1 + $0x140] sm:$0xff]  ;;  %v6128_v24 = vld [vmem:[%s8846_s1 + $0x150] sm:$0xff] }
   0x9   :  { %97 = vmatpush1.msra.mxu0 %v6075_v15  ;;  %168 = vmatpush1.msra.mxu1 %v6080_v16  ;;  %v6135_v25 = vld [vmem:[%s8846_s1 + $0x128] sm:$0xff]  ;;  %v6140_v26 = vld [vmem:[%s8846_s1 + $0x138] sm:$0xff]  ;;  %v6147_v27 = vld [vmem:[%s8846_s1 + $0x120] sm:$0xff] }
   0xa   :  { %98 = vmatprep.subr.mxu0 %v6087_v17  ;;  %169 = vmatprep.subr.mxu1 %v6092_v18  ;;  %v6152_v28 = vld [vmem:[%s8846_s1 + $0x130] sm:$0xff]  ;;  %v6159_v29 = vld [vmem:[%s8846_s1 + $0x108] sm:$0xff]  ;;  %v6164_v30 = vld [vmem:[%s8846_s1 + $0x118] sm:$0xff] }
   0xb   :  { %99 = vmatpush1.msra.mxu0 %v6099_v19  ;;  %170 = vmatpush1.msra.mxu1 %v6104_v20  ;;  %v6171_v31 = vld [vmem:[%s8846_s1 + $0x100] sm:$0xff]  ;;  %v6176_v32 = vld [vmem:[%s8846_s1 + $0x110] sm:$0xff]  ;;  %v6183_v33 = vld [vmem:[%s8846_s1 + $0xe8] sm:$0xff] }
   0xc   :  { %100 = vmatprep.subr.mxu0 %v6111_v21  ;;  %171 = vmatprep.subr.mxu1 %v6116_v22  ;;  %8967 = vst [vmem:[#allocation2_spill] sm:$0xff] %v6183_v33  ;;  %v6188_v34 = vld [vmem:[%s8846_s1 + $0xf8] sm:$0xff]  ;;  %v6195_v35 = vld [vmem:[%s8846_s1 + $0xe0] sm:$0xff]  ;;  %v6200_v36 = vld [vmem:[%s8846_s1 + $0xf0] sm:$0xff] }
   0xd   :  { %101 = vmatpush1.msra.mxu0 %v6123_v23  ;;  %172 = vmatpush1.msra.mxu1 %v6128_v24  ;;  %8968 = vst [vmem:[#allocation3_spill] sm:$0xff] %v6188_v34  ;;  %8969 = vst [vmem:[#allocation4_spill] sm:$0xff] %v6195_v35  ;;  %v6207_v37 = vld [vmem:[%s8846_s1 + $0xc8] sm:$0xff]  ;;  %v6212_v38 = vld [vmem:[%s8846_s1 + $0xd8] sm:$0xff] }
   0xe   :  { %102 = vmatprep.subr.mxu0 %v6135_v25  ;;  %173 = vmatprep.subr.mxu1 %v6140_v26  ;;  %8970 = vst [vmem:[#allocation5_spill] sm:$0xff] %v6200_v36  ;;  %8971 = vst [vmem:[#allocation6_spill] sm:$0xff] %v6207_v37  ;;  %v6219_v39 = vld [vmem:[%s8846_s1 + $0xc0] sm:$0xff]  ;;  %v6224_v40 = vld [vmem:[%s8846_s1 + $0xd0] sm:$0xff] }
   0xf   :  { %103 = vmatpush1.msra.mxu0 %v6147_v27  ;;  %174 = vmatpush1.msra.mxu1 %v6152_v28  ;;  %8972 = vst [vmem:[#allocation7_spill] sm:$0xff] %v6212_v38  ;;  %8973 = vst [vmem:[#allocation8_spill] sm:$0xff] %v6219_v39  ;;  %v6231_v41 = vld [vmem:[%s8846_s1 + $0xa8] sm:$0xff]  ;;  %v6236_v42 = vld [vmem:[%s8846_s1 + $0xb8] sm:$0xff] }
  0x10   :  { %104 = vmatprep.subr.mxu0 %v6159_v29  ;;  %175 = vmatprep.subr.mxu1 %v6164_v30  ;;  %8974 = vst [vmem:[#allocation9_spill] sm:$0xff] %v6224_v40  ;;  %8975 = vst [vmem:[#allocation10_spill] sm:$0xff] %v6231_v41  ;;  %v6243_v43 = vld [vmem:[%s8846_s1 + $0xa0] sm:$0xff]  ;;  %v6248_v44 = vld [vmem:[%s8846_s1 + $0xb0] sm:$0xff] }
  0x11   :  { %105 = vmatpush1.msra.mxu0 %v6171_v31  ;;  %176 = vmatpush1.msra.mxu1 %v6176_v32  ;;  %8976 = vst [vmem:[#allocation11_spill] sm:$0xff] %v6236_v42  ;;  %8977 = vst [vmem:[#allocation12_spill] sm:$0xff] %v6243_v43  ;;  %v6255_v45 = vld [vmem:[%s8846_s1 + $0x88] sm:$0xff]  ;;  %v6260_v46 = vld [vmem:[%s8846_s1 + $0x98] sm:$0xff] }
  0x12   :  { %106 = vmatprep.subr.mxu0 %v6183_v33  ;;  %177 = vmatprep.subr.mxu1 %v6188_v34  ;;  %8978 = vst [vmem:[#allocation13_spill] sm:$0xff] %v6248_v44  ;;  %8979 = vst [vmem:[#allocation14_spill] sm:$0xff] %v6255_v45  ;;  %v6267_v47 = vld [vmem:[%s8846_s1 + $0x80] sm:$0xff]  ;;  %v6272_v48 = vld [vmem:[%s8846_s1 + $0x90] sm:$0xff] }
  0x13   :  { %107 = vmatpush1.msra.mxu0 %v6195_v35  ;;  %178 = vmatpush1.msra.mxu1 %v6200_v36  ;;  %8980 = vst [vmem:[#allocation15_spill] sm:$0xff] %v6260_v46  ;;  %8981 = vst [vmem:[#allocation16_spill] sm:$0xff] %v6267_v47  ;;  %v6279_v49 = vld [vmem:[%s8846_s1 + $0x68] sm:$0xff]  ;;  %v6284_v50 = vld [vmem:[%s8846_s1 + $0x78] sm:$0xff] }
  0x14   :  { %108 = vmatprep.subr.mxu0 %v6207_v37  ;;  %179 = vmatprep.subr.mxu1 %v6212_v38  ;;  %8982 = vst [vmem:[#allocation17_spill] sm:$0xff] %v6272_v48  ;;  %8983 = vst [vmem:[#allocation18_spill] sm:$0xff] %v6279_v49  ;;  %v6291_v51 = vld [vmem:[%s8846_s1 + $0x60] sm:$0xff]  ;;  %v6296_v52 = vld [vmem:[%s8846_s1 + $0x70] sm:$0xff] }
  0x15   :  { %109 = vmatpush1.msra.mxu0 %v6219_v39  ;;  %180 = vmatpush1.msra.mxu1 %v6224_v40  ;;  %8984 = vst [vmem:[#allocation19_spill] sm:$0xff] %v6284_v50  ;;  %8985 = vst [vmem:[#allocation20_spill] sm:$0xff] %v6291_v51  ;;  %v6303_v53 = vld [vmem:[%s8846_s1 + $0x48] sm:$0xff]  ;;  %v6308_v54 = vld [vmem:[%s8846_s1 + $0x58] sm:$0xff] }
  0x16   :  { %110 = vmatprep.subr.mxu0 %v6231_v41  ;;  %181 = vmatprep.subr.mxu1 %v6236_v42  ;;  %8986 = vst [vmem:[#allocation21_spill] sm:$0xff] %v6296_v52  ;;  %8987 = vst [vmem:[#allocation22_spill] sm:$0xff] %v6303_v53  ;;  %v6315_v55 = vld [vmem:[%s8846_s1 + $0x40] sm:$0xff]  ;;  %v6320_v56 = vld [vmem:[%s8846_s1 + $0x50] sm:$0xff] }
  0x17   :  { %111 = vmatpush1.msra.mxu0 %v6243_v43  ;;  %182 = vmatpush1.msra.mxu1 %v6248_v44  ;;  %8988 = vst [vmem:[#allocation23_spill] sm:$0xff] %v6308_v54  ;;  %8989 = vst [vmem:[#allocation24_spill] sm:$0xff] %v6315_v55  ;;  %v6327_v57 = vld [vmem:[%s8846_s1 + $0x28] sm:$0xff]  ;;  %v6332_v58 = vld [vmem:[%s8846_s1 + $0x38] sm:$0xff] }
  0x18   :  { %112 = vmatprep.subr.mxu0 %v6255_v45  ;;  %183 = vmatprep.subr.mxu1 %v6260_v46  ;;  %8990 = vst [vmem:[#allocation25_spill] sm:$0xff] %v6320_v56  ;;  %8991 = vst [vmem:[#allocation26_spill] sm:$0xff] %v6327_v57  ;;  %v6339_v59 = vld [vmem:[%s8846_s1 + $0x20] sm:$0xff]  ;;  %v6344_v60 = vld [vmem:[%s8846_s1 + $0x30] sm:$0xff] }
  0x19   :  { %113 = vmatpush1.msra.mxu0 %v6267_v47  ;;  %184 = vmatpush1.msra.mxu1 %v6272_v48  ;;  %8992 = vst [vmem:[#allocation27_spill] sm:$0xff] %v6332_v58  ;;  %8993 = vst [vmem:[#allocation28_spill] sm:$0xff] %v6339_v59  ;;  %v6351_v61 = vld [vmem:[%s8846_s1 + $0x8] sm:$0xff]  ;;  %v6356_v62 = vld [vmem:[%s8846_s1 + $0x18] sm:$0xff] }
  0x1a   :  { %114 = vmatprep.subr.mxu0 %v6279_v49  ;;  %185 = vmatprep.subr.mxu1 %v6284_v50  ;;  %8994 = vst [vmem:[#allocation29_spill] sm:$0xff] %v6344_v60  ;;  %8995 = vst [vmem:[#allocation30_spill] sm:$0xff] %v6351_v61  ;;  %v6363_v63 = vld [vmem:[%s8846_s1] sm:$0xff]  ;;  %v6368_v3 = vld [vmem:[%s8846_s1 + $0x10] sm:$0xff] }
  0x1b   :  { %115 = vmatpush1.msra.mxu0 %v6291_v51  ;;  %186 = vmatpush1.msra.mxu1 %v6296_v52  ;;  %8996 = vst [vmem:[#allocation31_spill] sm:$0xff] %v6356_v62  ;;  %8997 = vst [vmem:[#allocation32_spill] sm:$0xff] %v6363_v63 }
  0x1c   :  { %116 = vmatprep.subr.mxu0 %v6303_v53  ;;  %187 = vmatprep.subr.mxu1 %v6308_v54  ;;  %8998 = vst [vmem:[#allocation33_spill] sm:$0xff] %v6368_v3 }
  0x1d   :  { %117 = vmatpush1.msra.mxu0 %v6315_v55  ;;  %188 = vmatpush1.msra.mxu1 %v6320_v56 }
  0x1e   :  { %118 = vmatprep.subr.mxu0 %v6327_v57  ;;  %189 = vmatprep.subr.mxu1 %v6332_v58  ;;  %v8999_v58 = vmov 0.0  }
  0x1f   :  { %119 = vmatpush1.msra.mxu0 %v6339_v59  ;;  %190 = vmatpush1.msra.mxu1 %v6344_v60 }
  0x20   :  { %120 = vmatprep.subr.mxu0 %v6351_v61  ;;  %191 = vmatprep.subr.mxu1 %v6356_v62 }
  0x21   :  { %121 = vmatpush1.msra.mxu0 %v6363_v63  ;;  %192 = vmatpush1.msra.mxu1 %v6368_v3 }
  0x22   :  { %155 = vmatmul.mubr.f32.vlgmr.msra.gmra.mxu0 %v8999_v58  ;;  %226 = vmatmul.mubr.f32.vlgmr.msra.gmra.mxu1 %v8999_v58 }
  0x23   :  { %650 = vmatprep.subr.mxu0 %v5993_v0  ;;  %721 = vmatprep.subr.mxu1 %v5998_v1 }
  0x24   :  { %651 = vmatpush1.msra.mxu0 %v6003_v2  ;;  %722 = vmatpush1.msra.mxu1 %v6012_v4 }
  0x25   :  { %652 = vmatprep.subr.mxu0 %v6017_v5  ;;  %723 = vmatprep.subr.mxu1 %v6022_v6 }
  0x26   :  { %653 = vmatpush1.msra.mxu0 %v6029_v7  ;;  %724 = vmatpush1.msra.mxu1 %v6034_v8 }
  0x27   :  { %654 = vmatprep.subr.mxu0 %v6039_v9  ;;  %725 = vmatprep.subr.mxu1 %v6046_v10 }
  0x28   :  { %655 = vmatpush1.msra.mxu0 %v6051_v11  ;;  %726 = vmatpush1.msra.mxu1 %v6056_v12 }
  0x29   :  { %656 = vmatprep.subr.mxu0 %v6063_v13  ;;  %727 = vmatprep.subr.mxu1 %v6068_v14 }
  0x2a   :  { %657 = vmatpush1.msra.mxu0 %v6075_v15  ;;  %728 = vmatpush1.msra.mxu1 %v6080_v16 }
  0x2b   :  { %658 = vmatprep.subr.mxu0 %v6087_v17  ;;  %729 = vmatprep.subr.mxu1 %v6092_v18 }
  0x2c   :  { %659 = vmatpush1.msra.mxu0 %v6099_v19  ;;  %730 = vmatpush1.msra.mxu1 %v6104_v20 }
  0x2d   :  { %660 = vmatprep.subr.mxu0 %v6111_v21  ;;  %731 = vmatprep.subr.mxu1 %v6116_v22 }
  0x2e   :  { %661 = vmatpush1.msra.mxu0 %v6123_v23  ;;  %732 = vmatpush1.msra.mxu1 %v6128_v24 }
  0x2f   :  { %662 = vmatprep.subr.mxu0 %v6135_v25  ;;  %733 = vmatprep.subr.mxu1 %v6140_v26 }
  0x30   :  { %663 = vmatpush1.msra.mxu0 %v6147_v27  ;;  %734 = vmatpush1.msra.mxu1 %v6152_v28 }
  0x31   :  { %664 = vmatprep.subr.mxu0 %v6159_v29  ;;  %735 = vmatprep.subr.mxu1 %v6164_v30 }
  0x32   :  { %665 = vmatpush1.msra.mxu0 %v6171_v31  ;;  %736 = vmatpush1.msra.mxu1 %v6176_v32 }
  0x33   :  { %666 = vmatprep.subr.mxu0 %v6183_v33  ;;  %737 = vmatprep.subr.mxu1 %v6188_v34 }
  0x34   :  { %667 = vmatpush1.msra.mxu0 %v6195_v35  ;;  %738 = vmatpush1.msra.mxu1 %v6200_v36 }
  0x35   :  { %668 = vmatprep.subr.mxu0 %v6207_v37  ;;  %739 = vmatprep.subr.mxu1 %v6212_v38 }
  0x36   :  { %669 = vmatpush1.msra.mxu0 %v6219_v39  ;;  %740 = vmatpush1.msra.mxu1 %v6224_v40 }
  0x37   :  { %670 = vmatprep.subr.mxu0 %v6231_v41  ;;  %741 = vmatprep.subr.mxu1 %v6236_v42 }
  0x38   :  { %671 = vmatpush1.msra.mxu0 %v6243_v43  ;;  %742 = vmatpush1.msra.mxu1 %v6248_v44 }
  0x39   :  { %672 = vmatprep.subr.mxu0 %v6255_v45  ;;  %743 = vmatprep.subr.mxu1 %v6260_v46 }
  0x3a   :  { %673 = vmatpush1.msra.mxu0 %v6267_v47  ;;  %744 = vmatpush1.msra.mxu1 %v6272_v48  ;;  %v9000_v47 = vld [vmem:[#allocation27_spill] sm:$0xff] }
  0x3b   :  { %674 = vmatprep.subr.mxu0 %v6279_v49  ;;  %745 = vmatprep.subr.mxu1 %v6284_v50 }
  0x3c   :  { %675 = vmatpush1.msra.mxu0 %v6291_v51  ;;  %746 = vmatpush1.msra.mxu1 %v6296_v52 }
  0x3d   :  { %676 = vmatprep.subr.mxu0 %v6303_v53  ;;  %747 = vmatprep.subr.mxu1 %v6308_v54 }
  0x3e   :  { %677 = vmatpush1.msra.mxu0 %v6315_v55  ;;  %748 = vmatpush1.msra.mxu1 %v6320_v56 }
  0x3f   :  { %678 = vmatprep.subr.mxu0 %v6327_v57  ;;  %749 = vmatprep.subr.mxu1 %v9000_v47  ;;  %v5974_v47 = vmov 1966171168   ;;  %v243_v57 = vlaneseq }
  0x40   :  { %679 = vmatpush1.msra.mxu0 %v6339_v59  ;;  %750 = vmatpush1.msra.mxu1 %v6344_v60  ;;  %v241_v59 = vunpack.c.l.s4 %v5974_v47 }
  0x41   :  { %680 = vmatprep.subr.mxu0 %v6351_v61  ;;  %751 = vmatprep.subr.mxu1 %v6356_v62  ;;  %v244_v56 = vshrl.u32 %v243_v57, 7 }
  0x42   :  { %681 = vmatpush1.msra.mxu0 %v6363_v63  ;;  %714 = vmatprep.mubr.f32.mxu0 %v8999_v58  ;;  %v242_v60 = vunpack.c.0.s8 %v241_v59 }
  0x43   :  { %752 = vmatpush1.msra.mxu1 %v6368_v3  ;;  %785 = vmatprep.mubr.f32.mxu1 %v8999_v58 }
  0x44   :  { %1210 = vmatprep.subr.mxu0 %v5993_v0  ;;  %1281 = vmatprep.subr.mxu1 %v5998_v1  ;;  %v6446_v62 = vsub.s32 %v242_v60, %v244_v56  ;;  %v75_v56 = vld [vmem:[%s8847_s0] ss:$8 sm:$0xf] }
  0x45   :  { %v4502_v60 = vld [vmem:[%s8847_s0 + $0x60] ss:$8 sm:$0xf] }
  0xe2   :  { %v156_v61 = vpop.f32.mrf.mxu0  ;;  %v227_v55 = vpop.f32.mrf.mxu1 }
  0xe4   :  { %v158_v63 = vpop.f32.mrf.mxu0  ;;  %v229_v54 = vpop.f32.mrf.mxu1 }
  0xe5   :  { %v236_v53 = vcombine.low %v156_v61, %v158_v63  ;;  %v237_v52 = vcombine.high %v156_v61, %v158_v63  ;;  %v238_v3 = vcombine.low %v227_v55, %v229_v54  ;;  %v239_v51 = vcombine.high %v227_v55, %v229_v54  ;;  %v4500_v54 = vld [vmem:[%s8847_s0 + $0x20] ss:$8 sm:$0xf] }
  0xe6   :  { %v4504_v61 = vld [vmem:[%s8847_s0 + $0xa0] ss:$8 sm:$0xf] }
  0xe7   :  { %v246_v58 = vrot.slane %v236_v53, %v6446_v62  ;;  %v253_v0 = vrot.slane %v237_v52, %v6446_v62  ;;  %v260_v1 = vrot.slane %v238_v3, %v6446_v62  ;;  %v267_v47 = vrot.slane %v239_v51, %v6446_v62  ;;  %v4501_v52 = vld [vmem:[%s8847_s0 + $0x40] ss:$8 sm:$0xf] }
  0xe8   :  { %v4503_v3 = vld [vmem:[%s8847_s0 + $0x80] ss:$8 sm:$0xf] }
  0xe9   :  { %v268_v59 = vcombine.low %v246_v58, %v260_v1  ;;  %v269_v57 = vcombine.high %v246_v58, %v260_v1  ;;  %v270_v50 = vcombine.low %v253_v0, %v267_v47  ;;  %v271_v49 = vcombine.high %v253_v0, %v267_v47  ;;  %v4505_v63 = vld [vmem:[%s8847_s0 + $0xc0] ss:$8 sm:$0xf] }
  0xeb   :  { %v278_v51 = vrot.slane %v268_v59, %v6446_v62  ;;  %v285_v53 = vrot.slane %v270_v50, %v6446_v62  ;;  %v292_v55 = vrot.slane %v269_v57, %v6446_v62  ;;  %v299_v58 = vrot.slane %v271_v49, %v6446_v62  ;;  %v4506_v49 = vld [vmem:[%s8847_s0 + $0xe0] ss:$8 sm:$0xf] }
  0xed   :  { %v300_v0 = vcombine.high %v278_v51, %v278_v51  ;;  %v301_v1 = vcombine.high %v285_v53, %v285_v53  ;;  %v302_v47 = vcombine.high %v292_v55, %v292_v55  ;;  %v303_v50 = vcombine.high %v299_v58, %v299_v58 }
  0xee   :  { %v6480_v59 = vadd.f32 %v278_v51, %v75_v56  ;;  %v6482_v57 = vadd.f32 %v4500_v54, %v292_v55  ;;  %v6484_v48 = vadd.f32 %v4503_v3, %v285_v53  ;;  %v6490_v44 = vadd.f32 %v4504_v61, %v299_v58 }
  0xef   :  { %v6486_v46 = vadd.f32 %v4501_v52, %v300_v0  ;;  %v6488_v45 = vadd.f32 %v4502_v60, %v302_v47  ;;  %v6492_v43 = vadd.f32 %v4505_v63, %v301_v1  ;;  %v6496_v40 = vadd.f32 %v4506_v49, %v303_v50 }
  0xf0   :  { %v4507_v42 = vmul.f32 -1.442695, %v6480_v59  ;;  %v4508_v41 = vmul.f32 -1.442695, %v6482_v57  ;;  %v4511_v52 = vmul.f32 -1.442695, %v6484_v48 }
  0xf1   :  { %v4509_v56 = vmul.f32 -1.442695, %v6486_v46  ;;  %v4510_v54 = vmul.f32 -1.442695, %v6488_v45  ;;  %v376_v3 = vrot.slane %v6480_v59, 1  ;;  %v377_v53 = vrot.slane %v6482_v57, 1 }
  0xf2   :  { %4757 = vpow2.f32 %v4507_v42  ;;  %v4512_v51 = vmul.f32 -1.442695, %v6490_v44  ;;  %v4513_v55 = vmul.f32 -1.442695, %v6492_v43  ;;  %v378_v58 = vrot.slane %v6486_v46, 1 }
  0xf3   :  { %4759 = vpow2.f32 %v4508_v41  ;;  %v4514_v60 = vmul.f32 -1.442695, %v6496_v40  ;;  %v379_v61 = vrot.slane %v6488_v45, 1  ;;  %v380_v42 = vrot.slane %v6484_v48, 1 }
  0xf4   :  { %4761 = vpow2.f32 %v4509_v56  ;;  %v4515_v63 = vmul.f32 -1.442695, %v376_v3  ;;  %v381_v41 = vrot.slane %v6490_v44, 1  ;;  %v4516_v0 = vmul.f32 -1.442695, %v377_v53 }
  0xf5   :  { %4763 = vpow2.f32 %v4510_v54  ;;  %v382_v1 = vrot.slane %v6492_v43, 1  ;;  %v4517_v47 = vmul.f32 -1.442695, %v378_v58  ;;  %v383_v50 = vrot.slane %v6496_v40, 1 }
  0xf6   :  { %4765 = vpow2.f32 %v4511_v52  ;;  %v4518_v49 = vmul.f32 -1.442695, %v379_v61  ;;  %v4519_v56 = vmul.f32 -1.442695, %v380_v42  ;;  %v4520_v54 = vmul.f32 -1.442695, %v381_v41 }
  0xf7   :  { %4767 = vpow2.f32 %v4512_v51  ;;  %v4521_v52 = vmul.f32 -1.442695, %v382_v1  ;;  %v4522_v3 = vmul.f32 -1.442695, %v383_v50 }
  0xf8   :  { %4769 = vpow2.f32 %v4513_v55 }
  0xf9   :  { %4771 = vpow2.f32 %v4514_v60 }
  0xfa   :  { %4773 = vpow2.f32 %v4515_v63 }
  0xfb   :  { %4775 = vpow2.f32 %v4516_v0 }
  0xfc   :  { %4777 = vpow2.f32 %v4517_v47 }
  0xfd   :  { %4779 = vpow2.f32 %v4518_v49 }
  0xfe   :  { %4781 = vpow2.f32 %v4519_v56 }
  0xff   :  { %v4758_v51 = vpop.eup %4757  ;;  %4783 = vpow2.f32 %v4520_v54 }
 0x100   :  { %v4760_v53 = vpop.eup %4759  ;;  %v344_v55 = vadd.f32 1.0, %v4758_v51  ;;  %4785 = vpow2.f32 %v4521_v52 }
 0x101   :  { %v4762_v39 = vpop.eup %4761  ;;  %v345_v58 = vadd.f32 1.0, %v4760_v53  ;;  %4787 = vpow2.f32 %v4522_v3 }
 0x102   :  { %v4764_v60 = vpop.eup %4763  ;;  %v346_v38 = vadd.f32 1.0, %v4762_v39  ;;  %4789 = vrcp.f32 %v344_v55 }
 0x103   :  { %v4766_v61 = vpop.eup %4765  ;;  %v347_v42 = vadd.f32 1.0, %v4764_v60  ;;  %4791 = vrcp.f32 %v345_v58 }
 0x104   :  { %v4768_v63 = vpop.eup %4767  ;;  %v348_v41 = vadd.f32 1.0, %v4766_v61  ;;  %4793 = vrcp.f32 %v346_v38 }
 0x105   :  { %v4770_v0 = vpop.eup %4769  ;;  %v349_v1 = vadd.f32 1.0, %v4768_v63  ;;  %4795 = vrcp.f32 %v347_v42 }
 0x106   :  { %v4772_v47 = vpop.eup %4771  ;;  %v350_v50 = vadd.f32 1.0, %v4770_v0  ;;  %4797 = vrcp.f32 %v348_v41  ;;  %v440_v0 = vrot.slane %v6480_v59, 2 }
 0x107   :  { %v4774_v49 = vpop.eup %4773  ;;  %v351_v56 = vadd.f32 1.0, %v4772_v47  ;;  %4799 = vrcp.f32 %v349_v1 }
 0x108   :  { %v4776_v54 = vpop.eup %4775  ;;  %4801 = vrcp.f32 %v350_v50  ;;  %v416_v52 = vadd.f32 1.0, %v4774_v49  ;;  %v441_v50 = vrot.slane %v6482_v57, 2 }
 0x109   :  { %v4778_v39 = vpop.eup %4777  ;;  %4803 = vrcp.f32 %v351_v56  ;;  %v417_v3 = vadd.f32 1.0, %v4776_v54  ;;  %v442_v56 = vrot.slane %v6486_v46, 2 }
 0x10a   :  { %v4780_v51 = vpop.eup %4779  ;;  %v418_v53 = vadd.f32 1.0, %v4778_v39  ;;  %4805 = vrcp.f32 %v416_v52  ;;  %v443_v52 = vrot.slane %v6488_v45, 2 }
 0x10b   :  { %v4782_v55 = vpop.eup %4781  ;;  %v419_v38 = vadd.f32 1.0, %v4780_v51  ;;  %4807 = vrcp.f32 %v417_v3  ;;  %v444_v3 = vrot.slane %v6484_v48, 2  ;;  %v464_v51 = vrot.slane %v6480_v59, 3 }
 0x10c   :  { %v4784_v58 = vpop.eup %4783  ;;  %v420_v60 = vadd.f32 1.0, %v4782_v55  ;;  %4809 = vrcp.f32 %v418_v53  ;;  %v445_v55 = vrot.slane %v6490_v44, 2  ;;  %v467_v59 = vrot.slane %v6488_v45, 3 }
 0x10d   :  { %v4786_v61 = vpop.eup %4785  ;;  %v421_v42 = vadd.f32 1.0, %v4784_v58  ;;  %4811 = vrcp.f32 %v419_v38  ;;  %v465_v38 = vrot.slane %v6482_v57, 3  ;;  %v4523_v57 = vmul.f32 -1.442695, %v464_v51 }
 0x10e   :  { %v4788_v63 = vpop.eup %4787  ;;  %v422_v41 = vadd.f32 1.0, %v4786_v61  ;;  %4813 = vrcp.f32 %v420_v60  ;;  %v446_v60 = vrot.slane %v6492_v43, 2  ;;  %v466_v61 = vrot.slane %v6486_v46, 3 }
 0x10f   :  { %v6513_v1 = vpop.eup %4789  ;;  %v423_v47 = vadd.f32 1.0, %v4788_v63  ;;  %4815 = vrcp.f32 %v421_v42  ;;  %v447_v63 = vrot.slane %v6496_v40, 2  ;;  %v470_v46 = vrot.slane %v6492_v43, 3 }
 0x110   :  { %v6516_v49 = vpop.eup %4791  ;;  %4817 = vrcp.f32 %v422_v41  ;;  %v4525_v36 = vmul.f32 -1.442695, %v466_v61  ;;  %v471_v45 = vrot.slane %v6496_v40, 3 }
 0x111   :  { %v6519_v54 = vpop.eup %4793  ;;  %4819 = vrcp.f32 %v423_v47 }
 0x112   :  { %v6522_v39 = vpop.eup %4795  ;;  %4821 = vtanh.f32 %v440_v0  ;;  %v468_v0 = vrot.slane %v6484_v48, 3 }
 0x113   :  { %v6526_v53 = vpop.eup %4797  ;;  %4823 = vtanh.f32 %v441_v50  ;;  %v469_v50 = vrot.slane %v6490_v44, 3  ;;  %v4529_v44 = vmul.f32 -1.442695, %v470_v46 }
 0x114   :  { %v6530_v58 = vpop.eup %4799  ;;  %4825 = vtanh.f32 %v442_v56  ;;  %v4524_v56 = vmul.f32 -1.442695, %v465_v38 }
 0x115   :  { %v6534_v42 = vpop.eup %4801  ;;  %4827 = vtanh.f32 %v443_v52  ;;  %v4526_v52 = vmul.f32 -1.442695, %v467_v59  ;;  %v4528_v51 = vmul.f32 -1.442695, %v469_v50 }
 0x116   :  { %v6538_v41 = vpop.eup %4803  ;;  %4829 = vtanh.f32 %v444_v3  ;;  %v4527_v3 = vmul.f32 -1.442695, %v468_v0 }
 0x117   :  { %v4806_v47 = vpop.eup %4805  ;;  %4831 = vtanh.f32 %v445_v55 }
 0x118   :  { %v4808_v37 = vpop.eup %4807  ;;  %4833 = vtanh.f32 %v446_v60  ;;  %v4530_v60 = vmul.f32 -1.442695, %v471_v45  ;;  %v528_v43 = vmul.f32 0.0, %v4806_v47 }
 0x119   :  { %v4810_v35 = vpop.eup %4809  ;;  %4835 = vtanh.f32 %v447_v63  ;;  %v529_v63 = vmul.f32 0.0, %v4808_v37 }
 0x11a   :  { %v4812_v34 = vpop.eup %4811  ;;  %4837 = vpow2.f32 %v4523_v57  ;;  %v530_v59 = vmul.f32 0.0, %v4810_v35 }
 0x11b   :  { %v4814_v48 = vpop.eup %4813  ;;  %4839 = vpow2.f32 %v4524_v56  ;;  %v531_v50 = vmul.f32 0.0, %v4812_v34 }
 0x11c   :  { %v4816_v55 = vpop.eup %4815  ;;  %4841 = vpow2.f32 %v4525_v36  ;;  %v532_v46 = vmul.f32 0.0, %v4814_v48 }
 0x11d   :  { %v4818_v38 = vpop.eup %4817  ;;  %4843 = vpow2.f32 %v4526_v52 }
 0x11e   :  { %v4820_v33 = vpop.eup %4819  ;;  %4845 = vpow2.f32 %v4527_v3  ;;  %v533_v3 = vmul.f32 0.0, %v4816_v55 }
 0x11f   :  { %v4822_v61 = vpop.eup %4821  ;;  %4847 = vpow2.f32 %v4528_v51 }
 0x120   :  { %v4824_v40 = vpop.eup %4823  ;;  %4849 = vpow2.f32 %v4529_v44  ;;  %v536_v0 = vmul.f32 %v4822_v61, %v6513_v1 }
 0x121   :  { %v4826_v57 = vpop.eup %4825  ;;  %4851 = vpow2.f32 %v4530_v60  ;;  %v537_v36 = vmul.f32 %v4824_v40, %v6516_v49 }
 0x122   :  { %v4828_v56 = vpop.eup %4827  ;;  %v538_v45 = vmul.f32 %v4826_v57, %v6519_v54  ;;  %v6547_v52 = vadd.f32 %v536_v0, %v528_v43 }
 0x123   :  { %v4830_v47 = vpop.eup %4829  ;;  %v539_v37 = vmul.f32 %v4828_v56, %v6522_v39  ;;  %v6550_v51 = vadd.f32 %v537_v36, %v529_v63 }
 0x124   :  { %v4832_v35 = vpop.eup %4831  ;;  %v540_v1 = vmul.f32 %v4830_v47, %v6526_v53  ;;  %v6553_v44 = vadd.f32 %v538_v45, %v530_v59  ;;  %4853 = vtanh.f32 %v6547_v52  ;;  %v534_v59 = vmul.f32 0.0, %v4818_v38 }
 0x125   :  { %v4834_v34 = vpop.eup %4833  ;;  %v541_v49 = vmul.f32 %v4832_v35, %v6530_v58  ;;  %v6557_v48 = vadd.f32 %v539_v37, %v531_v50  ;;  %4855 = vtanh.f32 %v6550_v51  ;;  %v535_v50 = vmul.f32 0.0, %v4820_v33 }
 0x126   :  { %v4836_v54 = vpop.eup %4835  ;;  %v6560_v55 = vadd.f32 %v540_v1, %v532_v46  ;;  %4857 = vtanh.f32 %v6553_v44  ;;  %v542_v46 = vmul.f32 %v4834_v34, %v6534_v42 }
 0x127   :  { %v4838_v39 = vpop.eup %4837  ;;  %v6563_v60 = vadd.f32 %v541_v49, %v533_v3  ;;  %4859 = vtanh.f32 %v6557_v48  ;;  %v543_v3 = vmul.f32 %v4836_v54, %v6538_v41 }
 0x128   :  { %v4840_v53 = vpop.eup %4839  ;;  %v504_v43 = vadd.f32 1.0, %v4838_v39  ;;  %4861 = vtanh.f32 %v6560_v55  ;;  %v6570_v1 = vadd.f32 %v542_v46, %v534_v59 }
 0x129   :  { %v4842_v61 = vpop.eup %4841  ;;  %v505_v58 = vadd.f32 1.0, %v4840_v53  ;;  %4863 = vtanh.f32 %v6563_v60  ;;  %v6572_v49 = vadd.f32 %v543_v3, %v535_v50 }
 0x12a   :  { %v4844_v63 = vpop.eup %4843  ;;  %v506_v40 = vadd.f32 1.0, %v4842_v61  ;;  %4865 = vrcp.f32 %v504_v43 }
 0x12b   :  { %v4846_v0 = vpop.eup %4845  ;;  %v507_v57 = vadd.f32 1.0, %v4844_v63  ;;  %4867 = vrcp.f32 %v505_v58 }
 0x12c   :  { %v4848_v36 = vpop.eup %4847  ;;  %v508_v56 = vadd.f32 1.0, %v4846_v0  ;;  %4869 = vrcp.f32 %v506_v40 }
 0x12d   :  { %v4850_v45 = vpop.eup %4849  ;;  %v509_v47 = vadd.f32 1.0, %v4848_v36  ;;  %4871 = vrcp.f32 %v507_v57 }
 0x12e   :  { %v4852_v37 = vpop.eup %4851  ;;  %v510_v35 = vadd.f32 1.0, %v4850_v45  ;;  %4873 = vrcp.f32 %v508_v56 }
 0x12f   :  { %v511_v38 = vadd.f32 1.0, %v4852_v37  ;;  %4875 = vrcp.f32 %v509_v47 }
 0x130   :  { %4877 = vrcp.f32 %v510_v35 }
 0x131   :  { %v4854_v33 = vpop.eup %4853  ;;  %4879 = vrcp.f32 %v511_v38 }
 0x132   :  { %v4856_v39 = vpop.eup %4855  ;;  %4881 = vtanh.f32 %v6570_v1 }
 0x133   :  { %v4858_v42 = vpop.eup %4857  ;;  %4883 = vtanh.f32 %v6572_v49 }
 0x134   :  { %v4860_v34 = vpop.eup %4859 }
 0x135   :  { %v4862_v41 = vpop.eup %4861 }
 0x136   :  { %v4864_v54 = vpop.eup %4863 }
 0x137   :  { %v4866_v53 = vpop.eup %4865 }
 0x138   :  { %v4868_v43 = vpop.eup %4867  ;;  %v560_v61 = vmul.f32 %v4866_v53, %v4854_v33 }
 0x139   :  { %v4870_v58 = vpop.eup %4869  ;;  %v561_v63 = vmul.f32 %v4868_v43, %v4856_v39 }
 0x13a   :  { %v4872_v40 = vpop.eup %4871  ;;  %v562_v59 = vmul.f32 %v4870_v58, %v4858_v42  ;;  %568 = vst [vmem:[%s8848_s2] sm:$0x1] %v560_v61 }
 0x13b   :  { %v4874_v0 = vpop.eup %4873  ;;  %v563_v57 = vmul.f32 %v4872_v40, %v4860_v34  ;;  %569 = vst [vmem:[%s8848_s2 + $0x8] sm:$0x1] %v561_v63  ;;  %v600_v45 = vcombine.low %v560_v61, %v561_v63 }
 0x13c   :  { %v4876_v50 = vpop.eup %4875  ;;  %v564_v36 = vmul.f32 %v4874_v0, %v4862_v41  ;;  %570 = vst [vmem:[%s8848_s2 + $0x10] sm:$0x1] %v562_v59  ;;  %v9032_v0 = vmov 0.0  }
 0x13d   :  { %v4878_v56 = vpop.eup %4877  ;;  %v565_v46 = vmul.f32 %v4876_v50, %v4864_v54  ;;  %571 = vst [vmem:[%s8848_s2 + $0x18] sm:$0x1] %v563_v57  ;;  %v601_v47 = vcombine.low %v562_v59, %v563_v57  ;;  %v610_v34 = vrot.slane %v600_v45, %v6446_v62  ;;  %v9031_v59 = vld [vmem:[#allocation32_spill] sm:$0xff]  ;;  %v9033_v57 = vld [vmem:[#allocation33_spill] sm:$0xff]  ;;  %v6673_v50 = vld [vmem:[%s8846_s1 + $0x1e8] sm:$0xff] }
 0x13e   :  { %v4880_v3 = vpop.eup %4879  ;;  %572 = vst [vmem:[%s8848_s2 + $0x20] sm:$0x1] %v564_v36 }
 0x13f   :  { %v4882_v37 = vpop.eup %4881  ;;  %573 = vst [vmem:[%s8848_s2 + $0x28] sm:$0x1] %v565_v46  ;;  %v617_v35 = vrot.slane %v601_v47, %v6446_v62  ;;  %v602_v42 = vcombine.low %v564_v36, %v565_v46  ;;  %v6679_v36 = vld [vmem:[%s8846_s1 + $0x1f8] sm:$0xff] }
 0x140   :  { %v4884_v38 = vpop.eup %4883  ;;  %v566_v33 = vmul.f32 %v4882_v37, %v4878_v56 }
 0x141   :  { %v567_v39 = vmul.f32 %v4884_v38, %v4880_v3  ;;  %v632_v54 = vcombine.low %v610_v34, %v617_v35  ;;  %v624_v53 = vrot.slane %v602_v42, %v6446_v62 }
 0x142   :  { %574 = vst [vmem:[%s8848_s2 + $0x30] sm:$0x1] %v566_v33 }
 0x143   :  { %575 = vst [vmem:[%s8848_s2 + $0x38] sm:$0x1] %v567_v39  ;;  %v603_v41 = vcombine.low %v566_v33, %v567_v39  ;;  %v640_v58 = vrot.slane %v632_v54, %v6446_v62 }
 0x145   :  { %v631_v43 = vrot.slane %v603_v41, %v6446_v62 }
 0x147   :  { %v633_v61 = vcombine.low %v624_v53, %v631_v43 }
 0x149   :  { %v647_v63 = vrot.slane %v633_v61, %v6446_v62  ;;  %v4531_v61 = vld [vmem:[%s8847_s0 + $0x1] ss:$8 sm:$0xf] }
 0x14b   :  { %v648_v40 = vcombine.low %v640_v58, %v647_v63  ;;  %v4532_v58 = vld [vmem:[%s8847_s0 + $0x21] ss:$8 sm:$0xf] }
 0x14c   :  { %v4533_v63 = vld [vmem:[%s8847_s0 + $0x41] ss:$8 sm:$0xf] }
 0x14d   :  { %715 = vmatmul.mubr.f32.vlgmr.msra.gmra.mxu0 %v648_v40  ;;  %786 = vmatmul.mubr.f32.vlgmr.msra.gmra.mxu1 %v648_v40  ;;  %v4535_v40 = vld [vmem:[%s8847_s0 + $0x81] ss:$8 sm:$0xf] }
 0x14e   :  { %1211 = vmatpush1.msra.mxu0 %v6003_v2  ;;  %1282 = vmatpush1.msra.mxu1 %v6012_v4  ;;  %v9001_v2 = vld [vmem:[#allocation2_spill] sm:$0xff]  ;;  %v9002_v4 = vld [vmem:[#allocation3_spill] sm:$0xff] }
 0x14f   :  { %1212 = vmatprep.subr.mxu0 %v6017_v5  ;;  %1283 = vmatprep.subr.mxu1 %v6022_v6  ;;  %v9003_v5 = vld [vmem:[#allocation4_spill] sm:$0xff]  ;;  %v9004_v6 = vld [vmem:[#allocation5_spill] sm:$0xff] }
 0x150   :  { %1213 = vmatpush1.msra.mxu0 %v6029_v7  ;;  %1284 = vmatpush1.msra.mxu1 %v6034_v8  ;;  %v9005_v7 = vld [vmem:[#allocation6_spill] sm:$0xff]  ;;  %v9006_v8 = vld [vmem:[#allocation7_spill] sm:$0xff] }
 0x151   :  { %1214 = vmatprep.subr.mxu0 %v6039_v9  ;;  %1285 = vmatprep.subr.mxu1 %v6046_v10  ;;  %v9007_v9 = vld [vmem:[#allocation8_spill] sm:$0xff]  ;;  %v9008_v10 = vld [vmem:[#allocation9_spill] sm:$0xff] }
 0x152   :  { %1215 = vmatpush1.msra.mxu0 %v6051_v11  ;;  %1286 = vmatpush1.msra.mxu1 %v6056_v12  ;;  %v9009_v11 = vld [vmem:[#allocation10_spill] sm:$0xff]  ;;  %v9010_v12 = vld [vmem:[#allocation11_spill] sm:$0xff] }
 0x153   :  { %1216 = vmatprep.subr.mxu0 %v6063_v13  ;;  %1287 = vmatprep.subr.mxu1 %v6068_v14  ;;  %v9011_v13 = vld [vmem:[#allocation12_spill] sm:$0xff]  ;;  %v9012_v14 = vld [vmem:[#allocation13_spill] sm:$0xff] }
 0x154   :  { %1217 = vmatpush1.msra.mxu0 %v6075_v15  ;;  %1288 = vmatpush1.msra.mxu1 %v6080_v16  ;;  %v9013_v15 = vld [vmem:[#allocation14_spill] sm:$0xff]  ;;  %v9014_v16 = vld [vmem:[#allocation15_spill] sm:$0xff] }
 0x155   :  { %1218 = vmatprep.subr.mxu0 %v6087_v17  ;;  %1289 = vmatprep.subr.mxu1 %v6092_v18  ;;  %v9015_v17 = vld [vmem:[#allocation16_spill] sm:$0xff]  ;;  %v9016_v18 = vld [vmem:[#allocation17_spill] sm:$0xff] }
 0x156   :  { %1219 = vmatpush1.msra.mxu0 %v6099_v19  ;;  %1290 = vmatpush1.msra.mxu1 %v6104_v20  ;;  %v9017_v19 = vld [vmem:[#allocation18_spill] sm:$0xff]  ;;  %v9018_v20 = vld [vmem:[#allocation19_spill] sm:$0xff] }
 0x157   :  { %1220 = vmatprep.subr.mxu0 %v6111_v21  ;;  %1291 = vmatprep.subr.mxu1 %v6116_v22  ;;  %v9019_v21 = vld [vmem:[#allocation20_spill] sm:$0xff]  ;;  %v9020_v22 = vld [vmem:[#allocation21_spill] sm:$0xff] }
 0x158   :  { %1221 = vmatpush1.msra.mxu0 %v6123_v23  ;;  %1292 = vmatpush1.msra.mxu1 %v6128_v24  ;;  %v9021_v23 = vld [vmem:[#allocation22_spill] sm:$0xff]  ;;  %v9022_v24 = vld [vmem:[#allocation23_spill] sm:$0xff] }
 0x159   :  { %1222 = vmatprep.subr.mxu0 %v6135_v25  ;;  %1293 = vmatprep.subr.mxu1 %v6140_v26  ;;  %v9023_v25 = vld [vmem:[#allocation24_spill] sm:$0xff]  ;;  %v9024_v26 = vld [vmem:[#allocation25_spill] sm:$0xff] }
 0x15a   :  { %1223 = vmatpush1.msra.mxu0 %v6147_v27  ;;  %1294 = vmatpush1.msra.mxu1 %v6152_v28  ;;  %v9025_v27 = vld [vmem:[#allocation26_spill] sm:$0xff]  ;;  %v9026_v28 = vld [vmem:[#allocation27_spill] sm:$0xff] }
 0x15b   :  { %1224 = vmatprep.subr.mxu0 %v6159_v29  ;;  %1295 = vmatprep.subr.mxu1 %v6164_v30  ;;  %v9027_v29 = vld [vmem:[#allocation28_spill] sm:$0xff]  ;;  %v9028_v30 = vld [vmem:[#allocation29_spill] sm:$0xff] }
 0x15c   :  { %1225 = vmatpush1.msra.mxu0 %v6171_v31  ;;  %1296 = vmatpush1.msra.mxu1 %v6176_v32  ;;  %v9029_v31 = vld [vmem:[#allocation30_spill] sm:$0xff]  ;;  %v9030_v32 = vld [vmem:[#allocation31_spill] sm:$0xff] }
 0x15d   :  { %1226 = vmatprep.subr.mxu0 %v9001_v2  ;;  %1297 = vmatprep.subr.mxu1 %v9002_v4 }
 0x15e   :  { %1227 = vmatpush1.msra.mxu0 %v9003_v5  ;;  %1298 = vmatpush1.msra.mxu1 %v9004_v6 }
 0x15f   :  { %1228 = vmatprep.subr.mxu0 %v9005_v7  ;;  %1299 = vmatprep.subr.mxu1 %v9006_v8  ;;  %v4534_v7 = vld [vmem:[%s8847_s0 + $0x61] ss:$8 sm:$0xf] }
 0x160   :  { %1229 = vmatpush1.msra.mxu0 %v9007_v9  ;;  %1300 = vmatpush1.msra.mxu1 %v9008_v10  ;;  %v4536_v8 = vld [vmem:[%s8847_s0 + $0xa1] ss:$8 sm:$0xf] }
 0x161   :  { %1230 = vmatprep.subr.mxu0 %v9009_v11  ;;  %1301 = vmatprep.subr.mxu1 %v9010_v12  ;;  %v4537_v9 = vld [vmem:[%s8847_s0 + $0xc1] ss:$8 sm:$0xf] }
 0x162   :  { %1231 = vmatpush1.msra.mxu0 %v9011_v13  ;;  %1302 = vmatpush1.msra.mxu1 %v9012_v14  ;;  %v4538_v14 = vld [vmem:[%s8847_s0 + $0xe1] ss:$8 sm:$0xf] }
 0x163   :  { %1232 = vmatprep.subr.mxu0 %v9013_v15  ;;  %1303 = vmatprep.subr.mxu1 %v9014_v16 }
 0x164   :  { %1233 = vmatpush1.msra.mxu0 %v9015_v17  ;;  %1304 = vmatpush1.msra.mxu1 %v9016_v18 }
 0x165   :  { %1234 = vmatprep.subr.mxu0 %v9017_v19  ;;  %1305 = vmatprep.subr.mxu1 %v9018_v20 }
 0x166   :  { %1235 = vmatpush1.msra.mxu0 %v9019_v21  ;;  %1306 = vmatpush1.msra.mxu1 %v9020_v22 }
 0x167   :  { %1236 = vmatprep.subr.mxu0 %v9021_v23  ;;  %1307 = vmatprep.subr.mxu1 %v9022_v24 }
 0x168   :  { %1237 = vmatpush1.msra.mxu0 %v9023_v25  ;;  %1308 = vmatpush1.msra.mxu1 %v9024_v26 }
 0x169   :  { %1238 = vmatprep.subr.mxu0 %v9025_v27  ;;  %1309 = vmatprep.subr.mxu1 %v9026_v28 }
 0x16a   :  { %1239 = vmatpush1.msra.mxu0 %v9027_v29  ;;  %1310 = vmatpush1.msra.mxu1 %v9028_v30 }
 0x16b   :  { %1240 = vmatprep.subr.mxu0 %v9029_v31  ;;  %1311 = vmatprep.subr.mxu1 %v9030_v32 }
 0x16c   :  { %1241 = vmatpush1.msra.mxu0 %v9031_v59  ;;  %1274 = vmatprep.mubr.f32.mxu0 %v9032_v0 }
 0x16d   :  { %1312 = vmatpush1.msra.mxu1 %v9033_v57  ;;  %1345 = vmatprep.mubr.f32.mxu1 %v9032_v0 }
 0x16e   :  { %1770 = vmatprep.subr.mxu0 %v6673_v50  ;;  %1841 = vmatprep.subr.mxu1 %v6679_v36 }
 0x20d   :  { %v716_v56 = vpop.f32.mrf.mxu0  ;;  %v787_v46 = vpop.f32.mrf.mxu1 }
 0x20f   :  { %v718_v45 = vpop.f32.mrf.mxu0  ;;  %v789_v47 = vpop.f32.mrf.mxu1 }
 0x210   :  { %v796_v3 = vcombine.low %v716_v56, %v718_v45  ;;  %v797_v37 = vcombine.high %v716_v56, %v718_v45  ;;  %v798_v35 = vcombine.low %v787_v46, %v789_v47  ;;  %v799_v38 = vcombine.high %v787_v46, %v789_v47 }
 0x212   :  { %v806_v33 = vrot.slane %v796_v3, %v6446_v62  ;;  %v813_v39 = vrot.slane %v797_v37, %v6446_v62  ;;  %v820_v42 = vrot.slane %v798_v35, %v6446_v62  ;;  %v827_v34 = vrot.slane %v799_v38, %v6446_v62 }
 0x214   :  { %v828_v41 = vcombine.low %v806_v33, %v820_v42  ;;  %v829_v54 = vcombine.high %v806_v33, %v820_v42  ;;  %v830_v53 = vcombine.low %v813_v39, %v827_v34  ;;  %v831_v43 = vcombine.high %v813_v39, %v827_v34 }
 0x216   :  { %v838_v2 = vrot.slane %v828_v41, %v6446_v62  ;;  %v845_v4 = vrot.slane %v830_v53, %v6446_v62  ;;  %v852_v5 = vrot.slane %v829_v54, %v6446_v62  ;;  %v859_v6 = vrot.slane %v831_v43, %v6446_v62 }
 0x218   :  { %v860_v10 = vcombine.high %v838_v2, %v838_v2  ;;  %v861_v11 = vcombine.high %v845_v4, %v845_v4  ;;  %v862_v12 = vcombine.high %v852_v5, %v852_v5  ;;  %v863_v13 = vcombine.high %v859_v6, %v859_v6 }
 0x219   :  { %v6714_v15 = vadd.f32 %v4531_v61, %v838_v2  ;;  %v6716_v16 = vadd.f32 %v4532_v58, %v852_v5  ;;  %v6718_v17 = vadd.f32 %v4535_v40, %v845_v4  ;;  %v6724_v20 = vadd.f32 %v4536_v8, %v859_v6 }
 0x21a   :  { %v6720_v18 = vadd.f32 %v4533_v63, %v860_v10  ;;  %v6722_v19 = vadd.f32 %v4534_v7, %v862_v12  ;;  %v6726_v21 = vadd.f32 %v4537_v9, %v861_v11  ;;  %v6730_v24 = vadd.f32 %v4538_v14, %v863_v13 }
 0x21b   :  { %v4539_v22 = vmul.f32 -1.442695, %v6714_v15  ;;  %v4540_v23 = vmul.f32 -1.442695, %v6716_v16  ;;  %v4543_v27 = vmul.f32 -1.442695, %v6718_v17 }
 0x21c   :  { %v4541_v25 = vmul.f32 -1.442695, %v6720_v18  ;;  %v4542_v26 = vmul.f32 -1.442695, %v6722_v19  ;;  %v936_v28 = vrot.slane %v6714_v15, 1  ;;  %v937_v30 = vrot.slane %v6716_v16, 1 }
 0x21d   :  { %4885 = vpow2.f32 %v4539_v22  ;;  %v4544_v29 = vmul.f32 -1.442695, %v6724_v20  ;;  %v4545_v31 = vmul.f32 -1.442695, %v6726_v21  ;;  %v938_v32 = vrot.slane %v6720_v18, 1 }
 0x21e   :  { %4887 = vpow2.f32 %v4540_v23  ;;  %v4546_v59 = vmul.f32 -1.442695, %v6730_v24  ;;  %v939_v57 = vrot.slane %v6722_v19, 1  ;;  %v940_v56 = vrot.slane %v6718_v17, 1 }
 0x21f   :  { %4889 = vpow2.f32 %v4541_v25  ;;  %v4547_v46 = vmul.f32 -1.442695, %v936_v28  ;;  %v941_v45 = vrot.slane %v6724_v20, 1  ;;  %v4548_v47 = vmul.f32 -1.442695, %v937_v30 }
 0x220   :  { %4891 = vpow2.f32 %v4542_v26  ;;  %v942_v3 = vrot.slane %v6726_v21, 1  ;;  %v4549_v37 = vmul.f32 -1.442695, %v938_v32  ;;  %v943_v35 = vrot.slane %v6730_v24, 1 }
 0x221   :  { %4893 = vpow2.f32 %v4543_v27  ;;  %v4550_v38 = vmul.f32 -1.442695, %v939_v57  ;;  %v4551_v33 = vmul.f32 -1.442695, %v940_v56  ;;  %v4552_v39 = vmul.f32 -1.442695, %v941_v45 }
 0x222   :  { %4895 = vpow2.f32 %v4544_v29  ;;  %v4553_v42 = vmul.f32 -1.442695, %v942_v3  ;;  %v4554_v34 = vmul.f32 -1.442695, %v943_v35  ;;  %v1000_v57 = vrot.slane %v6714_v15, 2 }
 0x223   :  { %4897 = vpow2.f32 %v4545_v31  ;;  %v1001_v45 = vrot.slane %v6716_v16, 2  ;;  %v1002_v3 = vrot.slane %v6720_v18, 2  ;;  %v1003_v35 = vrot.slane %v6722_v19, 2 }
 0x224   :  { %4899 = vpow2.f32 %v4546_v59 }
 0x225   :  { %4901 = vpow2.f32 %v4547_v46 }
 0x226   :  { %4903 = vpow2.f32 %v4548_v47 }
 0x227   :  { %4905 = vpow2.f32 %v4549_v37 }
 0x228   :  { %4907 = vpow2.f32 %v4550_v38 }
 0x229   :  { %4909 = vpow2.f32 %v4551_v33  ;;  %v1004_v33 = vrot.slane %v6718_v17, 2 }
 0x22a   :  { %v4886_v41 = vpop.eup %4885  ;;  %4911 = vpow2.f32 %v4552_v39  ;;  %v1024_v39 = vrot.slane %v6714_v15, 3  ;;  %v1027_v15 = vrot.slane %v6722_v19, 3  ;;  %v1031_v19 = vrot.slane %v6730_v24, 3 }
 0x22b   :  { %v4888_v54 = vpop.eup %4887  ;;  %v904_v53 = vadd.f32 1.0, %v4886_v41  ;;  %4913 = vpow2.f32 %v4553_v42  ;;  %v1025_v41 = vrot.slane %v6716_v16, 3 }
 0x22c   :  { %v4890_v43 = vpop.eup %4889  ;;  %v905_v61 = vadd.f32 1.0, %v4888_v54  ;;  %4915 = vpow2.f32 %v4554_v34  ;;  %v1005_v34 = vrot.slane %v6724_v20, 2  ;;  %v4555_v16 = vmul.f32 -1.442695, %v1024_v39 }
 0x22d   :  { %v4892_v58 = vpop.eup %4891  ;;  %v906_v63 = vadd.f32 1.0, %v4890_v43  ;;  %4917 = vrcp.f32 %v904_v53  ;;  %v1006_v53 = vrot.slane %v6726_v21, 2  ;;  %v1026_v43 = vrot.slane %v6720_v18, 3 }
 0x22e   :  { %v4894_v40 = vpop.eup %4893  ;;  %v907_v2 = vadd.f32 1.0, %v4892_v58  ;;  %4919 = vrcp.f32 %v905_v61  ;;  %v1007_v58 = vrot.slane %v6730_v24, 2  ;;  %v1030_v18 = vrot.slane %v6726_v21, 3 }
 0x22f   :  { %v4896_v4 = vpop.eup %4895  ;;  %v908_v5 = vadd.f32 1.0, %v4894_v40  ;;  %4921 = vrcp.f32 %v906_v63  ;;  %v1028_v40 = vrot.slane %v6718_v17, 3 }
 0x230   :  { %v4898_v6 = vpop.eup %4897  ;;  %v909_v7 = vadd.f32 1.0, %v4896_v4  ;;  %4923 = vrcp.f32 %v907_v2  ;;  %v1029_v4 = vrot.slane %v6724_v20, 3  ;;  %v4561_v20 = vmul.f32 -1.442695, %v1030_v18 }
 0x231   :  { %v4900_v8 = vpop.eup %4899  ;;  %v910_v9 = vadd.f32 1.0, %v4898_v6  ;;  %4925 = vrcp.f32 %v908_v5  ;;  %v4556_v5 = vmul.f32 -1.442695, %v1025_v41 }
 0x232   :  { %v4902_v10 = vpop.eup %4901  ;;  %v911_v11 = vadd.f32 1.0, %v4900_v8  ;;  %4927 = vrcp.f32 %v909_v7  ;;  %v4557_v7 = vmul.f32 -1.442695, %v1026_v43 }
 0x233   :  { %v4904_v12 = vpop.eup %4903  ;;  %4929 = vrcp.f32 %v910_v9  ;;  %v976_v13 = vadd.f32 1.0, %v4902_v10  ;;  %v4558_v9 = vmul.f32 -1.442695, %v1027_v15 }
 0x234   :  { %v4906_v14 = vpop.eup %4905  ;;  %4931 = vrcp.f32 %v911_v11  ;;  %v977_v22 = vadd.f32 1.0, %v4904_v12  ;;  %v4559_v11 = vmul.f32 -1.442695, %v1028_v40  ;;  %v4560_v12 = vmul.f32 -1.442695, %v1029_v4 }
 0x235   :  { %v4908_v23 = vpop.eup %4907  ;;  %v978_v25 = vadd.f32 1.0, %v4906_v14  ;;  %4933 = vrcp.f32 %v976_v13 }
 0x236   :  { %v4910_v26 = vpop.eup %4909  ;;  %v979_v27 = vadd.f32 1.0, %v4908_v23  ;;  %4935 = vrcp.f32 %v977_v22  ;;  %v4562_v22 = vmul.f32 -1.442695, %v1031_v19 }
 0x237   :  { %v4912_v28 = vpop.eup %4911  ;;  %v980_v29 = vadd.f32 1.0, %v4910_v26  ;;  %4937 = vrcp.f32 %v978_v25 }
 0x238   :  { %v4914_v30 = vpop.eup %4913  ;;  %v981_v31 = vadd.f32 1.0, %v4912_v28  ;;  %4939 = vrcp.f32 %v979_v27 }
 0x239   :  { %v4916_v32 = vpop.eup %4915  ;;  %v982_v59 = vadd.f32 1.0, %v4914_v30  ;;  %4941 = vrcp.f32 %v980_v29 }
 0x23a   :  { %v4918_v56 = vpop.eup %4917  ;;  %v983_v46 = vadd.f32 1.0, %v4916_v32  ;;  %4943 = vrcp.f32 %v981_v31 }
 0x23b   :  { %v4920_v47 = vpop.eup %4919  ;;  %4945 = vrcp.f32 %v982_v59 }
 0x23c   :  { %v4922_v37 = vpop.eup %4921  ;;  %4947 = vrcp.f32 %v983_v46 }
 0x23d   :  { %v6750_v38 = vpop.eup %4923  ;;  %4949 = vtanh.f32 %v1000_v57 }
 0x23e   :  { %v6754_v42 = vpop.eup %4925  ;;  %4951 = vtanh.f32 %v1001_v45 }
 0x23f   :  { %v6758_v54 = vpop.eup %4927  ;;  %4953 = vtanh.f32 %v1002_v3 }
 0x240   :  { %v6762_v61 = vpop.eup %4929  ;;  %4955 = vtanh.f32 %v1003_v35 }
 0x241   :  { %v6766_v63 = vpop.eup %4931  ;;  %4957 = vtanh.f32 %v1004_v33 }
 0x242   :  { %v4934_v2 = vpop.eup %4933  ;;  %4959 = vtanh.f32 %v1005_v34 }
 0x243   :  { %v4936_v6 = vpop.eup %4935  ;;  %4961 = vtanh.f32 %v1006_v53  ;;  %v1088_v21 = vmul.f32 %v4934_v2, %v6547_v52 }
 0x244   :  { %v4938_v8 = vpop.eup %4937  ;;  %4963 = vtanh.f32 %v1007_v58  ;;  %v1089_v24 = vmul.f32 %v4936_v6, %v6550_v51 }
 0x245   :  { %v4940_v10 = vpop.eup %4939  ;;  %4965 = vpow2.f32 %v4555_v16  ;;  %v1090_v28 = vmul.f32 %v4938_v8, %v6553_v44 }
 0x246   :  { %v4942_v17 = vpop.eup %4941  ;;  %4967 = vpow2.f32 %v4556_v5  ;;  %v1091_v31 = vmul.f32 %v4940_v10, %v6557_v48 }
 0x247   :  { %v4944_v13 = vpop.eup %4943  ;;  %4969 = vpow2.f32 %v4557_v7  ;;  %v1092_v57 = vmul.f32 %v4942_v17, %v6560_v55 }
 0x248   :  { %v4946_v14 = vpop.eup %4945  ;;  %4971 = vpow2.f32 %v4558_v9  ;;  %v1093_v51 = vmul.f32 %v4944_v13, %v6563_v60 }
 0x249   :  { %v4948_v23 = vpop.eup %4947  ;;  %4973 = vpow2.f32 %v4559_v11  ;;  %v1094_v43 = vmul.f32 %v4946_v14, %v6570_v1 }
 0x24a   :  { %v4950_v25 = vpop.eup %4949  ;;  %4975 = vpow2.f32 %v4560_v12  ;;  %v1095_v40 = vmul.f32 %v4948_v23, %v6572_v49 }
 0x24b   :  { %v4952_v26 = vpop.eup %4951  ;;  %4977 = vpow2.f32 %v4561_v20  ;;  %v1096_v27 = vmul.f32 %v4950_v25, %v4918_v56 }
 0x24c   :  { %v4954_v29 = vpop.eup %4953  ;;  %4979 = vpow2.f32 %v4562_v22  ;;  %v1097_v30 = vmul.f32 %v4952_v26, %v4920_v47 }
 0x24d   :  { %v4956_v32 = vpop.eup %4955  ;;  %v1098_v59 = vmul.f32 %v4954_v29, %v4922_v37  ;;  %v6777_v46 = vadd.f32 %v1096_v27, %v1088_v21 }
 0x24e   :  { %v4958_v52 = vpop.eup %4957  ;;  %v1099_v45 = vmul.f32 %v4956_v32, %v6750_v38  ;;  %v6781_v3 = vadd.f32 %v1097_v30, %v1089_v24 }
 0x24f   :  { %v4960_v56 = vpop.eup %4959  ;;  %v1100_v44 = vmul.f32 %v4958_v52, %v6754_v42  ;;  %v6784_v35 = vadd.f32 %v1098_v59, %v1090_v28  ;;  %4981 = vtanh.f32 %v6777_v46 }
 0x250   :  { %v4962_v48 = vpop.eup %4961  ;;  %v1101_v47 = vmul.f32 %v4960_v56, %v6758_v54  ;;  %v6788_v55 = vadd.f32 %v1099_v45, %v1091_v31  ;;  %4983 = vtanh.f32 %v6781_v3 }
 0x251   :  { %v4964_v37 = vpop.eup %4963  ;;  %v6791_v38 = vadd.f32 %v1100_v44, %v1092_v57  ;;  %4985 = vtanh.f32 %v6784_v35  ;;  %v1102_v4 = vmul.f32 %v4962_v48, %v6762_v61 }
 0x252   :  { %v4966_v60 = vpop.eup %4965  ;;  %v6794_v33 = vadd.f32 %v1101_v47, %v1093_v51  ;;  %4987 = vtanh.f32 %v6788_v55  ;;  %v1103_v18 = vmul.f32 %v4964_v37, %v6766_v63 }
 0x253   :  { %v4968_v39 = vpop.eup %4967  ;;  %v1064_v42 = vadd.f32 1.0, %v4966_v60  ;;  %4989 = vtanh.f32 %v6791_v38  ;;  %v6803_v19 = vadd.f32 %v1102_v4, %v1094_v43  ;;  %v6854_v43 = vld [vmem:[%s8846_s1 + $0x1c8] sm:$0xff]  ;;  %v6890_v4 = vld [vmem:[%s8846_s1 + $0x1a0] sm:$0xff] }
 0x254   :  { %v4970_v34 = vpop.eup %4969  ;;  %v1065_v41 = vadd.f32 1.0, %v4968_v39  ;;  %4991 = vtanh.f32 %v6794_v33  ;;  %v6805_v9 = vadd.f32 %v1103_v18, %v1095_v40  ;;  %v6872_v40 = vld [vmem:[%s8846_s1 + $0x1d0] sm:$0xff]  ;;  %v6908_v18 = vld [vmem:[%s8846_s1 + $0x198] sm:$0xff] }
 0x255   :  { %v4972_v54 = vpop.eup %4971  ;;  %v1066_v53 = vadd.f32 1.0, %v4970_v34  ;;  %4993 = vrcp.f32 %v1064_v42 }
 0x256   :  { %v4974_v58 = vpop.eup %4973  ;;  %v1067_v15 = vadd.f32 1.0, %v4972_v54  ;;  %4995 = vrcp.f32 %v1065_v41  ;;  %v6842_v54 = vld [vmem:[%s8846_s1 + $0x1e0] sm:$0xff] }
 0x257   :  { %v4976_v16 = vpop.eup %4975  ;;  %v1068_v2 = vadd.f32 1.0, %v4974_v58  ;;  %4997 = vrcp.f32 %v1066_v53  ;;  %v6848_v53 = vld [vmem:[%s8846_s1 + $0x1f0] sm:$0xff]  ;;  %v6860_v58 = vld [vmem:[%s8846_s1 + $0x1d8] sm:$0xff] }
 0x258   :  { %v4978_v5 = vpop.eup %4977  ;;  %v1069_v6 = vadd.f32 1.0, %v4976_v16  ;;  %4999 = vrcp.f32 %v1067_v15  ;;  %v6866_v15 = vld [vmem:[%s8846_s1 + $0x1c0] sm:$0xff]  ;;  %v6878_v16 = vld [vmem:[%s8846_s1 + $0x1a8] sm:$0xff] }
 0x259   :  { %v4980_v7 = vpop.eup %4979  ;;  %v1070_v8 = vadd.f32 1.0, %v4978_v5  ;;  %5001 = vrcp.f32 %v1068_v2  ;;  %v6884_v2 = vld [vmem:[%s8846_s1 + $0x1b8] sm:$0xff]  ;;  %v6896_v5 = vld [vmem:[%s8846_s1 + $0x1b0] sm:$0xff] }
 0x25a   :  { %v1071_v1 = vadd.f32 1.0, %v4980_v7  ;;  %5003 = vrcp.f32 %v1069_v6  ;;  %v6902_v6 = vld [vmem:[%s8846_s1 + $0x188] sm:$0xff]  ;;  %v6914_v7 = vld [vmem:[%s8846_s1 + $0x180] sm:$0xff] }
 0x25b   :  { %5005 = vrcp.f32 %v1070_v8  ;;  %v6920_v8 = vld [vmem:[%s8846_s1 + $0x190] sm:$0xff] }
 0x25c   :  { %v4982_v49 = vpop.eup %4981  ;;  %5007 = vrcp.f32 %v1071_v1  ;;  %v6926_v1 = vld [vmem:[%s8846_s1 + $0x168] sm:$0xff] }
 0x25d   :  { %v4984_v10 = vpop.eup %4983  ;;  %5009 = vtanh.f32 %v6803_v19 }
 0x25e   :  { %v4986_v61 = vpop.eup %4985  ;;  %5011 = vtanh.f32 %v6805_v9 }
 0x25f   :  { %v4988_v11 = vpop.eup %4987 }
 0x260   :  { %v4990_v63 = vpop.eup %4989 }
 0x261   :  { %v4992_v17 = vpop.eup %4991 }
 0x262   :  { %v4994_v12 = vpop.eup %4993 }
 0x263   :  { %v4996_v13 = vpop.eup %4995  ;;  %v1120_v20 = vmul.f32 %v4994_v12, %v4982_v49  ;;  %v6932_v49 = vld [vmem:[%s8846_s1 + $0x178] sm:$0xff]  ;;  %v6968_v12 = vld [vmem:[%s8846_s1 + $0x150] sm:$0xff] }
 0x264   :  { %v4998_v14 = vpop.eup %4997  ;;  %v1121_v22 = vmul.f32 %v4996_v13, %v4984_v10  ;;  %v6938_v10 = vld [vmem:[%s8846_s1 + $0x160] sm:$0xff]  ;;  %v6974_v13 = vld [vmem:[%s8846_s1 + $0x128] sm:$0xff] }
 0x265   :  { %v5000_v23 = vpop.eup %4999  ;;  %v1122_v21 = vmul.f32 %v4998_v14, %v4986_v61  ;;  %1128 = vst [vmem:[%s8848_s2 + $0x1] sm:$0x1] %v1120_v20  ;;  %v6944_v61 = vld [vmem:[%s8846_s1 + $0x170] sm:$0xff]  ;;  %9034 = vst [vmem:[#allocation2_spill] sm:$0xff] %v6974_v13  ;;  %v6986_v14 = vld [vmem:[%s8846_s1 + $0x120] sm:$0xff] }
 0x266   :  { %v5002_v25 = vpop.eup %5001  ;;  %v1123_v24 = vmul.f32 %v5000_v23, %v4988_v11  ;;  %1129 = vst [vmem:[%s8848_s2 + $0x9] sm:$0x1] %v1121_v22  ;;  %v1160_v30 = vcombine.low %v1120_v20, %v1121_v22  ;;  %v6950_v11 = vld [vmem:[%s8846_s1 + $0x148] sm:$0xff]  ;;  %v6980_v20 = vld [vmem:[%s8846_s1 + $0x138] sm:$0xff]  ;;  %9036 = vst [vmem:[#allocation4_spill] sm:$0xff] %v6986_v14 }
 0x267   :  { %v5004_v26 = vpop.eup %5003  ;;  %v1124_v27 = vmul.f32 %v5002_v25, %v4990_v63  ;;  %1130 = vst [vmem:[%s8848_s2 + $0x11] sm:$0x1] %v1122_v21  ;;  %v6956_v63 = vld [vmem:[%s8846_s1 + $0x158] sm:$0xff]  ;;  %9035 = vst [vmem:[#allocation3_spill] sm:$0xff] %v6980_v20  ;;  %v6992_v22 = vld [vmem:[%s8846_s1 + $0x130] sm:$0xff] }
 0x268   :  { %v5006_v28 = vpop.eup %5005  ;;  %v1125_v29 = vmul.f32 %v5004_v26, %v4992_v17  ;;  %1131 = vst [vmem:[%s8848_s2 + $0x19] sm:$0x1] %v1123_v24  ;;  %v1161_v31 = vcombine.low %v1122_v21, %v1123_v24  ;;  %v1170_v44 = vrot.slane %v1160_v30, %v6446_v62  ;;  %v6962_v17 = vld [vmem:[%s8846_s1 + $0x140] sm:$0xff]  ;;  %9037 = vst [vmem:[#allocation5_spill] sm:$0xff] %v6992_v22  ;;  %v6998_v23 = vld [vmem:[%s8846_s1 + $0x108] sm:$0xff] }
 0x269   :  { %v5008_v32 = vpop.eup %5007  ;;  %1132 = vst [vmem:[%s8848_s2 + $0x21] sm:$0x1] %v1124_v27  ;;  %9038 = vst [vmem:[#allocation6_spill] sm:$0xff] %v6998_v23  ;;  %v7004_v21 = vld [vmem:[%s8846_s1 + $0x118] sm:$0xff]  ;;  %v7010_v25 = vld [vmem:[%s8846_s1 + $0x100] sm:$0xff] }
 0x26a   :  { %v5010_v59 = vpop.eup %5009  ;;  %1133 = vst [vmem:[%s8848_s2 + $0x29] sm:$0x1] %v1125_v29  ;;  %v1177_v57 = vrot.slane %v1161_v31, %v6446_v62  ;;  %v1162_v56 = vcombine.low %v1124_v27, %v1125_v29  ;;  %9039 = vst [vmem:[#allocation7_spill] sm:$0xff] %v7004_v21  ;;  %v7016_v24 = vld [vmem:[%s8846_s1 + $0x110] sm:$0xff]  ;;  %v7022_v26 = vld [vmem:[%s8846_s1 + $0xe8] sm:$0xff] }
 0x26b   :  { %v5012_v52 = vpop.eup %5011  ;;  %v1126_v45 = vmul.f32 %v5010_v59, %v5006_v28  ;;  %9040 = vst [vmem:[#allocation8_spill] sm:$0xff] %v7010_v25  ;;  %9041 = vst [vmem:[#allocation9_spill] sm:$0xff] %v7016_v24  ;;  %v7028_v27 = vld [vmem:[%s8846_s1 + $0xf8] sm:$0xff]  ;;  %v7034_v28 = vld [vmem:[%s8846_s1 + $0xe0] sm:$0xff] }
 0x26c   :  { %v1127_v51 = vmul.f32 %v5012_v52, %v5008_v32  ;;  %v1192_v47 = vcombine.low %v1170_v44, %v1177_v57  ;;  %v1184_v37 = vrot.slane %v1162_v56, %v6446_v62  ;;  %9042 = vst [vmem:[#allocation10_spill] sm:$0xff] %v7022_v26  ;;  %9043 = vst [vmem:[#allocation11_spill] sm:$0xff] %v7028_v27  ;;  %v7040_v29 = vld [vmem:[%s8846_s1 + $0xf0] sm:$0xff]  ;;  %v7046_v30 = vld [vmem:[%s8846_s1 + $0xc8] sm:$0xff] }
 0x26d   :  { %1134 = vst [vmem:[%s8848_s2 + $0x31] sm:$0x1] %v1126_v45  ;;  %9044 = vst [vmem:[#allocation12_spill] sm:$0xff] %v7034_v28  ;;  %v7052_v31 = vld [vmem:[%s8846_s1 + $0xd8] sm:$0xff]  ;;  %v7058_v32 = vld [vmem:[%s8846_s1 + $0xc0] sm:$0xff] }
 0x26e   :  { %1135 = vst [vmem:[%s8848_s2 + $0x39] sm:$0x1] %v1127_v51  ;;  %v1163_v48 = vcombine.low %v1126_v45, %v1127_v51  ;;  %v1200_v42 = vrot.slane %v1192_v47, %v6446_v62  ;;  %9045 = vst [vmem:[#allocation13_spill] sm:$0xff] %v7040_v29  ;;  %v7064_v59 = vld [vmem:[%s8846_s1 + $0xd0] sm:$0xff]  ;;  %v7070_v57 = vld [vmem:[%s8846_s1 + $0xa8] sm:$0xff] }
 0x26f   :  { %9046 = vst [vmem:[#allocation14_spill] sm:$0xff] %v7046_v30  ;;  %9047 = vst [vmem:[#allocation15_spill] sm:$0xff] %v7052_v31  ;;  %v7076_v52 = vld [vmem:[%s8846_s1 + $0xb8] sm:$0xff]  ;;  %v7082_v45 = vld [vmem:[%s8846_s1 + $0xa0] sm:$0xff] }
 0x270   :  { %v1191_v60 = vrot.slane %v1163_v48, %v6446_v62  ;;  %9048 = vst [vmem:[#allocation16_spill] sm:$0xff] %v7058_v32  ;;  %9049 = vst [vmem:[#allocation17_spill] sm:$0xff] %v7064_v59  ;;  %v7088_v51 = vld [vmem:[%s8846_s1 + $0xb0] sm:$0xff]  ;;  %v7094_v56 = vld [vmem:[%s8846_s1 + $0x88] sm:$0xff] }
 0x271   :  { %9050 = vst [vmem:[#allocation18_spill] sm:$0xff] %v7070_v57  ;;  %9051 = vst [vmem:[#allocation19_spill] sm:$0xff] %v7076_v52  ;;  %v7100_v44 = vld [vmem:[%s8846_s1 + $0x98] sm:$0xff]  ;;  %v7106_v48 = vld [vmem:[%s8846_s1 + $0x80] sm:$0xff] }
 0x272   :  { %v1193_v39 = vcombine.low %v1184_v37, %v1191_v60  ;;  %9052 = vst [vmem:[#allocation20_spill] sm:$0xff] %v7082_v45  ;;  %9053 = vst [vmem:[#allocation21_spill] sm:$0xff] %v7088_v51  ;;  %v7112_v47 = vld [vmem:[%s8846_s1 + $0x90] sm:$0xff]  ;;  %v7118_v37 = vld [vmem:[%s8846_s1 + $0x68] sm:$0xff] }
 0x273   :  { %9054 = vst [vmem:[#allocation22_spill] sm:$0xff] %v7094_v56  ;;  %9055 = vst [vmem:[#allocation23_spill] sm:$0xff] %v7100_v44  ;;  %v7124_v60 = vld [vmem:[%s8846_s1 + $0x78] sm:$0xff] }
 0x274   :  { %v1207_v34 = vrot.slane %v1193_v39, %v6446_v62  ;;  %9056 = vst [vmem:[#allocation24_spill] sm:$0xff] %v7106_v48  ;;  %9057 = vst [vmem:[#allocation25_spill] sm:$0xff] %v7112_v47  ;;  %v7130_v39 = vld [vmem:[%s8846_s1 + $0x60] sm:$0xff] }
 0x275   :  { %9058 = vst [vmem:[#allocation26_spill] sm:$0xff] %v7118_v37  ;;  %9059 = vst [vmem:[#allocation27_spill] sm:$0xff] %v7124_v60 }
 0x276   :  { %v1208_v41 = vcombine.low %v1200_v42, %v1207_v34  ;;  %9060 = vst [vmem:[#allocation28_spill] sm:$0xff] %v7130_v39  ;;  %v7136_v42 = vld [vmem:[%s8846_s1 + $0x70] sm:$0xff]  ;;  %v7142_v34 = vld [vmem:[%s8846_s1 + $0x48] sm:$0xff] }
 0x277   :  { %9061 = vst [vmem:[#allocation29_spill] sm:$0xff] %v7136_v42  ;;  %9062 = vst [vmem:[#allocation30_spill] sm:$0xff] %v7142_v34 }
 0x278   :  { %1275 = vmatmul.mubr.f32.vlgmr.msra.gmra.mxu0 %v1208_v41  ;;  %1346 = vmatmul.mubr.f32.vlgmr.msra.gmra.mxu1 %v1208_v41  ;;  %v7148_v41 = vld [vmem:[%s8846_s1 + $0x58] sm:$0xff] }
 0x279   :  { %1771 = vmatpush1.msra.mxu0 %v6842_v54  ;;  %1842 = vmatpush1.msra.mxu1 %v6848_v53  ;;  %9063 = vst [vmem:[#allocation31_spill] sm:$0xff] %v7148_v41 }
 0x27a   :  { %1772 = vmatprep.subr.mxu0 %v6854_v43  ;;  %1843 = vmatprep.subr.mxu1 %v6860_v58 }
 0x27b   :  { %1773 = vmatpush1.msra.mxu0 %v6866_v15  ;;  %1844 = vmatpush1.msra.mxu1 %v6872_v40 }
 0x27c   :  { %1774 = vmatprep.subr.mxu0 %v6878_v16  ;;  %1845 = vmatprep.subr.mxu1 %v6884_v2 }
 0x27d   :  { %1775 = vmatpush1.msra.mxu0 %v6890_v4  ;;  %1846 = vmatpush1.msra.mxu1 %v6896_v5 }
 0x27e   :  { %1776 = vmatprep.subr.mxu0 %v6902_v6  ;;  %1847 = vmatprep.subr.mxu1 %v6908_v18 }
 0x27f   :  { %1777 = vmatpush1.msra.mxu0 %v6914_v7  ;;  %1848 = vmatpush1.msra.mxu1 %v6920_v8 }
 0x280   :  { %1778 = vmatprep.subr.mxu0 %v6926_v1  ;;  %1849 = vmatprep.subr.mxu1 %v6932_v49 }
 0x281   :  { %1779 = vmatpush1.msra.mxu0 %v6938_v10  ;;  %1850 = vmatpush1.msra.mxu1 %v6944_v61 }
 0x282   :  { %1780 = vmatprep.subr.mxu0 %v6950_v11  ;;  %1851 = vmatprep.subr.mxu1 %v6956_v63 }
 0x283   :  { %1781 = vmatpush1.msra.mxu0 %v6962_v17  ;;  %1852 = vmatpush1.msra.mxu1 %v6968_v12 }
 0x284   :  { %1782 = vmatprep.subr.mxu0 %v6974_v13  ;;  %1853 = vmatprep.subr.mxu1 %v6980_v20 }
 0x285   :  { %1783 = vmatpush1.msra.mxu0 %v6986_v14  ;;  %1854 = vmatpush1.msra.mxu1 %v6992_v22 }
 0x286   :  { %1784 = vmatprep.subr.mxu0 %v6998_v23  ;;  %1855 = vmatprep.subr.mxu1 %v7004_v21 }
 0x287   :  { %1785 = vmatpush1.msra.mxu0 %v7010_v25  ;;  %1856 = vmatpush1.msra.mxu1 %v7016_v24 }
 0x288   :  { %1786 = vmatprep.subr.mxu0 %v7022_v26  ;;  %1857 = vmatprep.subr.mxu1 %v7028_v27 }
 0x289   :  { %1787 = vmatpush1.msra.mxu0 %v7034_v28  ;;  %1858 = vmatpush1.msra.mxu1 %v7040_v29 }
 0x28a   :  { %1788 = vmatprep.subr.mxu0 %v7046_v30  ;;  %1859 = vmatprep.subr.mxu1 %v7052_v31 }
 0x28b   :  { %1789 = vmatpush1.msra.mxu0 %v7058_v32  ;;  %1860 = vmatpush1.msra.mxu1 %v7064_v59 }
 0x28c   :  { %1790 = vmatprep.subr.mxu0 %v7070_v57  ;;  %1861 = vmatprep.subr.mxu1 %v7076_v52  ;;  %v4563_v57 = vld [vmem:[%s8847_s0 + $0x2] ss:$8 sm:$0xf] }
 0x28d   :  { %1791 = vmatpush1.msra.mxu0 %v7082_v45  ;;  %1862 = vmatpush1.msra.mxu1 %v7088_v51 }
 0x28e   :  { %1792 = vmatprep.subr.mxu0 %v7094_v56  ;;  %1863 = vmatprep.subr.mxu1 %v7100_v44 }
 0x28f   :  { %1793 = vmatpush1.msra.mxu0 %v7106_v48  ;;  %1864 = vmatpush1.msra.mxu1 %v7112_v47 }
 0x290   :  { %1794 = vmatprep.subr.mxu0 %v7118_v37  ;;  %1865 = vmatprep.subr.mxu1 %v7124_v60 }
 0x291   :  { %1795 = vmatpush1.msra.mxu0 %v7130_v39  ;;  %1866 = vmatpush1.msra.mxu1 %v7136_v42  ;;  %v7154_v39 = vld [vmem:[%s8846_s1 + $0x40] sm:$0xff]  ;;  %v7160_v42 = vld [vmem:[%s8846_s1 + $0x50] sm:$0xff] }
 0x292   :  { %1796 = vmatprep.subr.mxu0 %v7142_v34  ;;  %1867 = vmatprep.subr.mxu1 %v7148_v41  ;;  %9064 = vst [vmem:[#allocation32_spill] sm:$0xff] %v7154_v39  ;;  %9065 = vst [vmem:[#allocation33_spill] sm:$0xff] %v7160_v42  ;;  %v7166_v34 = vld [vmem:[%s8846_s1 + $0x28] sm:$0xff]  ;;  %v7172_v41 = vld [vmem:[%s8846_s1 + $0x38] sm:$0xff] }
 0x293   :  { %1797 = vmatpush1.msra.mxu0 %v7154_v39  ;;  %1868 = vmatpush1.msra.mxu1 %v7160_v42  ;;  %9066 = vst [vmem:[#allocation34_spill] sm:$0xff] %v7166_v34  ;;  %9067 = vst [vmem:[#allocation35_spill] sm:$0xff] %v7172_v41  ;;  %v7178_v39 = vld [vmem:[%s8846_s1 + $0x20] sm:$0xff]  ;;  %v7184_v42 = vld [vmem:[%s8846_s1 + $0x30] sm:$0xff] }
 0x294   :  { %1798 = vmatprep.subr.mxu0 %v7166_v34  ;;  %1869 = vmatprep.subr.mxu1 %v7172_v41  ;;  %9068 = vst [vmem:[#allocation36_spill] sm:$0xff] %v7178_v39  ;;  %9069 = vst [vmem:[#allocation37_spill] sm:$0xff] %v7184_v42  ;;  %v7190_v34 = vld [vmem:[%s8846_s1 + $0x8] sm:$0xff]  ;;  %v7196_v41 = vld [vmem:[%s8846_s1 + $0x18] sm:$0xff] }
 0x295   :  { %1799 = vmatpush1.msra.mxu0 %v7178_v39  ;;  %1870 = vmatpush1.msra.mxu1 %v7184_v42  ;;  %9070 = vst [vmem:[#allocation38_spill] sm:$0xff] %v7190_v34  ;;  %9071 = vst [vmem:[#allocation39_spill] sm:$0xff] %v7196_v41  ;;  %v7202_v39 = vld [vmem:[%s8846_s1] sm:$0xff] }
 0x296   :  { %1800 = vmatprep.subr.mxu0 %v7190_v34  ;;  %1871 = vmatprep.subr.mxu1 %v7196_v41  ;;  %9072 = vst [vmem:[#allocation40_spill] sm:$0xff] %v7202_v39  ;;  %v7209_v34 = vld [vmem:[%s8846_s1 + $0x10] sm:$0xff] }
 0x297   :  { %1801 = vmatpush1.msra.mxu0 %v7202_v39  ;;  %1834 = vmatprep.mubr.f32.mxu0 %v9032_v0  ;;  %9073 = vst [vmem:[#allocation41_spill] sm:$0xff] %v7209_v34 }
 0x298   :  { %1872 = vmatpush1.msra.mxu1 %v7209_v34  ;;  %1905 = vmatprep.mubr.f32.mxu1 %v9032_v0 }
 0x299   :  { %2330 = vmatprep.subr.mxu0 %v6673_v50  ;;  %2401 = vmatprep.subr.mxu1 %v6679_v36 }
 0x338   :  { %v1276_v41 = vpop.f32.mrf.mxu0  ;;  %v1347_v42 = vpop.f32.mrf.mxu1 }
 0x33a   :  { %v1278_v60 = vpop.f32.mrf.mxu0  ;;  %v1349_v37 = vpop.f32.mrf.mxu1 }
 0x33b   :  { %v1356_v39 = vcombine.low %v1276_v41, %v1278_v60  ;;  %v1357_v47 = vcombine.high %v1276_v41, %v1278_v60  ;;  %v1358_v48 = vcombine.low %v1347_v42, %v1349_v37  ;;  %v1359_v44 = vcombine.high %v1347_v42, %v1349_v37  ;;  %v4564_v37 = vld [vmem:[%s8847_s0 + $0x22] ss:$8 sm:$0xf] }
 0x33c   :  { %v4566_v60 = vld [vmem:[%s8847_s0 + $0x62] ss:$8 sm:$0xf] }
 0x33d   :  { %v1366_v56 = vrot.slane %v1356_v39, %v6446_v62  ;;  %v1373_v51 = vrot.slane %v1357_v47, %v6446_v62  ;;  %v1380_v34 = vrot.slane %v1358_v48, %v6446_v62  ;;  %v1387_v0 = vrot.slane %v1359_v44, %v6446_v62  ;;  %v4565_v47 = vld [vmem:[%s8847_s0 + $0x42] ss:$8 sm:$0xf] }
 0x33e   :  { %v4567_v44 = vld [vmem:[%s8847_s0 + $0x82] ss:$8 sm:$0xf] }
 0x33f   :  { %v1388_v45 = vcombine.low %v1366_v56, %v1380_v34  ;;  %v1389_v50 = vcombine.high %v1366_v56, %v1380_v34  ;;  %v1390_v52 = vcombine.low %v1373_v51, %v1387_v0  ;;  %v1391_v36 = vcombine.high %v1373_v51, %v1387_v0  ;;  %v4568_v39 = vld [vmem:[%s8847_s0 + $0xa2] ss:$8 sm:$0xf] }
 0x340   :  { %v4569_v42 = vld [vmem:[%s8847_s0 + $0xc2] ss:$8 sm:$0xf] }
 0x341   :  { %v1398_v56 = vrot.slane %v1388_v45, %v6446_v62  ;;  %v1405_v0 = vrot.slane %v1390_v52, %v6446_v62  ;;  %v1412_v51 = vrot.slane %v1389_v50, %v6446_v62  ;;  %v1419_v48 = vrot.slane %v1391_v36, %v6446_v62  ;;  %v4570_v50 = vld [vmem:[%s8847_s0 + $0xe2] ss:$8 sm:$0xf] }
 0x343   :  { %v1420_v34 = vcombine.high %v1398_v56, %v1398_v56  ;;  %v1421_v45 = vcombine.high %v1405_v0, %v1405_v0  ;;  %v1422_v41 = vcombine.high %v1412_v51, %v1412_v51  ;;  %v1423_v52 = vcombine.high %v1419_v48, %v1419_v48 }
 0x344   :  { %v7247_v36 = vadd.f32 %v4563_v57, %v1398_v56  ;;  %v7249_v59 = vadd.f32 %v4564_v37, %v1412_v51  ;;  %v7251_v32 = vadd.f32 %v4567_v44, %v1405_v0  ;;  %v7257_v29 = vadd.f32 %v4568_v39, %v1419_v48 }
 0x345   :  { %v7253_v31 = vadd.f32 %v4565_v47, %v1420_v34  ;;  %v7255_v30 = vadd.f32 %v4566_v60, %v1422_v41  ;;  %v7259_v28 = vadd.f32 %v4569_v42, %v1421_v45  ;;  %v7263_v24 = vadd.f32 %v4570_v50, %v1423_v52 }
 0x346   :  { %v4571_v27 = vmul.f32 -1.442695, %v7247_v36  ;;  %v4572_v26 = vmul.f32 -1.442695, %v7249_v59  ;;  %v4575_v47 = vmul.f32 -1.442695, %v7251_v32 }
 0x347   :  { %v4573_v57 = vmul.f32 -1.442695, %v7253_v31  ;;  %v4574_v37 = vmul.f32 -1.442695, %v7255_v30  ;;  %v1496_v44 = vrot.slane %v7247_v36, 1  ;;  %v1497_v0 = vrot.slane %v7249_v59, 1 }
 0x348   :  { %5013 = vpow2.f32 %v4571_v27  ;;  %v4576_v56 = vmul.f32 -1.442695, %v7257_v29  ;;  %v4577_v51 = vmul.f32 -1.442695, %v7259_v28  ;;  %v1498_v48 = vrot.slane %v7253_v31, 1 }
 0x349   :  { %5015 = vpow2.f32 %v4572_v26  ;;  %v4578_v60 = vmul.f32 -1.442695, %v7263_v24  ;;  %v1499_v39 = vrot.slane %v7255_v30, 1  ;;  %v1500_v27 = vrot.slane %v7251_v32, 1 }
 0x34a   :  { %5017 = vpow2.f32 %v4573_v57  ;;  %v4579_v42 = vmul.f32 -1.442695, %v1496_v44  ;;  %v1501_v26 = vrot.slane %v7257_v29, 1  ;;  %v4580_v34 = vmul.f32 -1.442695, %v1497_v0 }
 0x34b   :  { %5019 = vpow2.f32 %v4574_v37  ;;  %v1502_v45 = vrot.slane %v7259_v28, 1  ;;  %v4581_v41 = vmul.f32 -1.442695, %v1498_v48  ;;  %v1503_v52 = vrot.slane %v7263_v24, 1 }
 0x34c   :  { %5021 = vpow2.f32 %v4575_v47  ;;  %v4582_v50 = vmul.f32 -1.442695, %v1499_v39  ;;  %v4583_v57 = vmul.f32 -1.442695, %v1500_v27  ;;  %v4584_v37 = vmul.f32 -1.442695, %v1501_v26 }
 0x34d   :  { %5023 = vpow2.f32 %v4576_v56  ;;  %v4585_v47 = vmul.f32 -1.442695, %v1502_v45  ;;  %v4586_v44 = vmul.f32 -1.442695, %v1503_v52 }
 0x34e   :  { %5025 = vpow2.f32 %v4577_v51 }
 0x34f   :  { %5027 = vpow2.f32 %v4578_v60 }
 0x350   :  { %5029 = vpow2.f32 %v4579_v42 }
 0x351   :  { %5031 = vpow2.f32 %v4580_v34 }
 0x352   :  { %5033 = vpow2.f32 %v4581_v41 }
 0x353   :  { %5035 = vpow2.f32 %v4582_v50 }
 0x354   :  { %5037 = vpow2.f32 %v4583_v57 }
 0x355   :  { %v5014_v56 = vpop.eup %5013  ;;  %5039 = vpow2.f32 %v4584_v37 }
 0x356   :  { %v5016_v0 = vpop.eup %5015  ;;  %v1464_v51 = vadd.f32 1.0, %v5014_v56  ;;  %5041 = vpow2.f32 %v4585_v47 }
 0x357   :  { %v5018_v25 = vpop.eup %5017  ;;  %v1465_v48 = vadd.f32 1.0, %v5016_v0  ;;  %5043 = vpow2.f32 %v4586_v44 }
 0x358   :  { %v5020_v60 = vpop.eup %5019  ;;  %v1466_v21 = vadd.f32 1.0, %v5018_v25  ;;  %5045 = vrcp.f32 %v1464_v51 }
 0x359   :  { %v5022_v39 = vpop.eup %5021  ;;  %v1467_v27 = vadd.f32 1.0, %v5020_v60  ;;  %5047 = vrcp.f32 %v1465_v48 }
 0x35a   :  { %v5024_v42 = vpop.eup %5023  ;;  %v1468_v26 = vadd.f32 1.0, %v5022_v39  ;;  %5049 = vrcp.f32 %v1466_v21 }
 0x35b   :  { %v5026_v34 = vpop.eup %5025  ;;  %v1469_v45 = vadd.f32 1.0, %v5024_v42  ;;  %5051 = vrcp.f32 %v1467_v27 }
 0x35c   :  { %v5028_v41 = vpop.eup %5027  ;;  %v1470_v52 = vadd.f32 1.0, %v5026_v34  ;;  %5053 = vrcp.f32 %v1468_v26  ;;  %v1560_v34 = vrot.slane %v7247_v36, 2 }
 0x35d   :  { %v5030_v50 = vpop.eup %5029  ;;  %v1471_v57 = vadd.f32 1.0, %v5028_v41  ;;  %5055 = vrcp.f32 %v1469_v45 }
 0x35e   :  { %v5032_v37 = vpop.eup %5031  ;;  %5057 = vrcp.f32 %v1470_v52  ;;  %v1536_v47 = vadd.f32 1.0, %v5030_v50  ;;  %v1561_v52 = vrot.slane %v7249_v59, 2 }
 0x35f   :  { %v5034_v25 = vpop.eup %5033  ;;  %5059 = vrcp.f32 %v1471_v57  ;;  %v1537_v44 = vadd.f32 1.0, %v5032_v37  ;;  %v1562_v57 = vrot.slane %v7253_v31, 2 }
 0x360   :  { %v5036_v56 = vpop.eup %5035  ;;  %v1538_v0 = vadd.f32 1.0, %v5034_v25  ;;  %5061 = vrcp.f32 %v1536_v47  ;;  %v1563_v47 = vrot.slane %v7255_v30, 2 }
 0x361   :  { %v5038_v51 = vpop.eup %5037  ;;  %v1539_v21 = vadd.f32 1.0, %v5036_v56  ;;  %5063 = vrcp.f32 %v1537_v44  ;;  %v1564_v44 = vrot.slane %v7251_v32, 2  ;;  %v1584_v56 = vrot.slane %v7247_v36, 3 }
 0x362   :  { %v5040_v48 = vpop.eup %5039  ;;  %v1540_v60 = vadd.f32 1.0, %v5038_v51  ;;  %5065 = vrcp.f32 %v1538_v0  ;;  %v1565_v51 = vrot.slane %v7257_v29, 2  ;;  %v1587_v36 = vrot.slane %v7255_v30, 3 }
 0x363   :  { %v5042_v39 = vpop.eup %5041  ;;  %v1541_v27 = vadd.f32 1.0, %v5040_v48  ;;  %5067 = vrcp.f32 %v1539_v21  ;;  %v1585_v21 = vrot.slane %v7249_v59, 3  ;;  %v4587_v59 = vmul.f32 -1.442695, %v1584_v56 }
 0x364   :  { %v5044_v42 = vpop.eup %5043  ;;  %v1542_v26 = vadd.f32 1.0, %v5042_v39  ;;  %5069 = vrcp.f32 %v1540_v60  ;;  %v1566_v60 = vrot.slane %v7259_v28, 2  ;;  %v1586_v39 = vrot.slane %v7253_v31, 3 }
 0x365   :  { %v5046_v45 = vpop.eup %5045  ;;  %v1543_v41 = vadd.f32 1.0, %v5044_v42  ;;  %5071 = vrcp.f32 %v1541_v27  ;;  %v1567_v42 = vrot.slane %v7263_v24, 2  ;;  %v1590_v31 = vrot.slane %v7259_v28, 3 }
 0x366   :  { %v5048_v50 = vpop.eup %5047  ;;  %5073 = vrcp.f32 %v1542_v26  ;;  %v4589_v22 = vmul.f32 -1.442695, %v1586_v39  ;;  %v1591_v30 = vrot.slane %v7263_v24, 3 }
 0x367   :  { %v5050_v37 = vpop.eup %5049  ;;  %5075 = vrcp.f32 %v1543_v41 }
 0x368   :  { %v7283_v25 = vpop.eup %5051  ;;  %5077 = vtanh.f32 %v1560_v34  ;;  %v1588_v34 = vrot.slane %v7251_v32, 3 }
 0x369   :  { %v7287_v0 = vpop.eup %5053  ;;  %5079 = vtanh.f32 %v1561_v52  ;;  %v1589_v52 = vrot.slane %v7257_v29, 3  ;;  %v4593_v29 = vmul.f32 -1.442695, %v1590_v31 }
 0x36a   :  { %v7291_v48 = vpop.eup %5055  ;;  %5081 = vtanh.f32 %v1562_v57  ;;  %v4588_v57 = vmul.f32 -1.442695, %v1585_v21 }
 0x36b   :  { %v7295_v27 = vpop.eup %5057  ;;  %5083 = vtanh.f32 %v1563_v47  ;;  %v4590_v47 = vmul.f32 -1.442695, %v1587_v36  ;;  %v4592_v56 = vmul.f32 -1.442695, %v1589_v52 }
 0x36c   :  { %v7299_v26 = vpop.eup %5059  ;;  %5085 = vtanh.f32 %v1564_v44  ;;  %v4591_v44 = vmul.f32 -1.442695, %v1588_v34 }
 0x36d   :  { %v5062_v41 = vpop.eup %5061  ;;  %5087 = vtanh.f32 %v1565_v51 }
 0x36e   :  { %v5064_v23 = vpop.eup %5063  ;;  %5089 = vtanh.f32 %v1566_v60  ;;  %v4594_v60 = vmul.f32 -1.442695, %v1591_v30  ;;  %v1648_v28 = vmul.f32 %v5062_v41, %v6777_v46 }
 0x36f   :  { %v5066_v14 = vpop.eup %5065  ;;  %5091 = vtanh.f32 %v1567_v42  ;;  %v1649_v24 = vmul.f32 %v5064_v23, %v6781_v3 }
 0x370   :  { %v5068_v20 = vpop.eup %5067  ;;  %5093 = vpow2.f32 %v4587_v59  ;;  %v1650_v34 = vmul.f32 %v5066_v14, %v6784_v35 }
 0x371   :  { %v5070_v32 = vpop.eup %5069  ;;  %5095 = vpow2.f32 %v4588_v57  ;;  %v1651_v52 = vmul.f32 %v5068_v20, %v6788_v55 }
 0x372   :  { %v5072_v51 = vpop.eup %5071  ;;  %5097 = vpow2.f32 %v4589_v22  ;;  %v1652_v30 = vmul.f32 %v5070_v32, %v6791_v38 }
 0x373   :  { %v5074_v21 = vpop.eup %5073  ;;  %5099 = vpow2.f32 %v4590_v47  ;;  %v1653_v3 = vmul.f32 %v5072_v51, %v6794_v33 }
 0x374   :  { %v5076_v13 = vpop.eup %5075  ;;  %5101 = vpow2.f32 %v4591_v44 }
 0x375   :  { %v5078_v39 = vpop.eup %5077  ;;  %5103 = vpow2.f32 %v4592_v56 }
 0x376   :  { %v5080_v42 = vpop.eup %5079  ;;  %5105 = vpow2.f32 %v4593_v29  ;;  %v1656_v36 = vmul.f32 %v5078_v39, %v5046_v45  ;;  %v1654_v29 = vmul.f32 %v5074_v21, %v6803_v19  ;;  %v1655_v39 = vmul.f32 %v5076_v13, %v6805_v9 }
 0x377   :  { %v5082_v59 = vpop.eup %5081  ;;  %5107 = vpow2.f32 %v4594_v60  ;;  %v1657_v22 = vmul.f32 %v5080_v42, %v5048_v50 }
 0x378   :  { %v5084_v57 = vpop.eup %5083  ;;  %v1658_v31 = vmul.f32 %v5082_v59, %v5050_v37  ;;  %v7310_v47 = vadd.f32 %v1656_v36, %v1648_v28 }
 0x379   :  { %v5086_v46 = vpop.eup %5085  ;;  %v1659_v41 = vmul.f32 %v5084_v57, %v7283_v25  ;;  %v7314_v23 = vadd.f32 %v1657_v22, %v1649_v24 }
 0x37a   :  { %v5088_v45 = vpop.eup %5087  ;;  %v1660_v35 = vmul.f32 %v5086_v46, %v7287_v0  ;;  %v7317_v14 = vadd.f32 %v1658_v31, %v1650_v34  ;;  %5109 = vtanh.f32 %v7310_v47 }
 0x37b   :  { %v5090_v55 = vpop.eup %5089  ;;  %v1661_v20 = vmul.f32 %v5088_v45, %v7291_v48  ;;  %v7321_v38 = vadd.f32 %v1659_v41, %v1651_v52  ;;  %5111 = vtanh.f32 %v7314_v23 }
 0x37c   :  { %v5092_v50 = vpop.eup %5091  ;;  %v7324_v37 = vadd.f32 %v1660_v35, %v1652_v30  ;;  %5113 = vtanh.f32 %v7317_v14  ;;  %v1662_v36 = vmul.f32 %v5090_v55, %v7295_v27 }
 0x37d   :  { %v5094_v33 = vpop.eup %5093  ;;  %v7327_v25 = vadd.f32 %v1661_v20, %v1653_v3  ;;  %5115 = vtanh.f32 %v7321_v38  ;;  %v1663_v22 = vmul.f32 %v5092_v50, %v7299_v26 }
 0x37e   :  { %v5096_v0 = vpop.eup %5095  ;;  %v1624_v44 = vadd.f32 1.0, %v5094_v33  ;;  %5117 = vtanh.f32 %v7324_v37  ;;  %v7336_v31 = vadd.f32 %v1662_v36, %v1654_v29 }
 0x37f   :  { %v5098_v32 = vpop.eup %5097  ;;  %v1625_v48 = vadd.f32 1.0, %v5096_v0  ;;  %5119 = vtanh.f32 %v7327_v25  ;;  %v7338_v21 = vadd.f32 %v1663_v22, %v1655_v39 }
 0x380   :  { %v5100_v56 = vpop.eup %5099  ;;  %v1626_v51 = vadd.f32 1.0, %v5098_v32  ;;  %5121 = vrcp.f32 %v1624_v44 }
 0x381   :  { %v5102_v60 = vpop.eup %5101  ;;  %v1627_v28 = vadd.f32 1.0, %v5100_v56  ;;  %5123 = vrcp.f32 %v1625_v48 }
 0x382   :  { %v5104_v24 = vpop.eup %5103  ;;  %v1628_v42 = vadd.f32 1.0, %v5102_v60  ;;  %5125 = vrcp.f32 %v1626_v51 }
 0x383   :  { %v5106_v34 = vpop.eup %5105  ;;  %v1629_v59 = vadd.f32 1.0, %v5104_v24  ;;  %5127 = vrcp.f32 %v1627_v28 }
 0x384   :  { %v5108_v52 = vpop.eup %5107  ;;  %v1630_v57 = vadd.f32 1.0, %v5106_v34  ;;  %5129 = vrcp.f32 %v1628_v42 }
 0x385   :  { %v1631_v19 = vadd.f32 1.0, %v5108_v52  ;;  %5131 = vrcp.f32 %v1629_v59 }
 0x386   :  { %5133 = vrcp.f32 %v1630_v57 }
 0x387   :  { %v5110_v9 = vpop.eup %5109  ;;  %5135 = vrcp.f32 %v1631_v19 }
 0x388   :  { %v5112_v13 = vpop.eup %5111  ;;  %5137 = vtanh.f32 %v7336_v31 }
 0x389   :  { %v5114_v27 = vpop.eup %5113  ;;  %5139 = vtanh.f32 %v7338_v21 }
 0x38a   :  { %v5116_v30 = vpop.eup %5115 }
 0x38b   :  { %v5118_v26 = vpop.eup %5117 }
 0x38c   :  { %v5120_v46 = vpop.eup %5119 }
 0x38d   :  { %v5122_v41 = vpop.eup %5121 }
 0x38e   :  { %v5124_v3 = vpop.eup %5123  ;;  %v1680_v45 = vmul.f32 %v5122_v41, %v5110_v9  ;;  %v9098_v41 = vld [vmem:[#allocation26_spill] sm:$0xff] }
 0x38f   :  { %v5126_v35 = vpop.eup %5125  ;;  %v1681_v55 = vmul.f32 %v5124_v3, %v5112_v13  ;;  %v9099_v3 = vld [vmem:[#allocation27_spill] sm:$0xff] }
 0x390   :  { %v5128_v20 = vpop.eup %5127  ;;  %v1682_v50 = vmul.f32 %v5126_v35, %v5114_v27  ;;  %1688 = vst [vmem:[%s8848_s2 + $0x2] sm:$0x1] %v1680_v45  ;;  %v9101_v35 = vld [vmem:[#allocation29_spill] sm:$0xff] }
 0x391   :  { %v5130_v33 = vpop.eup %5129  ;;  %v1683_v0 = vmul.f32 %v5128_v20, %v5116_v30  ;;  %1689 = vst [vmem:[%s8848_s2 + $0xa] sm:$0x1] %v1681_v55  ;;  %v1720_v51 = vcombine.low %v1680_v45, %v1681_v55  ;;  %v9100_v45 = vld [vmem:[#allocation28_spill] sm:$0xff]  ;;  %v9102_v55 = vld [vmem:[#allocation30_spill] sm:$0xff]  ;;  %v9103_v20 = vld [vmem:[#allocation31_spill] sm:$0xff] }
 0x392   :  { %v5132_v44 = vpop.eup %5131  ;;  %v1684_v32 = vmul.f32 %v5130_v33, %v5118_v26  ;;  %1690 = vst [vmem:[%s8848_s2 + $0x12] sm:$0x1] %v1682_v50  ;;  %v9096_v26 = vld [vmem:[#allocation24_spill] sm:$0xff]  ;;  %v9105_v33 = vld [vmem:[#allocation33_spill] sm:$0xff] }
 0x393   :  { %v5134_v48 = vpop.eup %5133  ;;  %v1685_v56 = vmul.f32 %v5132_v44, %v5120_v46  ;;  %1691 = vst [vmem:[%s8848_s2 + $0x1a] sm:$0x1] %v1683_v0  ;;  %v1721_v29 = vcombine.low %v1682_v50, %v1683_v0  ;;  %v1730_v59 = vrot.slane %v1720_v51, %v6446_v62  ;;  %v9097_v46 = vld [vmem:[#allocation25_spill] sm:$0xff]  ;;  %v9104_v50 = vld [vmem:[#allocation32_spill] sm:$0xff]  ;;  %v9106_v0 = vld [vmem:[#allocation34_spill] sm:$0xff] }
 0x394   :  { %v5136_v60 = vpop.eup %5135  ;;  %1692 = vst [vmem:[%s8848_s2 + $0x22] sm:$0x1] %v1684_v32  ;;  %v9107_v44 = vld [vmem:[#allocation35_spill] sm:$0xff] }
 0x395   :  { %v5138_v28 = vpop.eup %5137  ;;  %1693 = vst [vmem:[%s8848_s2 + $0x2a] sm:$0x1] %v1685_v56  ;;  %v1737_v39 = vrot.slane %v1721_v29, %v6446_v62  ;;  %v1722_v34 = vcombine.low %v1684_v32, %v1685_v56  ;;  %v9108_v32 = vld [vmem:[#allocation36_spill] sm:$0xff]  ;;  %v9110_v56 = vld [vmem:[#allocation38_spill] sm:$0xff]  ;;  %v9111_v51 = vld [vmem:[#allocation39_spill] sm:$0xff] }
 0x396   :  { %v5140_v24 = vpop.eup %5139  ;;  %v1686_v42 = vmul.f32 %v5138_v28, %v5134_v48  ;;  %v9109_v48 = vld [vmem:[#allocation37_spill] sm:$0xff]  ;;  %v9112_v29 = vld [vmem:[#allocation40_spill] sm:$0xff] }
 0x397   :  { %v1687_v36 = vmul.f32 %v5140_v24, %v5136_v60  ;;  %v1752_v52 = vcombine.low %v1730_v59, %v1737_v39  ;;  %v1744_v57 = vrot.slane %v1722_v34, %v6446_v62  ;;  %v9113_v60 = vmov 0.0   ;;  %v9114_v28 = vld [vmem:[#allocation41_spill] sm:$0xff]  ;;  %v7439_v39 = vld [vmem:[%s8846_s1 + $0x1e8] sm:$0xff] }
 0x398   :  { %1694 = vst [vmem:[%s8848_s2 + $0x32] sm:$0x1] %v1686_v42  ;;  %v7445_v24 = vld [vmem:[%s8846_s1 + $0x1f8] sm:$0xff] }
 0x399   :  { %1695 = vst [vmem:[%s8848_s2 + $0x3a] sm:$0x1] %v1687_v36  ;;  %v1723_v22 = vcombine.low %v1686_v42, %v1687_v36  ;;  %v1760_v13 = vrot.slane %v1752_v52, %v6446_v62 }
 0x39b   :  { %v1751_v19 = vrot.slane %v1723_v22, %v6446_v62 }
 0x39d   :  { %v1753_v9 = vcombine.low %v1744_v57, %v1751_v19 }
 0x39f   :  { %v1767_v27 = vrot.slane %v1753_v9, %v6446_v62 }
 0x3a1   :  { %v1768_v30 = vcombine.low %v1760_v13, %v1767_v27 }
 0x3a3   :  { %1835 = vmatmul.mubr.f32.vlgmr.msra.gmra.mxu0 %v1768_v30  ;;  %1906 = vmatmul.mubr.f32.vlgmr.msra.gmra.mxu1 %v1768_v30 }
 0x3a4   :  { %2331 = vmatpush1.msra.mxu0 %v6842_v54  ;;  %2402 = vmatpush1.msra.mxu1 %v6848_v53  ;;  %v9074_v54 = vld [vmem:[#allocation2_spill] sm:$0xff]  ;;  %v9075_v53 = vld [vmem:[#allocation3_spill] sm:$0xff] }
 0x3a5   :  { %2332 = vmatprep.subr.mxu0 %v6854_v43  ;;  %2403 = vmatprep.subr.mxu1 %v6860_v58  ;;  %v9076_v43 = vld [vmem:[#allocation4_spill] sm:$0xff]  ;;  %v9077_v58 = vld [vmem:[#allocation5_spill] sm:$0xff] }
 0x3a6   :  { %2333 = vmatpush1.msra.mxu0 %v6866_v15  ;;  %2404 = vmatpush1.msra.mxu1 %v6872_v40  ;;  %v9078_v15 = vld [vmem:[#allocation6_spill] sm:$0xff]  ;;  %v9079_v40 = vld [vmem:[#allocation7_spill] sm:$0xff] }
 0x3a7   :  { %2334 = vmatprep.subr.mxu0 %v6878_v16  ;;  %2405 = vmatprep.subr.mxu1 %v6884_v2  ;;  %v9080_v16 = vld [vmem:[#allocation8_spill] sm:$0xff]  ;;  %v9081_v2 = vld [vmem:[#allocation9_spill] sm:$0xff] }
 0x3a8   :  { %2335 = vmatpush1.msra.mxu0 %v6890_v4  ;;  %2406 = vmatpush1.msra.mxu1 %v6896_v5  ;;  %v9082_v4 = vld [vmem:[#allocation10_spill] sm:$0xff]  ;;  %v9083_v5 = vld [vmem:[#allocation11_spill] sm:$0xff] }
 0x3a9   :  { %2336 = vmatprep.subr.mxu0 %v6902_v6  ;;  %2407 = vmatprep.subr.mxu1 %v6908_v18  ;;  %v9084_v6 = vld [vmem:[#allocation12_spill] sm:$0xff]  ;;  %v9085_v18 = vld [vmem:[#allocation13_spill] sm:$0xff] }
 0x3aa   :  { %2337 = vmatpush1.msra.mxu0 %v6914_v7  ;;  %2408 = vmatpush1.msra.mxu1 %v6920_v8  ;;  %v9086_v7 = vld [vmem:[#allocation14_spill] sm:$0xff]  ;;  %v9087_v8 = vld [vmem:[#allocation15_spill] sm:$0xff] }
 0x3ab   :  { %2338 = vmatprep.subr.mxu0 %v6926_v1  ;;  %2409 = vmatprep.subr.mxu1 %v6932_v49  ;;  %v9088_v1 = vld [vmem:[#allocation16_spill] sm:$0xff]  ;;  %v9089_v49 = vld [vmem:[#allocation17_spill] sm:$0xff] }
 0x3ac   :  { %2339 = vmatpush1.msra.mxu0 %v6938_v10  ;;  %2410 = vmatpush1.msra.mxu1 %v6944_v61  ;;  %v9090_v10 = vld [vmem:[#allocation18_spill] sm:$0xff]  ;;  %v9091_v61 = vld [vmem:[#allocation19_spill] sm:$0xff] }
 0x3ad   :  { %2340 = vmatprep.subr.mxu0 %v6950_v11  ;;  %2411 = vmatprep.subr.mxu1 %v6956_v63  ;;  %v9092_v11 = vld [vmem:[#allocation20_spill] sm:$0xff]  ;;  %v9093_v63 = vld [vmem:[#allocation21_spill] sm:$0xff] }
 0x3ae   :  { %2341 = vmatpush1.msra.mxu0 %v6962_v17  ;;  %2412 = vmatpush1.msra.mxu1 %v6968_v12  ;;  %v9094_v17 = vld [vmem:[#allocation22_spill] sm:$0xff]  ;;  %v9095_v12 = vld [vmem:[#allocation23_spill] sm:$0xff] }
 0x3af   :  { %2342 = vmatprep.subr.mxu0 %v9074_v54  ;;  %2413 = vmatprep.subr.mxu1 %v9075_v53 }
 0x3b0   :  { %2343 = vmatpush1.msra.mxu0 %v9076_v43  ;;  %2414 = vmatpush1.msra.mxu1 %v9077_v58 }
 0x3b1   :  { %2344 = vmatprep.subr.mxu0 %v9078_v15  ;;  %2415 = vmatprep.subr.mxu1 %v9079_v40  ;;  %v4595_v15 = vld [vmem:[%s8847_s0 + $0x3] ss:$8 sm:$0xf] }
 0x3b2   :  { %2345 = vmatpush1.msra.mxu0 %v9080_v16  ;;  %2416 = vmatpush1.msra.mxu1 %v9081_v2  ;;  %v4596_v40 = vld [vmem:[%s8847_s0 + $0x23] ss:$8 sm:$0xf] }
 0x3b3   :  { %2346 = vmatprep.subr.mxu0 %v9082_v4  ;;  %2417 = vmatprep.subr.mxu1 %v9083_v5  ;;  %v4597_v16 = vld [vmem:[%s8847_s0 + $0x43] ss:$8 sm:$0xf] }
 0x3b4   :  { %2347 = vmatpush1.msra.mxu0 %v9084_v6  ;;  %2418 = vmatpush1.msra.mxu1 %v9085_v18  ;;  %v4599_v2 = vld [vmem:[%s8847_s0 + $0x83] ss:$8 sm:$0xf] }
 0x3b5   :  { %2348 = vmatprep.subr.mxu0 %v9086_v7  ;;  %2419 = vmatprep.subr.mxu1 %v9087_v8  ;;  %v4598_v7 = vld [vmem:[%s8847_s0 + $0x63] ss:$8 sm:$0xf] }
 0x3b6   :  { %2349 = vmatpush1.msra.mxu0 %v9088_v1  ;;  %2420 = vmatpush1.msra.mxu1 %v9089_v49  ;;  %v4600_v8 = vld [vmem:[%s8847_s0 + $0xa3] ss:$8 sm:$0xf] }
 0x3b7   :  { %2350 = vmatprep.subr.mxu0 %v9090_v10  ;;  %2421 = vmatprep.subr.mxu1 %v9091_v61  ;;  %v4601_v1 = vld [vmem:[%s8847_s0 + $0xc3] ss:$8 sm:$0xf] }
 0x3b8   :  { %2351 = vmatpush1.msra.mxu0 %v9092_v11  ;;  %2422 = vmatpush1.msra.mxu1 %v9093_v63  ;;  %v4602_v63 = vld [vmem:[%s8847_s0 + $0xe3] ss:$8 sm:$0xf] }
 0x3b9   :  { %2352 = vmatprep.subr.mxu0 %v9094_v17  ;;  %2423 = vmatprep.subr.mxu1 %v9095_v12 }
 0x3ba   :  { %2353 = vmatpush1.msra.mxu0 %v9096_v26  ;;  %2424 = vmatpush1.msra.mxu1 %v9097_v46 }
 0x3bb   :  { %2354 = vmatprep.subr.mxu0 %v9098_v41  ;;  %2425 = vmatprep.subr.mxu1 %v9099_v3 }
 0x3bc   :  { %2355 = vmatpush1.msra.mxu0 %v9100_v45  ;;  %2426 = vmatpush1.msra.mxu1 %v9101_v35 }
 0x3bd   :  { %2356 = vmatprep.subr.mxu0 %v9102_v55  ;;  %2427 = vmatprep.subr.mxu1 %v9103_v20 }
 0x3be   :  { %2357 = vmatpush1.msra.mxu0 %v9104_v50  ;;  %2428 = vmatpush1.msra.mxu1 %v9105_v33 }
 0x3bf   :  { %2358 = vmatprep.subr.mxu0 %v9106_v0  ;;  %2429 = vmatprep.subr.mxu1 %v9107_v44 }
 0x3c0   :  { %2359 = vmatpush1.msra.mxu0 %v9108_v32  ;;  %2430 = vmatpush1.msra.mxu1 %v9109_v48 }
 0x3c1   :  { %2360 = vmatprep.subr.mxu0 %v9110_v56  ;;  %2431 = vmatprep.subr.mxu1 %v9111_v51 }
 0x3c2   :  { %2361 = vmatpush1.msra.mxu0 %v9112_v29  ;;  %2394 = vmatprep.mubr.f32.mxu0 %v9113_v60 }
 0x3c3   :  { %2432 = vmatpush1.msra.mxu1 %v9114_v28  ;;  %2465 = vmatprep.mubr.f32.mxu1 %v9113_v60 }
 0x3c4   :  { %2890 = vmatprep.subr.mxu0 %v7439_v39  ;;  %2961 = vmatprep.subr.mxu1 %v7445_v24 }
 0x463   :  { %v1836_v42 = vpop.f32.mrf.mxu0  ;;  %v1907_v36 = vpop.f32.mrf.mxu1 }
 0x465   :  { %v1838_v34 = vpop.f32.mrf.mxu0  ;;  %v1909_v59 = vpop.f32.mrf.mxu1 }
 0x466   :  { %v1916_v22 = vcombine.low %v1836_v42, %v1838_v34  ;;  %v1917_v52 = vcombine.high %v1836_v42, %v1838_v34  ;;  %v1918_v57 = vcombine.low %v1907_v36, %v1909_v59  ;;  %v1919_v19 = vcombine.high %v1907_v36, %v1909_v59 }
 0x468   :  { %v1926_v9 = vrot.slane %v1916_v22, %v6446_v62  ;;  %v1933_v13 = vrot.slane %v1917_v52, %v6446_v62  ;;  %v1940_v27 = vrot.slane %v1918_v57, %v6446_v62  ;;  %v1947_v30 = vrot.slane %v1919_v19, %v6446_v62 }
 0x46a   :  { %v1948_v54 = vcombine.low %v1926_v9, %v1940_v27  ;;  %v1949_v53 = vcombine.high %v1926_v9, %v1940_v27  ;;  %v1950_v43 = vcombine.low %v1933_v13, %v1947_v30  ;;  %v1951_v58 = vcombine.high %v1933_v13, %v1947_v30 }
 0x46c   :  { %v1958_v4 = vrot.slane %v1948_v54, %v6446_v62  ;;  %v1965_v5 = vrot.slane %v1950_v43, %v6446_v62  ;;  %v1972_v6 = vrot.slane %v1949_v53, %v6446_v62  ;;  %v1979_v18 = vrot.slane %v1951_v58, %v6446_v62 }
 0x46e   :  { %v1980_v49 = vcombine.high %v1958_v4, %v1958_v4  ;;  %v1981_v10 = vcombine.high %v1965_v5, %v1965_v5  ;;  %v1982_v61 = vcombine.high %v1972_v6, %v1972_v6  ;;  %v1983_v11 = vcombine.high %v1979_v18, %v1979_v18 }
 0x46f   :  { %v7480_v17 = vadd.f32 %v4595_v15, %v1958_v4  ;;  %v7482_v12 = vadd.f32 %v4596_v40, %v1972_v6  ;;  %v7484_v26 = vadd.f32 %v4599_v2, %v1965_v5  ;;  %v7490_v3 = vadd.f32 %v4600_v8, %v1979_v18 }
 0x470   :  { %v7486_v46 = vadd.f32 %v4597_v16, %v1980_v49  ;;  %v7488_v41 = vadd.f32 %v4598_v7, %v1982_v61  ;;  %v7492_v45 = vadd.f32 %v4601_v1, %v1981_v10  ;;  %v7496_v20 = vadd.f32 %v4602_v63, %v1983_v11 }
 0x471   :  { %v4603_v35 = vmul.f32 -1.442695, %v7480_v17  ;;  %v4604_v55 = vmul.f32 -1.442695, %v7482_v12  ;;  %v4607_v0 = vmul.f32 -1.442695, %v7484_v26 }
 0x472   :  { %v4605_v50 = vmul.f32 -1.442695, %v7486_v46  ;;  %v4606_v33 = vmul.f32 -1.442695, %v7488_v41  ;;  %v2056_v44 = vrot.slane %v7480_v17, 1  ;;  %v2057_v48 = vrot.slane %v7482_v12, 1 }
 0x473   :  { %5141 = vpow2.f32 %v4603_v35  ;;  %v4608_v32 = vmul.f32 -1.442695, %v7490_v3  ;;  %v4609_v56 = vmul.f32 -1.442695, %v7492_v45  ;;  %v2058_v51 = vrot.slane %v7486_v46, 1 }
 0x474   :  { %5143 = vpow2.f32 %v4604_v55  ;;  %v4610_v29 = vmul.f32 -1.442695, %v7496_v20  ;;  %v2059_v28 = vrot.slane %v7488_v41, 1  ;;  %v2060_v42 = vrot.slane %v7484_v26, 1 }
 0x475   :  { %5145 = vpow2.f32 %v4605_v50  ;;  %v4611_v36 = vmul.f32 -1.442695, %v2056_v44  ;;  %v2061_v34 = vrot.slane %v7490_v3, 1  ;;  %v4612_v59 = vmul.f32 -1.442695, %v2057_v48 }
 0x476   :  { %5147 = vpow2.f32 %v4606_v33  ;;  %v2062_v22 = vrot.slane %v7492_v45, 1  ;;  %v4613_v52 = vmul.f32 -1.442695, %v2058_v51  ;;  %v2063_v57 = vrot.slane %v7496_v20, 1 }
 0x477   :  { %5149 = vpow2.f32 %v4607_v0  ;;  %v4614_v19 = vmul.f32 -1.442695, %v2059_v28  ;;  %v4615_v9 = vmul.f32 -1.442695, %v2060_v42  ;;  %v4616_v13 = vmul.f32 -1.442695, %v2061_v34 }
 0x478   :  { %5151 = vpow2.f32 %v4608_v32  ;;  %v4617_v27 = vmul.f32 -1.442695, %v2062_v22  ;;  %v4618_v30 = vmul.f32 -1.442695, %v2063_v57  ;;  %v2120_v28 = vrot.slane %v7480_v17, 2 }
 0x479   :  { %5153 = vpow2.f32 %v4609_v56  ;;  %v2121_v34 = vrot.slane %v7482_v12, 2  ;;  %v2122_v22 = vrot.slane %v7486_v46, 2  ;;  %v2123_v57 = vrot.slane %v7488_v41, 2 }
 0x47a   :  { %5155 = vpow2.f32 %v4610_v29 }
 0x47b   :  { %5157 = vpow2.f32 %v4611_v36 }
 0x47c   :  { %5159 = vpow2.f32 %v4612_v59 }
 0x47d   :  { %5161 = vpow2.f32 %v4613_v52 }
 0x47e   :  { %5163 = vpow2.f32 %v4614_v19 }
 0x47f   :  { %5165 = vpow2.f32 %v4615_v9  ;;  %v2124_v9 = vrot.slane %v7484_v26, 2 }
 0x480   :  { %v5142_v54 = vpop.eup %5141  ;;  %5167 = vpow2.f32 %v4616_v13  ;;  %v2144_v13 = vrot.slane %v7480_v17, 3  ;;  %v2147_v17 = vrot.slane %v7488_v41, 3  ;;  %v2151_v41 = vrot.slane %v7496_v20, 3 }
 0x481   :  { %v5144_v53 = vpop.eup %5143  ;;  %v2024_v43 = vadd.f32 1.0, %v5142_v54  ;;  %5169 = vpow2.f32 %v4617_v27  ;;  %v2145_v54 = vrot.slane %v7482_v12, 3 }
 0x482   :  { %v5146_v58 = vpop.eup %5145  ;;  %v2025_v15 = vadd.f32 1.0, %v5144_v53  ;;  %5171 = vpow2.f32 %v4618_v30  ;;  %v2125_v30 = vrot.slane %v7490_v3, 2  ;;  %v4619_v12 = vmul.f32 -1.442695, %v2144_v13 }
 0x483   :  { %v5148_v40 = vpop.eup %5147  ;;  %v2026_v16 = vadd.f32 1.0, %v5146_v58  ;;  %5173 = vrcp.f32 %v2024_v43  ;;  %v2126_v43 = vrot.slane %v7492_v45, 2  ;;  %v2146_v58 = vrot.slane %v7486_v46, 3 }
 0x484   :  { %v5150_v2 = vpop.eup %5149  ;;  %v2027_v4 = vadd.f32 1.0, %v5148_v40  ;;  %5175 = vrcp.f32 %v2025_v15  ;;  %v2127_v40 = vrot.slane %v7496_v20, 2  ;;  %v2150_v46 = vrot.slane %v7492_v45, 3 }
 0x485   :  { %v5152_v5 = vpop.eup %5151  ;;  %v2028_v6 = vadd.f32 1.0, %v5150_v2  ;;  %5177 = vrcp.f32 %v2026_v16  ;;  %v2148_v2 = vrot.slane %v7484_v26, 3 }
 0x486   :  { %v5154_v18 = vpop.eup %5153  ;;  %v2029_v7 = vadd.f32 1.0, %v5152_v5  ;;  %5179 = vrcp.f32 %v2027_v4  ;;  %v2149_v5 = vrot.slane %v7490_v3, 3  ;;  %v4625_v3 = vmul.f32 -1.442695, %v2150_v46 }
 0x487   :  { %v5156_v8 = vpop.eup %5155  ;;  %v2030_v1 = vadd.f32 1.0, %v5154_v18  ;;  %5181 = vrcp.f32 %v2028_v6  ;;  %v4620_v6 = vmul.f32 -1.442695, %v2145_v54 }
 0x488   :  { %v5158_v49 = vpop.eup %5157  ;;  %v2031_v10 = vadd.f32 1.0, %v5156_v8  ;;  %5183 = vrcp.f32 %v2029_v7  ;;  %v4621_v7 = vmul.f32 -1.442695, %v2146_v58 }
 0x489   :  { %v5160_v61 = vpop.eup %5159  ;;  %5185 = vrcp.f32 %v2030_v1  ;;  %v2096_v11 = vadd.f32 1.0, %v5158_v49  ;;  %v4622_v1 = vmul.f32 -1.442695, %v2147_v17 }
 0x48a   :  { %v5162_v63 = vpop.eup %5161  ;;  %5187 = vrcp.f32 %v2031_v10  ;;  %v2097_v35 = vadd.f32 1.0, %v5160_v61  ;;  %v4623_v10 = vmul.f32 -1.442695, %v2148_v2  ;;  %v4624_v61 = vmul.f32 -1.442695, %v2149_v5 }
 0x48b   :  { %v5164_v55 = vpop.eup %5163  ;;  %v2098_v50 = vadd.f32 1.0, %v5162_v63  ;;  %5189 = vrcp.f32 %v2096_v11 }
 0x48c   :  { %v5166_v33 = vpop.eup %5165  ;;  %v2099_v0 = vadd.f32 1.0, %v5164_v55  ;;  %5191 = vrcp.f32 %v2097_v35  ;;  %v4626_v35 = vmul.f32 -1.442695, %v2151_v41 }
 0x48d   :  { %v5168_v44 = vpop.eup %5167  ;;  %v2100_v32 = vadd.f32 1.0, %v5166_v33  ;;  %5193 = vrcp.f32 %v2098_v50 }
 0x48e   :  { %v5170_v48 = vpop.eup %5169  ;;  %v2101_v56 = vadd.f32 1.0, %v5168_v44  ;;  %5195 = vrcp.f32 %v2099_v0 }
 0x48f   :  { %v5172_v51 = vpop.eup %5171  ;;  %v2102_v29 = vadd.f32 1.0, %v5170_v48  ;;  %5197 = vrcp.f32 %v2100_v32 }
 0x490   :  { %v5174_v42 = vpop.eup %5173  ;;  %v2103_v36 = vadd.f32 1.0, %v5172_v51  ;;  %5199 = vrcp.f32 %v2101_v56 }
 0x491   :  { %v5176_v59 = vpop.eup %5175  ;;  %5201 = vrcp.f32 %v2102_v29 }
 0x492   :  { %v5178_v52 = vpop.eup %5177  ;;  %5203 = vrcp.f32 %v2103_v36 }
 0x493   :  { %v7516_v19 = vpop.eup %5179  ;;  %5205 = vtanh.f32 %v2120_v28 }
 0x494   :  { %v7520_v27 = vpop.eup %5181  ;;  %5207 = vtanh.f32 %v2121_v34 }
 0x495   :  { %v7524_v53 = vpop.eup %5183  ;;  %5209 = vtanh.f32 %v2122_v22 }
 0x496   :  { %v7528_v15 = vpop.eup %5185  ;;  %5211 = vtanh.f32 %v2123_v57 }
 0x497   :  { %v7532_v16 = vpop.eup %5187  ;;  %5213 = vtanh.f32 %v2124_v9 }
 0x498   :  { %v5190_v4 = vpop.eup %5189  ;;  %5215 = vtanh.f32 %v2125_v30 }
 0x499   :  { %v5192_v18 = vpop.eup %5191  ;;  %5217 = vtanh.f32 %v2126_v43  ;;  %v2208_v45 = vmul.f32 %v5190_v4, %v7310_v47 }
 0x49a   :  { %v5194_v8 = vpop.eup %5193  ;;  %5219 = vtanh.f32 %v2127_v40  ;;  %v2209_v20 = vmul.f32 %v5192_v18, %v7314_v23 }
 0x49b   :  { %v5196_v49 = vpop.eup %5195  ;;  %5221 = vpow2.f32 %v4619_v12  ;;  %v2210_v44 = vmul.f32 %v5194_v8, %v7317_v14 }
 0x49c   :  { %v5198_v26 = vpop.eup %5197  ;;  %5223 = vpow2.f32 %v4620_v6  ;;  %v2211_v56 = vmul.f32 %v5196_v49, %v7321_v38 }
 0x49d   :  { %v5200_v11 = vpop.eup %5199  ;;  %5225 = vpow2.f32 %v4621_v7  ;;  %v2212_v28 = vmul.f32 %v5198_v26, %v7324_v37 }
 0x49e   :  { %v5202_v63 = vpop.eup %5201  ;;  %5227 = vpow2.f32 %v4622_v1  ;;  %v2213_v23 = vmul.f32 %v5200_v11, %v7327_v25 }
 0x49f   :  { %v5204_v55 = vpop.eup %5203  ;;  %5229 = vpow2.f32 %v4623_v10  ;;  %v2214_v58 = vmul.f32 %v5202_v63, %v7336_v31 }
 0x4a0   :  { %v5206_v50 = vpop.eup %5205  ;;  %5231 = vpow2.f32 %v4624_v61  ;;  %v2215_v2 = vmul.f32 %v5204_v55, %v7338_v21 }
 0x4a1   :  { %v5208_v33 = vpop.eup %5207  ;;  %5233 = vpow2.f32 %v4625_v3  ;;  %v2216_v0 = vmul.f32 %v5206_v50, %v5174_v42 }
 0x4a2   :  { %v5210_v32 = vpop.eup %5209  ;;  %5235 = vpow2.f32 %v4626_v35  ;;  %v2217_v48 = vmul.f32 %v5208_v33, %v5176_v59 }
 0x4a3   :  { %v5212_v51 = vpop.eup %5211  ;;  %v2218_v29 = vmul.f32 %v5210_v32, %v5178_v52  ;;  %v7543_v36 = vadd.f32 %v2216_v0, %v2208_v45 }
 0x4a4   :  { %v5214_v47 = vpop.eup %5213  ;;  %v2219_v34 = vmul.f32 %v5212_v51, %v7516_v19  ;;  %v7547_v22 = vadd.f32 %v2217_v48, %v2209_v20 }
 0x4a5   :  { %v5216_v42 = vpop.eup %5215  ;;  %v2220_v14 = vmul.f32 %v5214_v47, %v7520_v27  ;;  %v7550_v57 = vadd.f32 %v2218_v29, %v2210_v44  ;;  %5237 = vtanh.f32 %v7543_v36 }
 0x4a6   :  { %v5218_v38 = vpop.eup %5217  ;;  %v2221_v59 = vmul.f32 %v5216_v42, %v7524_v53  ;;  %v7554_v37 = vadd.f32 %v2219_v34, %v2211_v56  ;;  %5239 = vtanh.f32 %v7547_v22 }
 0x4a7   :  { %v5220_v52 = vpop.eup %5219  ;;  %v7557_v19 = vadd.f32 %v2220_v14, %v2212_v28  ;;  %5241 = vtanh.f32 %v7550_v57  ;;  %v2222_v5 = vmul.f32 %v5218_v38, %v7528_v15 }
 0x4a8   :  { %v5222_v25 = vpop.eup %5221  ;;  %v7560_v9 = vadd.f32 %v2221_v59, %v2213_v23  ;;  %5243 = vtanh.f32 %v7554_v37  ;;  %v2223_v46 = vmul.f32 %v5220_v52, %v7532_v16 }
 0x4a9   :  { %v5224_v13 = vpop.eup %5223  ;;  %v2184_v27 = vadd.f32 1.0, %v5222_v25  ;;  %5245 = vtanh.f32 %v7557_v19  ;;  %v7569_v41 = vadd.f32 %v2222_v5, %v2214_v58  ;;  %v7620_v58 = vld [vmem:[%s8846_s1 + $0x1c8] sm:$0xff]  ;;  %v7656_v5 = vld [vmem:[%s8846_s1 + $0x1a0] sm:$0xff] }
 0x4aa   :  { %v5226_v30 = vpop.eup %5225  ;;  %v2185_v54 = vadd.f32 1.0, %v5224_v13  ;;  %5247 = vtanh.f32 %v7560_v9  ;;  %v7571_v1 = vadd.f32 %v2223_v46, %v2215_v2  ;;  %v7638_v2 = vld [vmem:[%s8846_s1 + $0x1d0] sm:$0xff]  ;;  %v7674_v46 = vld [vmem:[%s8846_s1 + $0x198] sm:$0xff] }
 0x4ab   :  { %v5228_v53 = vpop.eup %5227  ;;  %v2186_v43 = vadd.f32 1.0, %v5226_v30  ;;  %5249 = vrcp.f32 %v2184_v27 }
 0x4ac   :  { %v5230_v40 = vpop.eup %5229  ;;  %v2187_v17 = vadd.f32 1.0, %v5228_v53  ;;  %5251 = vrcp.f32 %v2185_v54  ;;  %v7608_v53 = vld [vmem:[%s8846_s1 + $0x1e0] sm:$0xff] }
 0x4ad   :  { %v5232_v12 = vpop.eup %5231  ;;  %v2188_v4 = vadd.f32 1.0, %v5230_v40  ;;  %5253 = vrcp.f32 %v2186_v43  ;;  %v7614_v43 = vld [vmem:[%s8846_s1 + $0x1f0] sm:$0xff]  ;;  %v7626_v40 = vld [vmem:[%s8846_s1 + $0x1d8] sm:$0xff] }
 0x4ae   :  { %v5234_v6 = vpop.eup %5233  ;;  %v2189_v18 = vadd.f32 1.0, %v5232_v12  ;;  %5255 = vrcp.f32 %v2187_v17  ;;  %v7632_v17 = vld [vmem:[%s8846_s1 + $0x1c0] sm:$0xff]  ;;  %v7644_v12 = vld [vmem:[%s8846_s1 + $0x1a8] sm:$0xff] }
 0x4af   :  { %v5236_v7 = vpop.eup %5235  ;;  %v2190_v8 = vadd.f32 1.0, %v5234_v6  ;;  %5257 = vrcp.f32 %v2188_v4  ;;  %v7650_v4 = vld [vmem:[%s8846_s1 + $0x1b8] sm:$0xff]  ;;  %v7662_v6 = vld [vmem:[%s8846_s1 + $0x1b0] sm:$0xff] }
 0x4b0   :  { %v2191_v31 = vadd.f32 1.0, %v5236_v7  ;;  %5259 = vrcp.f32 %v2189_v18  ;;  %v7668_v18 = vld [vmem:[%s8846_s1 + $0x188] sm:$0xff]  ;;  %v7680_v7 = vld [vmem:[%s8846_s1 + $0x180] sm:$0xff] }
 0x4b1   :  { %5261 = vrcp.f32 %v2190_v8  ;;  %v7686_v8 = vld [vmem:[%s8846_s1 + $0x190] sm:$0xff] }
 0x4b2   :  { %v5238_v21 = vpop.eup %5237  ;;  %5263 = vrcp.f32 %v2191_v31  ;;  %v7692_v31 = vld [vmem:[%s8846_s1 + $0x168] sm:$0xff] }
 0x4b3   :  { %v5240_v49 = vpop.eup %5239  ;;  %5265 = vtanh.f32 %v7569_v41 }
 0x4b4   :  { %v5242_v15 = vpop.eup %5241  ;;  %5267 = vtanh.f32 %v7571_v1 }
 0x4b5   :  { %v5244_v10 = vpop.eup %5243 }
 0x4b6   :  { %v5246_v16 = vpop.eup %5245 }
 0x4b7   :  { %v5248_v26 = vpop.eup %5247 }
 0x4b8   :  { %v5250_v61 = vpop.eup %5249 }
 0x4b9   :  { %v5252_v11 = vpop.eup %5251  ;;  %v2240_v3 = vmul.f32 %v5250_v61, %v5238_v21  ;;  %v7698_v21 = vld [vmem:[%s8846_s1 + $0x178] sm:$0xff]  ;;  %v7734_v61 = vld [vmem:[%s8846_s1 + $0x150] sm:$0xff] }
 0x4ba   :  { %v5254_v63 = vpop.eup %5253  ;;  %v2241_v35 = vmul.f32 %v5252_v11, %v5240_v49  ;;  %v7704_v49 = vld [vmem:[%s8846_s1 + $0x160] sm:$0xff]  ;;  %v7740_v11 = vld [vmem:[%s8846_s1 + $0x128] sm:$0xff] }
 0x4bb   :  { %v5256_v55 = vpop.eup %5255  ;;  %v2242_v45 = vmul.f32 %v5254_v63, %v5242_v15  ;;  %2248 = vst [vmem:[%s8848_s2 + $0x3] sm:$0x1] %v2240_v3  ;;  %v7710_v15 = vld [vmem:[%s8846_s1 + $0x170] sm:$0xff]  ;;  %9115 = vst [vmem:[#allocation2_spill] sm:$0xff] %v7740_v11  ;;  %v7752_v63 = vld [vmem:[%s8846_s1 + $0x120] sm:$0xff] }
 0x4bc   :  { %v5258_v50 = vpop.eup %5257  ;;  %v2243_v20 = vmul.f32 %v5256_v55, %v5244_v10  ;;  %2249 = vst [vmem:[%s8848_s2 + $0xb] sm:$0x1] %v2241_v35  ;;  %v2280_v48 = vcombine.low %v2240_v3, %v2241_v35  ;;  %v7716_v10 = vld [vmem:[%s8846_s1 + $0x148] sm:$0xff]  ;;  %v7746_v3 = vld [vmem:[%s8846_s1 + $0x138] sm:$0xff]  ;;  %9117 = vst [vmem:[#allocation4_spill] sm:$0xff] %v7752_v63 }
 0x4bd   :  { %v5260_v33 = vpop.eup %5259  ;;  %v2244_v0 = vmul.f32 %v5258_v50, %v5246_v16  ;;  %2250 = vst [vmem:[%s8848_s2 + $0x13] sm:$0x1] %v2242_v45  ;;  %v7722_v16 = vld [vmem:[%s8846_s1 + $0x158] sm:$0xff]  ;;  %9116 = vst [vmem:[#allocation3_spill] sm:$0xff] %v7746_v3  ;;  %v7758_v35 = vld [vmem:[%s8846_s1 + $0x130] sm:$0xff] }
 0x4be   :  { %v5262_v44 = vpop.eup %5261  ;;  %v2245_v32 = vmul.f32 %v5260_v33, %v5248_v26  ;;  %2251 = vst [vmem:[%s8848_s2 + $0x1b] sm:$0x1] %v2243_v20  ;;  %v2281_v56 = vcombine.low %v2242_v45, %v2243_v20  ;;  %v2290_v14 = vrot.slane %v2280_v48, %v6446_v62  ;;  %v7728_v26 = vld [vmem:[%s8846_s1 + $0x140] sm:$0xff]  ;;  %9118 = vst [vmem:[#allocation5_spill] sm:$0xff] %v7758_v35  ;;  %v7764_v55 = vld [vmem:[%s8846_s1 + $0x108] sm:$0xff] }
 0x4bf   :  { %v5264_v51 = vpop.eup %5263  ;;  %2252 = vst [vmem:[%s8848_s2 + $0x23] sm:$0x1] %v2244_v0  ;;  %9119 = vst [vmem:[#allocation6_spill] sm:$0xff] %v7764_v55  ;;  %v7770_v45 = vld [vmem:[%s8846_s1 + $0x118] sm:$0xff]  ;;  %v7776_v50 = vld [vmem:[%s8846_s1 + $0x100] sm:$0xff] }
 0x4c0   :  { %v5266_v29 = vpop.eup %5265  ;;  %2253 = vst [vmem:[%s8848_s2 + $0x2b] sm:$0x1] %v2245_v32  ;;  %v2297_v28 = vrot.slane %v2281_v56, %v6446_v62  ;;  %v2282_v42 = vcombine.low %v2244_v0, %v2245_v32  ;;  %9120 = vst [vmem:[#allocation7_spill] sm:$0xff] %v7770_v45  ;;  %v7782_v20 = vld [vmem:[%s8846_s1 + $0x110] sm:$0xff]  ;;  %v7788_v33 = vld [vmem:[%s8846_s1 + $0xe8] sm:$0xff] }
 0x4c1   :  { %v5268_v47 = vpop.eup %5267  ;;  %v2246_v34 = vmul.f32 %v5266_v29, %v5262_v44  ;;  %9121 = vst [vmem:[#allocation8_spill] sm:$0xff] %v7776_v50  ;;  %9122 = vst [vmem:[#allocation9_spill] sm:$0xff] %v7782_v20  ;;  %v7794_v0 = vld [vmem:[%s8846_s1 + $0xf8] sm:$0xff]  ;;  %v7800_v44 = vld [vmem:[%s8846_s1 + $0xe0] sm:$0xff] }
 0x4c2   :  { %v2247_v23 = vmul.f32 %v5268_v47, %v5264_v51  ;;  %v2312_v59 = vcombine.low %v2290_v14, %v2297_v28  ;;  %v2304_v52 = vrot.slane %v2282_v42, %v6446_v62  ;;  %9123 = vst [vmem:[#allocation10_spill] sm:$0xff] %v7788_v33  ;;  %9124 = vst [vmem:[#allocation11_spill] sm:$0xff] %v7794_v0  ;;  %v7806_v32 = vld [vmem:[%s8846_s1 + $0xf0] sm:$0xff]  ;;  %v7812_v48 = vld [vmem:[%s8846_s1 + $0xc8] sm:$0xff] }
 0x4c3   :  { %2254 = vst [vmem:[%s8848_s2 + $0x33] sm:$0x1] %v2246_v34  ;;  %9125 = vst [vmem:[#allocation12_spill] sm:$0xff] %v7800_v44  ;;  %v7818_v56 = vld [vmem:[%s8846_s1 + $0xd8] sm:$0xff]  ;;  %v7824_v51 = vld [vmem:[%s8846_s1 + $0xc0] sm:$0xff] }
 0x4c4   :  { %2255 = vst [vmem:[%s8848_s2 + $0x3b] sm:$0x1] %v2247_v23  ;;  %v2283_v38 = vcombine.low %v2246_v34, %v2247_v23  ;;  %v2320_v27 = vrot.slane %v2312_v59, %v6446_v62  ;;  %9126 = vst [vmem:[#allocation13_spill] sm:$0xff] %v7806_v32  ;;  %v7830_v29 = vld [vmem:[%s8846_s1 + $0xd0] sm:$0xff]  ;;  %v7836_v28 = vld [vmem:[%s8846_s1 + $0xa8] sm:$0xff] }
 0x4c5   :  { %9127 = vst [vmem:[#allocation14_spill] sm:$0xff] %v7812_v48  ;;  %9128 = vst [vmem:[#allocation15_spill] sm:$0xff] %v7818_v56  ;;  %v7842_v47 = vld [vmem:[%s8846_s1 + $0xb8] sm:$0xff]  ;;  %v7848_v34 = vld [vmem:[%s8846_s1 + $0xa0] sm:$0xff] }
 0x4c6   :  { %v2311_v25 = vrot.slane %v2283_v38, %v6446_v62  ;;  %9129 = vst [vmem:[#allocation16_spill] sm:$0xff] %v7824_v51  ;;  %9130 = vst [vmem:[#allocation17_spill] sm:$0xff] %v7830_v29  ;;  %v7854_v23 = vld [vmem:[%s8846_s1 + $0xb0] sm:$0xff]  ;;  %v7860_v42 = vld [vmem:[%s8846_s1 + $0x88] sm:$0xff] }
 0x4c7   :  { %9131 = vst [vmem:[#allocation18_spill] sm:$0xff] %v7836_v28  ;;  %9132 = vst [vmem:[#allocation19_spill] sm:$0xff] %v7842_v47  ;;  %v7866_v14 = vld [vmem:[%s8846_s1 + $0x98] sm:$0xff]  ;;  %v7872_v38 = vld [vmem:[%s8846_s1 + $0x80] sm:$0xff] }
 0x4c8   :  { %v2313_v13 = vcombine.low %v2304_v52, %v2311_v25  ;;  %9133 = vst [vmem:[#allocation20_spill] sm:$0xff] %v7848_v34  ;;  %9134 = vst [vmem:[#allocation21_spill] sm:$0xff] %v7854_v23  ;;  %v7878_v59 = vld [vmem:[%s8846_s1 + $0x90] sm:$0xff]  ;;  %v7884_v52 = vld [vmem:[%s8846_s1 + $0x68] sm:$0xff] }
 0x4c9   :  { %9135 = vst [vmem:[#allocation22_spill] sm:$0xff] %v7860_v42  ;;  %9136 = vst [vmem:[#allocation23_spill] sm:$0xff] %v7866_v14  ;;  %v7890_v25 = vld [vmem:[%s8846_s1 + $0x78] sm:$0xff] }
 0x4ca   :  { %v2327_v30 = vrot.slane %v2313_v13, %v6446_v62  ;;  %9137 = vst [vmem:[#allocation24_spill] sm:$0xff] %v7872_v38  ;;  %9138 = vst [vmem:[#allocation25_spill] sm:$0xff] %v7878_v59  ;;  %v7896_v13 = vld [vmem:[%s8846_s1 + $0x60] sm:$0xff] }
 0x4cb   :  { %9139 = vst [vmem:[#allocation26_spill] sm:$0xff] %v7884_v52  ;;  %9140 = vst [vmem:[#allocation27_spill] sm:$0xff] %v7890_v25 }
 0x4cc   :  { %v2328_v54 = vcombine.low %v2320_v27, %v2327_v30  ;;  %9141 = vst [vmem:[#allocation28_spill] sm:$0xff] %v7896_v13  ;;  %v7902_v27 = vld [vmem:[%s8846_s1 + $0x70] sm:$0xff]  ;;  %v7908_v30 = vld [vmem:[%s8846_s1 + $0x48] sm:$0xff] }
 0x4cd   :  { %9142 = vst [vmem:[#allocation29_spill] sm:$0xff] %v7902_v27  ;;  %9143 = vst [vmem:[#allocation30_spill] sm:$0xff] %v7908_v30 }
 0x4ce   :  { %2395 = vmatmul.mubr.f32.vlgmr.msra.gmra.mxu0 %v2328_v54  ;;  %2466 = vmatmul.mubr.f32.vlgmr.msra.gmra.mxu1 %v2328_v54  ;;  %v7914_v54 = vld [vmem:[%s8846_s1 + $0x58] sm:$0xff] }
 0x4cf   :  { %2891 = vmatpush1.msra.mxu0 %v7608_v53  ;;  %2962 = vmatpush1.msra.mxu1 %v7614_v43  ;;  %9144 = vst [vmem:[#allocation31_spill] sm:$0xff] %v7914_v54 }
 0x4d0   :  { %2892 = vmatprep.subr.mxu0 %v7620_v58  ;;  %2963 = vmatprep.subr.mxu1 %v7626_v40 }
 0x4d1   :  { %2893 = vmatpush1.msra.mxu0 %v7632_v17  ;;  %2964 = vmatpush1.msra.mxu1 %v7638_v2 }
 0x4d2   :  { %2894 = vmatprep.subr.mxu0 %v7644_v12  ;;  %2965 = vmatprep.subr.mxu1 %v7650_v4 }
 0x4d3   :  { %2895 = vmatpush1.msra.mxu0 %v7656_v5  ;;  %2966 = vmatpush1.msra.mxu1 %v7662_v6 }
 0x4d4   :  { %2896 = vmatprep.subr.mxu0 %v7668_v18  ;;  %2967 = vmatprep.subr.mxu1 %v7674_v46 }
 0x4d5   :  { %2897 = vmatpush1.msra.mxu0 %v7680_v7  ;;  %2968 = vmatpush1.msra.mxu1 %v7686_v8 }
 0x4d6   :  { %2898 = vmatprep.subr.mxu0 %v7692_v31  ;;  %2969 = vmatprep.subr.mxu1 %v7698_v21 }
 0x4d7   :  { %2899 = vmatpush1.msra.mxu0 %v7704_v49  ;;  %2970 = vmatpush1.msra.mxu1 %v7710_v15 }
 0x4d8   :  { %2900 = vmatprep.subr.mxu0 %v7716_v10  ;;  %2971 = vmatprep.subr.mxu1 %v7722_v16 }
 0x4d9   :  { %2901 = vmatpush1.msra.mxu0 %v7728_v26  ;;  %2972 = vmatpush1.msra.mxu1 %v7734_v61 }
 0x4da   :  { %2902 = vmatprep.subr.mxu0 %v7740_v11  ;;  %2973 = vmatprep.subr.mxu1 %v7746_v3 }
 0x4db   :  { %2903 = vmatpush1.msra.mxu0 %v7752_v63  ;;  %2974 = vmatpush1.msra.mxu1 %v7758_v35 }
 0x4dc   :  { %2904 = vmatprep.subr.mxu0 %v7764_v55  ;;  %2975 = vmatprep.subr.mxu1 %v7770_v45 }
 0x4dd   :  { %2905 = vmatpush1.msra.mxu0 %v7776_v50  ;;  %2976 = vmatpush1.msra.mxu1 %v7782_v20 }
 0x4de   :  { %2906 = vmatprep.subr.mxu0 %v7788_v33  ;;  %2977 = vmatprep.subr.mxu1 %v7794_v0 }
 0x4df   :  { %2907 = vmatpush1.msra.mxu0 %v7800_v44  ;;  %2978 = vmatpush1.msra.mxu1 %v7806_v32 }
 0x4e0   :  { %2908 = vmatprep.subr.mxu0 %v7812_v48  ;;  %2979 = vmatprep.subr.mxu1 %v7818_v56 }
 0x4e1   :  { %2909 = vmatpush1.msra.mxu0 %v7824_v51  ;;  %2980 = vmatpush1.msra.mxu1 %v7830_v29 }
 0x4e2   :  { %2910 = vmatprep.subr.mxu0 %v7836_v28  ;;  %2981 = vmatprep.subr.mxu1 %v7842_v47  ;;  %v4627_v28 = vld [vmem:[%s8847_s0 + $0x4] ss:$8 sm:$0xf] }
 0x4e3   :  { %2911 = vmatpush1.msra.mxu0 %v7848_v34  ;;  %2982 = vmatpush1.msra.mxu1 %v7854_v23 }
 0x4e4   :  { %2912 = vmatprep.subr.mxu0 %v7860_v42  ;;  %2983 = vmatprep.subr.mxu1 %v7866_v14 }
 0x4e5   :  { %2913 = vmatpush1.msra.mxu0 %v7872_v38  ;;  %2984 = vmatpush1.msra.mxu1 %v7878_v59 }
 0x4e6   :  { %2914 = vmatprep.subr.mxu0 %v7884_v52  ;;  %2985 = vmatprep.subr.mxu1 %v7890_v25 }
 0x4e7   :  { %2915 = vmatpush1.msra.mxu0 %v7896_v13  ;;  %2986 = vmatpush1.msra.mxu1 %v7902_v27  ;;  %v7920_v13 = vld [vmem:[%s8846_s1 + $0x40] sm:$0xff]  ;;  %v7926_v27 = vld [vmem:[%s8846_s1 + $0x50] sm:$0xff] }
 0x4e8   :  { %2916 = vmatprep.subr.mxu0 %v7908_v30  ;;  %2987 = vmatprep.subr.mxu1 %v7914_v54  ;;  %9145 = vst [vmem:[#allocation32_spill] sm:$0xff] %v7920_v13  ;;  %9146 = vst [vmem:[#allocation33_spill] sm:$0xff] %v7926_v27  ;;  %v7932_v30 = vld [vmem:[%s8846_s1 + $0x28] sm:$0xff]  ;;  %v7938_v54 = vld [vmem:[%s8846_s1 + $0x38] sm:$0xff] }
 0x4e9   :  { %2917 = vmatpush1.msra.mxu0 %v7920_v13  ;;  %2988 = vmatpush1.msra.mxu1 %v7926_v27  ;;  %9147 = vst [vmem:[#allocation34_spill] sm:$0xff] %v7932_v30  ;;  %9148 = vst [vmem:[#allocation35_spill] sm:$0xff] %v7938_v54  ;;  %v7944_v13 = vld [vmem:[%s8846_s1 + $0x20] sm:$0xff]  ;;  %v7950_v27 = vld [vmem:[%s8846_s1 + $0x30] sm:$0xff] }
 0x4ea   :  { %2918 = vmatprep.subr.mxu0 %v7932_v30  ;;  %2989 = vmatprep.subr.mxu1 %v7938_v54  ;;  %9149 = vst [vmem:[#allocation36_spill] sm:$0xff] %v7944_v13  ;;  %9150 = vst [vmem:[#allocation37_spill] sm:$0xff] %v7950_v27  ;;  %v7956_v30 = vld [vmem:[%s8846_s1 + $0x8] sm:$0xff]  ;;  %v7962_v54 = vld [vmem:[%s8846_s1 + $0x18] sm:$0xff] }
 0x4eb   :  { %2919 = vmatpush1.msra.mxu0 %v7944_v13  ;;  %2990 = vmatpush1.msra.mxu1 %v7950_v27  ;;  %9151 = vst [vmem:[#allocation38_spill] sm:$0xff] %v7956_v30  ;;  %9152 = vst [vmem:[#allocation39_spill] sm:$0xff] %v7962_v54  ;;  %v7968_v13 = vld [vmem:[%s8846_s1] sm:$0xff] }
 0x4ec   :  { %2920 = vmatprep.subr.mxu0 %v7956_v30  ;;  %2991 = vmatprep.subr.mxu1 %v7962_v54  ;;  %9153 = vst [vmem:[#allocation40_spill] sm:$0xff] %v7968_v13  ;;  %v7975_v30 = vld [vmem:[%s8846_s1 + $0x10] sm:$0xff] }
 0x4ed   :  { %2921 = vmatpush1.msra.mxu0 %v7968_v13  ;;  %2954 = vmatprep.mubr.f32.mxu0 %v9113_v60  ;;  %9154 = vst [vmem:[#allocation41_spill] sm:$0xff] %v7975_v30 }
 0x4ee   :  { %2992 = vmatpush1.msra.mxu1 %v7975_v30  ;;  %3025 = vmatprep.mubr.f32.mxu1 %v9113_v60 }
 0x4ef   :  { %3450 = vmatprep.subr.mxu0 %v7439_v39  ;;  %3521 = vmatprep.subr.mxu1 %v7445_v24 }
 0x58e   :  { %v2396_v54 = vpop.f32.mrf.mxu0  ;;  %v2467_v27 = vpop.f32.mrf.mxu1 }
 0x590   :  { %v2398_v25 = vpop.f32.mrf.mxu0  ;;  %v2469_v52 = vpop.f32.mrf.mxu1 }
 0x591   :  { %v2476_v13 = vcombine.low %v2396_v54, %v2398_v25  ;;  %v2477_v59 = vcombine.high %v2396_v54, %v2398_v25  ;;  %v2478_v38 = vcombine.low %v2467_v27, %v2469_v52  ;;  %v2479_v14 = vcombine.high %v2467_v27, %v2469_v52  ;;  %v4628_v52 = vld [vmem:[%s8847_s0 + $0x24] ss:$8 sm:$0xf] }
 0x592   :  { %v4630_v25 = vld [vmem:[%s8847_s0 + $0x64] ss:$8 sm:$0xf] }
 0x593   :  { %v2486_v42 = vrot.slane %v2476_v13, %v6446_v62  ;;  %v2493_v23 = vrot.slane %v2477_v59, %v6446_v62  ;;  %v2500_v30 = vrot.slane %v2478_v38, %v6446_v62  ;;  %v2507_v60 = vrot.slane %v2479_v14, %v6446_v62  ;;  %v4629_v59 = vld [vmem:[%s8847_s0 + $0x44] ss:$8 sm:$0xf] }
 0x594   :  { %v4631_v14 = vld [vmem:[%s8847_s0 + $0x84] ss:$8 sm:$0xf] }
 0x595   :  { %v2508_v34 = vcombine.low %v2486_v42, %v2500_v30  ;;  %v2509_v39 = vcombine.high %v2486_v42, %v2500_v30  ;;  %v2510_v47 = vcombine.low %v2493_v23, %v2507_v60  ;;  %v2511_v24 = vcombine.high %v2493_v23, %v2507_v60  ;;  %v4632_v13 = vld [vmem:[%s8847_s0 + $0xa4] ss:$8 sm:$0xf] }
 0x596   :  { %v4633_v27 = vld [vmem:[%s8847_s0 + $0xc4] ss:$8 sm:$0xf] }
 0x597   :  { %v2518_v42 = vrot.slane %v2508_v34, %v6446_v62  ;;  %v2525_v60 = vrot.slane %v2510_v47, %v6446_v62  ;;  %v2532_v23 = vrot.slane %v2509_v39, %v6446_v62  ;;  %v2539_v38 = vrot.slane %v2511_v24, %v6446_v62  ;;  %v4634_v39 = vld [vmem:[%s8847_s0 + $0xe4] ss:$8 sm:$0xf] }
 0x599   :  { %v2540_v30 = vcombine.high %v2518_v42, %v2518_v42  ;;  %v2541_v34 = vcombine.high %v2525_v60, %v2525_v60  ;;  %v2542_v54 = vcombine.high %v2532_v23, %v2532_v23  ;;  %v2543_v47 = vcombine.high %v2539_v38, %v2539_v38 }
 0x59a   :  { %v8013_v24 = vadd.f32 %v4627_v28, %v2518_v42  ;;  %v8015_v29 = vadd.f32 %v4628_v52, %v2532_v23  ;;  %v8017_v51 = vadd.f32 %v4631_v14, %v2525_v60  ;;  %v8023_v32 = vadd.f32 %v4632_v13, %v2539_v38 }
 0x59b   :  { %v8019_v56 = vadd.f32 %v4629_v59, %v2540_v30  ;;  %v8021_v48 = vadd.f32 %v4630_v25, %v2542_v54  ;;  %v8025_v44 = vadd.f32 %v4633_v27, %v2541_v34  ;;  %v8029_v20 = vadd.f32 %v4634_v39, %v2543_v47 }
 0x59c   :  { %v4635_v0 = vmul.f32 -1.442695, %v8013_v24  ;;  %v4636_v33 = vmul.f32 -1.442695, %v8015_v29  ;;  %v4639_v59 = vmul.f32 -1.442695, %v8017_v51 }
 0x59d   :  { %v4637_v28 = vmul.f32 -1.442695, %v8019_v56  ;;  %v4638_v52 = vmul.f32 -1.442695, %v8021_v48  ;;  %v2616_v14 = vrot.slane %v8013_v24, 1  ;;  %v2617_v60 = vrot.slane %v8015_v29, 1 }
 0x59e   :  { %5269 = vpow2.f32 %v4635_v0  ;;  %v4640_v42 = vmul.f32 -1.442695, %v8023_v32  ;;  %v4641_v23 = vmul.f32 -1.442695, %v8025_v44  ;;  %v2618_v38 = vrot.slane %v8019_v56, 1 }
 0x59f   :  { %5271 = vpow2.f32 %v4636_v33  ;;  %v4642_v25 = vmul.f32 -1.442695, %v8029_v20  ;;  %v2619_v13 = vrot.slane %v8021_v48, 1  ;;  %v2620_v0 = vrot.slane %v8017_v51, 1 }
 0x5a0   :  { %5273 = vpow2.f32 %v4637_v28  ;;  %v4643_v27 = vmul.f32 -1.442695, %v2616_v14  ;;  %v2621_v33 = vrot.slane %v8023_v32, 1  ;;  %v4644_v30 = vmul.f32 -1.442695, %v2617_v60 }
 0x5a1   :  { %5275 = vpow2.f32 %v4638_v52  ;;  %v2622_v34 = vrot.slane %v8025_v44, 1  ;;  %v4645_v54 = vmul.f32 -1.442695, %v2618_v38  ;;  %v2623_v47 = vrot.slane %v8029_v20, 1 }
 0x5a2   :  { %5277 = vpow2.f32 %v4639_v59  ;;  %v4646_v39 = vmul.f32 -1.442695, %v2619_v13  ;;  %v4647_v28 = vmul.f32 -1.442695, %v2620_v0  ;;  %v4648_v52 = vmul.f32 -1.442695, %v2621_v33 }
 0x5a3   :  { %5279 = vpow2.f32 %v4640_v42  ;;  %v4649_v59 = vmul.f32 -1.442695, %v2622_v34  ;;  %v4650_v14 = vmul.f32 -1.442695, %v2623_v47 }
 0x5a4   :  { %5281 = vpow2.f32 %v4641_v23 }
 0x5a5   :  { %5283 = vpow2.f32 %v4642_v25 }
 0x5a6   :  { %5285 = vpow2.f32 %v4643_v27 }
 0x5a7   :  { %5287 = vpow2.f32 %v4644_v30 }
 0x5a8   :  { %5289 = vpow2.f32 %v4645_v54 }
 0x5a9   :  { %5291 = vpow2.f32 %v4646_v39 }
 0x5aa   :  { %5293 = vpow2.f32 %v4647_v28 }
 0x5ab   :  { %v5270_v42 = vpop.eup %5269  ;;  %5295 = vpow2.f32 %v4648_v52 }
 0x5ac   :  { %v5272_v60 = vpop.eup %5271  ;;  %v2584_v23 = vadd.f32 1.0, %v5270_v42  ;;  %5297 = vpow2.f32 %v4649_v59 }
 0x5ad   :  { %v5274_v50 = vpop.eup %5273  ;;  %v2585_v38 = vadd.f32 1.0, %v5272_v60  ;;  %5299 = vpow2.f32 %v4650_v14 }
 0x5ae   :  { %v5276_v25 = vpop.eup %5275  ;;  %v2586_v45 = vadd.f32 1.0, %v5274_v50  ;;  %5301 = vrcp.f32 %v2584_v23 }
 0x5af   :  { %v5278_v13 = vpop.eup %5277  ;;  %v2587_v0 = vadd.f32 1.0, %v5276_v25  ;;  %5303 = vrcp.f32 %v2585_v38 }
 0x5b0   :  { %v5280_v27 = vpop.eup %5279  ;;  %v2588_v33 = vadd.f32 1.0, %v5278_v13  ;;  %5305 = vrcp.f32 %v2586_v45 }
 0x5b1   :  { %v5282_v30 = vpop.eup %5281  ;;  %v2589_v34 = vadd.f32 1.0, %v5280_v27  ;;  %5307 = vrcp.f32 %v2587_v0 }
 0x5b2   :  { %v5284_v54 = vpop.eup %5283  ;;  %v2590_v47 = vadd.f32 1.0, %v5282_v30  ;;  %5309 = vrcp.f32 %v2588_v33  ;;  %v2680_v30 = vrot.slane %v8013_v24, 2 }
 0x5b3   :  { %v5286_v39 = vpop.eup %5285  ;;  %v2591_v28 = vadd.f32 1.0, %v5284_v54  ;;  %5311 = vrcp.f32 %v2589_v34 }
 0x5b4   :  { %v5288_v52 = vpop.eup %5287  ;;  %5313 = vrcp.f32 %v2590_v47  ;;  %v2656_v59 = vadd.f32 1.0, %v5286_v39  ;;  %v2681_v47 = vrot.slane %v8015_v29, 2 }
 0x5b5   :  { %v5290_v50 = vpop.eup %5289  ;;  %5315 = vrcp.f32 %v2591_v28  ;;  %v2657_v14 = vadd.f32 1.0, %v5288_v52  ;;  %v2682_v28 = vrot.slane %v8019_v56, 2 }
 0x5b6   :  { %v5292_v42 = vpop.eup %5291  ;;  %v2658_v60 = vadd.f32 1.0, %v5290_v50  ;;  %5317 = vrcp.f32 %v2656_v59  ;;  %v2683_v59 = vrot.slane %v8021_v48, 2 }
 0x5b7   :  { %v5294_v23 = vpop.eup %5293  ;;  %v2659_v45 = vadd.f32 1.0, %v5292_v42  ;;  %5319 = vrcp.f32 %v2657_v14  ;;  %v2684_v14 = vrot.slane %v8017_v51, 2  ;;  %v2704_v42 = vrot.slane %v8013_v24, 3 }
 0x5b8   :  { %v5296_v38 = vpop.eup %5295  ;;  %v2660_v25 = vadd.f32 1.0, %v5294_v23  ;;  %5321 = vrcp.f32 %v2658_v60  ;;  %v2685_v23 = vrot.slane %v8023_v32, 2  ;;  %v2707_v24 = vrot.slane %v8021_v48, 3 }
 0x5b9   :  { %v5298_v13 = vpop.eup %5297  ;;  %v2661_v0 = vadd.f32 1.0, %v5296_v38  ;;  %5323 = vrcp.f32 %v2659_v45  ;;  %v2705_v45 = vrot.slane %v8015_v29, 3  ;;  %v4651_v29 = vmul.f32 -1.442695, %v2704_v42 }
 0x5ba   :  { %v5300_v27 = vpop.eup %5299  ;;  %v2662_v33 = vadd.f32 1.0, %v5298_v13  ;;  %5325 = vrcp.f32 %v2660_v25  ;;  %v2686_v25 = vrot.slane %v8025_v44, 2  ;;  %v2706_v13 = vrot.slane %v8019_v56, 3 }
 0x5bb   :  { %v5302_v34 = vpop.eup %5301  ;;  %v2663_v54 = vadd.f32 1.0, %v5300_v27  ;;  %5327 = vrcp.f32 %v2661_v0  ;;  %v2687_v27 = vrot.slane %v8029_v20, 2  ;;  %v2710_v56 = vrot.slane %v8025_v44, 3 }
 0x5bc   :  { %v5304_v39 = vpop.eup %5303  ;;  %5329 = vrcp.f32 %v2662_v33  ;;  %v4653_v35 = vmul.f32 -1.442695, %v2706_v13  ;;  %v2711_v48 = vrot.slane %v8029_v20, 3 }
 0x5bd   :  { %v5306_v52 = vpop.eup %5305  ;;  %5331 = vrcp.f32 %v2663_v54 }
 0x5be   :  { %v8049_v50 = vpop.eup %5307  ;;  %5333 = vtanh.f32 %v2680_v30  ;;  %v2708_v30 = vrot.slane %v8017_v51, 3 }
 0x5bf   :  { %v8053_v60 = vpop.eup %5309  ;;  %5335 = vtanh.f32 %v2681_v47  ;;  %v2709_v47 = vrot.slane %v8023_v32, 3  ;;  %v4657_v32 = vmul.f32 -1.442695, %v2710_v56 }
 0x5c0   :  { %v8057_v38 = vpop.eup %5311  ;;  %5337 = vtanh.f32 %v2682_v28  ;;  %v4652_v28 = vmul.f32 -1.442695, %v2705_v45 }
 0x5c1   :  { %v8061_v0 = vpop.eup %5313  ;;  %5339 = vtanh.f32 %v2683_v59  ;;  %v4654_v59 = vmul.f32 -1.442695, %v2707_v24  ;;  %v4656_v42 = vmul.f32 -1.442695, %v2709_v47 }
 0x5c2   :  { %v8065_v33 = vpop.eup %5315  ;;  %5341 = vtanh.f32 %v2684_v14  ;;  %v4655_v14 = vmul.f32 -1.442695, %v2708_v30 }
 0x5c3   :  { %v5318_v54 = vpop.eup %5317  ;;  %5343 = vtanh.f32 %v2685_v23 }
 0x5c4   :  { %v5320_v55 = vpop.eup %5319  ;;  %5345 = vtanh.f32 %v2686_v25  ;;  %v4658_v25 = vmul.f32 -1.442695, %v2711_v48  ;;  %v2768_v44 = vmul.f32 %v5318_v54, %v7543_v36 }
 0x5c5   :  { %v5322_v63 = vpop.eup %5321  ;;  %5347 = vtanh.f32 %v2687_v27  ;;  %v2769_v20 = vmul.f32 %v5320_v55, %v7547_v22 }
 0x5c6   :  { %v5324_v3 = vpop.eup %5323  ;;  %5349 = vpow2.f32 %v4651_v29  ;;  %v2770_v30 = vmul.f32 %v5322_v63, %v7550_v57 }
 0x5c7   :  { %v5326_v51 = vpop.eup %5325  ;;  %5351 = vpow2.f32 %v4652_v28  ;;  %v2771_v47 = vmul.f32 %v5324_v3, %v7554_v37 }
 0x5c8   :  { %v5328_v23 = vpop.eup %5327  ;;  %5353 = vpow2.f32 %v4653_v35  ;;  %v2772_v48 = vmul.f32 %v5326_v51, %v7557_v19 }
 0x5c9   :  { %v5330_v45 = vpop.eup %5329  ;;  %5355 = vpow2.f32 %v4654_v59  ;;  %v2773_v22 = vmul.f32 %v5328_v23, %v7560_v9 }
 0x5ca   :  { %v5332_v11 = vpop.eup %5331  ;;  %5357 = vpow2.f32 %v4655_v14 }
 0x5cb   :  { %v5334_v13 = vpop.eup %5333  ;;  %5359 = vpow2.f32 %v4656_v42 }
 0x5cc   :  { %v5336_v27 = vpop.eup %5335  ;;  %5361 = vpow2.f32 %v4657_v32  ;;  %v2776_v24 = vmul.f32 %v5334_v13, %v5302_v34  ;;  %v2774_v32 = vmul.f32 %v5330_v45, %v7569_v41  ;;  %v2775_v13 = vmul.f32 %v5332_v11, %v7571_v1 }
 0x5cd   :  { %v5338_v29 = vpop.eup %5337  ;;  %5363 = vpow2.f32 %v4658_v25  ;;  %v2777_v35 = vmul.f32 %v5336_v27, %v5304_v39 }
 0x5ce   :  { %v5340_v28 = vpop.eup %5339  ;;  %v2778_v56 = vmul.f32 %v5338_v29, %v5306_v52  ;;  %v8076_v59 = vadd.f32 %v2776_v24, %v2768_v44 }
 0x5cf   :  { %v5342_v36 = vpop.eup %5341  ;;  %v2779_v54 = vmul.f32 %v5340_v28, %v8049_v50  ;;  %v8080_v55 = vadd.f32 %v2777_v35, %v2769_v20 }
 0x5d0   :  { %v5344_v34 = vpop.eup %5343  ;;  %v2780_v57 = vmul.f32 %v5342_v36, %v8053_v60  ;;  %v8083_v63 = vadd.f32 %v2778_v56, %v2770_v30  ;;  %5365 = vtanh.f32 %v8076_v59 }
 0x5d1   :  { %v5346_v37 = vpop.eup %5345  ;;  %v2781_v3 = vmul.f32 %v5344_v34, %v8057_v38  ;;  %v8087_v19 = vadd.f32 %v2779_v54, %v2771_v47  ;;  %5367 = vtanh.f32 %v8080_v55 }
 0x5d2   :  { %v5348_v39 = vpop.eup %5347  ;;  %v8090_v52 = vadd.f32 %v2780_v57, %v2772_v48  ;;  %5369 = vtanh.f32 %v8083_v63  ;;  %v2782_v24 = vmul.f32 %v5346_v37, %v8061_v0 }
 0x5d3   :  { %v5350_v9 = vpop.eup %5349  ;;  %v8093_v50 = vadd.f32 %v2781_v3, %v2773_v22  ;;  %5371 = vtanh.f32 %v8087_v19  ;;  %v2783_v35 = vmul.f32 %v5348_v39, %v8065_v33 }
 0x5d4   :  { %v5352_v60 = vpop.eup %5351  ;;  %v2744_v14 = vadd.f32 1.0, %v5350_v9  ;;  %5373 = vtanh.f32 %v8090_v52  ;;  %v8102_v56 = vadd.f32 %v2782_v24, %v2774_v32 }
 0x5d5   :  { %v5354_v51 = vpop.eup %5353  ;;  %v2745_v38 = vadd.f32 1.0, %v5352_v60  ;;  %5375 = vtanh.f32 %v8093_v50  ;;  %v8104_v45 = vadd.f32 %v2783_v35, %v2775_v13 }
 0x5d6   :  { %v5356_v42 = vpop.eup %5355  ;;  %v2746_v23 = vadd.f32 1.0, %v5354_v51  ;;  %5377 = vrcp.f32 %v2744_v14 }
 0x5d7   :  { %v5358_v25 = vpop.eup %5357  ;;  %v2747_v44 = vadd.f32 1.0, %v5356_v42  ;;  %5379 = vrcp.f32 %v2745_v38 }
 0x5d8   :  { %v5360_v20 = vpop.eup %5359  ;;  %v2748_v27 = vadd.f32 1.0, %v5358_v25  ;;  %5381 = vrcp.f32 %v2746_v23 }
 0x5d9   :  { %v5362_v30 = vpop.eup %5361  ;;  %v2749_v29 = vadd.f32 1.0, %v5360_v20  ;;  %5383 = vrcp.f32 %v2747_v44 }
 0x5da   :  { %v5364_v47 = vpop.eup %5363  ;;  %v2750_v28 = vadd.f32 1.0, %v5362_v30  ;;  %5385 = vrcp.f32 %v2748_v27 }
 0x5db   :  { %v2751_v41 = vadd.f32 1.0, %v5364_v47  ;;  %5387 = vrcp.f32 %v2749_v29 }
 0x5dc   :  { %5389 = vrcp.f32 %v2750_v28 }
 0x5dd   :  { %v5366_v1 = vpop.eup %5365  ;;  %5391 = vrcp.f32 %v2751_v41 }
 0x5de   :  { %v5368_v11 = vpop.eup %5367  ;;  %5393 = vtanh.f32 %v8102_v56 }
 0x5df   :  { %v5370_v0 = vpop.eup %5369  ;;  %5395 = vtanh.f32 %v8104_v45 }
 0x5e0   :  { %v5372_v48 = vpop.eup %5371 }
 0x5e1   :  { %v5374_v33 = vpop.eup %5373 }
 0x5e2   :  { %v5376_v36 = vpop.eup %5375 }
 0x5e3   :  { %v5378_v54 = vpop.eup %5377 }
 0x5e4   :  { %v5380_v22 = vpop.eup %5379  ;;  %v2800_v34 = vmul.f32 %v5378_v54, %v5366_v1  ;;  %v9179_v54 = vld [vmem:[#allocation26_spill] sm:$0xff] }
 0x5e5   :  { %v5382_v57 = vpop.eup %5381  ;;  %v2801_v37 = vmul.f32 %v5380_v22, %v5368_v11  ;;  %v9180_v22 = vld [vmem:[#allocation27_spill] sm:$0xff] }
 0x5e6   :  { %v5384_v3 = vpop.eup %5383  ;;  %v2802_v39 = vmul.f32 %v5382_v57, %v5370_v0  ;;  %2808 = vst [vmem:[%s8848_s2 + $0x4] sm:$0x1] %v2800_v34  ;;  %v9182_v57 = vld [vmem:[#allocation29_spill] sm:$0xff] }
 0x5e7   :  { %v5386_v9 = vpop.eup %5385  ;;  %v2803_v60 = vmul.f32 %v5384_v3, %v5372_v48  ;;  %2809 = vst [vmem:[%s8848_s2 + $0xc] sm:$0x1] %v2801_v37  ;;  %v2840_v23 = vcombine.low %v2800_v34, %v2801_v37  ;;  %v9181_v34 = vld [vmem:[#allocation28_spill] sm:$0xff]  ;;  %v9183_v37 = vld [vmem:[#allocation30_spill] sm:$0xff]  ;;  %v9184_v3 = vld [vmem:[#allocation31_spill] sm:$0xff] }
 0x5e8   :  { %v5388_v14 = vpop.eup %5387  ;;  %v2804_v51 = vmul.f32 %v5386_v9, %v5374_v33  ;;  %2810 = vst [vmem:[%s8848_s2 + $0x14] sm:$0x1] %v2802_v39  ;;  %v9177_v33 = vld [vmem:[#allocation24_spill] sm:$0xff]  ;;  %v9186_v9 = vld [vmem:[#allocation33_spill] sm:$0xff] }
 0x5e9   :  { %v5390_v38 = vpop.eup %5389  ;;  %v2805_v42 = vmul.f32 %v5388_v14, %v5376_v36  ;;  %2811 = vst [vmem:[%s8848_s2 + $0x1c] sm:$0x1] %v2803_v60  ;;  %v2841_v32 = vcombine.low %v2802_v39, %v2803_v60  ;;  %v2850_v29 = vrot.slane %v2840_v23, %v6446_v62  ;;  %v9178_v36 = vld [vmem:[#allocation25_spill] sm:$0xff]  ;;  %v9185_v39 = vld [vmem:[#allocation32_spill] sm:$0xff]  ;;  %v9187_v60 = vld [vmem:[#allocation34_spill] sm:$0xff] }
 0x5ea   :  { %v5392_v25 = vpop.eup %5391  ;;  %2812 = vst [vmem:[%s8848_s2 + $0x24] sm:$0x1] %v2804_v51  ;;  %v9188_v14 = vld [vmem:[#allocation35_spill] sm:$0xff] }
 0x5eb   :  { %v5394_v44 = vpop.eup %5393  ;;  %2813 = vst [vmem:[%s8848_s2 + $0x2c] sm:$0x1] %v2805_v42  ;;  %v2857_v13 = vrot.slane %v2841_v32, %v6446_v62  ;;  %v2842_v30 = vcombine.low %v2804_v51, %v2805_v42  ;;  %v9189_v51 = vld [vmem:[#allocation36_spill] sm:$0xff]  ;;  %v9191_v42 = vld [vmem:[#allocation38_spill] sm:$0xff]  ;;  %v9192_v23 = vld [vmem:[#allocation39_spill] sm:$0xff] }
 0x5ec   :  { %v5396_v20 = vpop.eup %5395  ;;  %v2806_v27 = vmul.f32 %v5394_v44, %v5390_v38  ;;  %v9190_v38 = vld [vmem:[#allocation37_spill] sm:$0xff]  ;;  %v9193_v32 = vld [vmem:[#allocation40_spill] sm:$0xff] }
 0x5ed   :  { %v2807_v24 = vmul.f32 %v5396_v20, %v5392_v25  ;;  %v2872_v47 = vcombine.low %v2850_v29, %v2857_v13  ;;  %v2864_v28 = vrot.slane %v2842_v30, %v6446_v62  ;;  %v9194_v25 = vmov 0.0   ;;  %v9195_v44 = vld [vmem:[#allocation41_spill] sm:$0xff]  ;;  %v5909_v13 = vld [vmem:[%s8846_s1 + $0x1e8] sm:$0xff] }
 0x5ee   :  { %2814 = vst [vmem:[%s8848_s2 + $0x34] sm:$0x1] %v2806_v27  ;;  %v5910_v20 = vld [vmem:[%s8846_s1 + $0x1f8] sm:$0xff] }
 0x5ef   :  { %2815 = vst [vmem:[%s8848_s2 + $0x3c] sm:$0x1] %v2807_v24  ;;  %v2843_v35 = vcombine.low %v2806_v27, %v2807_v24  ;;  %v2880_v11 = vrot.slane %v2872_v47, %v6446_v62 }
 0x5f1   :  { %v2871_v41 = vrot.slane %v2843_v35, %v6446_v62 }
 0x5f3   :  { %v2873_v1 = vcombine.low %v2864_v28, %v2871_v41 }
 0x5f5   :  { %v2887_v0 = vrot.slane %v2873_v1, %v6446_v62 }
 0x5f7   :  { %v2888_v48 = vcombine.low %v2880_v11, %v2887_v0 }
 0x5f9   :  { %2955 = vmatmul.mubr.f32.vlgmr.msra.gmra.mxu0 %v2888_v48  ;;  %3026 = vmatmul.mubr.f32.vlgmr.msra.gmra.mxu1 %v2888_v48 }
 0x5fa   :  { %3451 = vmatpush1.msra.mxu0 %v7608_v53  ;;  %3522 = vmatpush1.msra.mxu1 %v7614_v43  ;;  %v9155_v53 = vld [vmem:[#allocation2_spill] sm:$0xff]  ;;  %v9156_v43 = vld [vmem:[#allocation3_spill] sm:$0xff] }
 0x5fb   :  { %3452 = vmatprep.subr.mxu0 %v7620_v58  ;;  %3523 = vmatprep.subr.mxu1 %v7626_v40  ;;  %v9157_v58 = vld [vmem:[#allocation4_spill] sm:$0xff]  ;;  %v9158_v40 = vld [vmem:[#allocation5_spill] sm:$0xff] }
 0x5fc   :  { %3453 = vmatpush1.msra.mxu0 %v7632_v17  ;;  %3524 = vmatpush1.msra.mxu1 %v7638_v2  ;;  %v9159_v17 = vld [vmem:[#allocation6_spill] sm:$0xff]  ;;  %v9160_v2 = vld [vmem:[#allocation7_spill] sm:$0xff] }
 0x5fd   :  { %3454 = vmatprep.subr.mxu0 %v7644_v12  ;;  %3525 = vmatprep.subr.mxu1 %v7650_v4  ;;  %v9161_v12 = vld [vmem:[#allocation8_spill] sm:$0xff]  ;;  %v9162_v4 = vld [vmem:[#allocation9_spill] sm:$0xff] }
 0x5fe   :  { %3455 = vmatpush1.msra.mxu0 %v7656_v5  ;;  %3526 = vmatpush1.msra.mxu1 %v7662_v6  ;;  %v9163_v5 = vld [vmem:[#allocation10_spill] sm:$0xff]  ;;  %v9164_v6 = vld [vmem:[#allocation11_spill] sm:$0xff] }
 0x5ff   :  { %3456 = vmatprep.subr.mxu0 %v7668_v18  ;;  %3527 = vmatprep.subr.mxu1 %v7674_v46  ;;  %v9165_v18 = vld [vmem:[#allocation12_spill] sm:$0xff]  ;;  %v9166_v46 = vld [vmem:[#allocation13_spill] sm:$0xff] }
 0x600   :  { %3457 = vmatpush1.msra.mxu0 %v7680_v7  ;;  %3528 = vmatpush1.msra.mxu1 %v7686_v8  ;;  %v9167_v7 = vld [vmem:[#allocation14_spill] sm:$0xff]  ;;  %v9168_v8 = vld [vmem:[#allocation15_spill] sm:$0xff] }
 0x601   :  { %3458 = vmatprep.subr.mxu0 %v7692_v31  ;;  %3529 = vmatprep.subr.mxu1 %v7698_v21  ;;  %v9169_v31 = vld [vmem:[#allocation16_spill] sm:$0xff]  ;;  %v9170_v21 = vld [vmem:[#allocation17_spill] sm:$0xff] }
 0x602   :  { %3459 = vmatpush1.msra.mxu0 %v7704_v49  ;;  %3530 = vmatpush1.msra.mxu1 %v7710_v15  ;;  %v9171_v49 = vld [vmem:[#allocation18_spill] sm:$0xff]  ;;  %v9172_v15 = vld [vmem:[#allocation19_spill] sm:$0xff] }
 0x603   :  { %3460 = vmatprep.subr.mxu0 %v7716_v10  ;;  %3531 = vmatprep.subr.mxu1 %v7722_v16  ;;  %v9173_v10 = vld [vmem:[#allocation20_spill] sm:$0xff]  ;;  %v9174_v16 = vld [vmem:[#allocation21_spill] sm:$0xff] }
 0x604   :  { %3461 = vmatpush1.msra.mxu0 %v7728_v26  ;;  %3532 = vmatpush1.msra.mxu1 %v7734_v61  ;;  %v9175_v26 = vld [vmem:[#allocation22_spill] sm:$0xff]  ;;  %v9176_v61 = vld [vmem:[#allocation23_spill] sm:$0xff] }
 0x605   :  { %3462 = vmatprep.subr.mxu0 %v9155_v53  ;;  %3533 = vmatprep.subr.mxu1 %v9156_v43 }
 0x606   :  { %3463 = vmatpush1.msra.mxu0 %v9157_v58  ;;  %3534 = vmatpush1.msra.mxu1 %v9158_v40 }
 0x607   :  { %3464 = vmatprep.subr.mxu0 %v9159_v17  ;;  %3535 = vmatprep.subr.mxu1 %v9160_v2  ;;  %v4659_v17 = vld [vmem:[%s8847_s0 + $0x5] ss:$8 sm:$0xf] }
 0x608   :  { %3465 = vmatpush1.msra.mxu0 %v9161_v12  ;;  %3536 = vmatpush1.msra.mxu1 %v9162_v4  ;;  %v4660_v2 = vld [vmem:[%s8847_s0 + $0x25] ss:$8 sm:$0xf] }
 0x609   :  { %3466 = vmatprep.subr.mxu0 %v9163_v5  ;;  %3537 = vmatprep.subr.mxu1 %v9164_v6  ;;  %v4661_v12 = vld [vmem:[%s8847_s0 + $0x45] ss:$8 sm:$0xf] }
 0x60a   :  { %3467 = vmatpush1.msra.mxu0 %v9165_v18  ;;  %3538 = vmatpush1.msra.mxu1 %v9166_v46  ;;  %v4663_v4 = vld [vmem:[%s8847_s0 + $0x85] ss:$8 sm:$0xf] }
 0x60b   :  { %3468 = vmatprep.subr.mxu0 %v9167_v7  ;;  %3539 = vmatprep.subr.mxu1 %v9168_v8  ;;  %v4662_v7 = vld [vmem:[%s8847_s0 + $0x65] ss:$8 sm:$0xf] }
 0x60c   :  { %3469 = vmatpush1.msra.mxu0 %v9169_v31  ;;  %3540 = vmatpush1.msra.mxu1 %v9170_v21  ;;  %v4664_v8 = vld [vmem:[%s8847_s0 + $0xa5] ss:$8 sm:$0xf] }
 0x60d   :  { %3470 = vmatprep.subr.mxu0 %v9171_v49  ;;  %3541 = vmatprep.subr.mxu1 %v9172_v15  ;;  %v4665_v31 = vld [vmem:[%s8847_s0 + $0xc5] ss:$8 sm:$0xf] }
 0x60e   :  { %3471 = vmatpush1.msra.mxu0 %v9173_v10  ;;  %3542 = vmatpush1.msra.mxu1 %v9174_v16  ;;  %v4666_v16 = vld [vmem:[%s8847_s0 + $0xe5] ss:$8 sm:$0xf] }
 0x60f   :  { %3472 = vmatprep.subr.mxu0 %v9175_v26  ;;  %3543 = vmatprep.subr.mxu1 %v9176_v61 }
 0x610   :  { %3473 = vmatpush1.msra.mxu0 %v9177_v33  ;;  %3544 = vmatpush1.msra.mxu1 %v9178_v36 }
 0x611   :  { %3474 = vmatprep.subr.mxu0 %v9179_v54  ;;  %3545 = vmatprep.subr.mxu1 %v9180_v22 }
 0x612   :  { %3475 = vmatpush1.msra.mxu0 %v9181_v34  ;;  %3546 = vmatpush1.msra.mxu1 %v9182_v57 }
 0x613   :  { %3476 = vmatprep.subr.mxu0 %v9183_v37  ;;  %3547 = vmatprep.subr.mxu1 %v9184_v3 }
 0x614   :  { %3477 = vmatpush1.msra.mxu0 %v9185_v39  ;;  %3548 = vmatpush1.msra.mxu1 %v9186_v9 }
 0x615   :  { %3478 = vmatprep.subr.mxu0 %v9187_v60  ;;  %3549 = vmatprep.subr.mxu1 %v9188_v14 }
 0x616   :  { %3479 = vmatpush1.msra.mxu0 %v9189_v51  ;;  %3550 = vmatpush1.msra.mxu1 %v9190_v38 }
 0x617   :  { %3480 = vmatprep.subr.mxu0 %v9191_v42  ;;  %3551 = vmatprep.subr.mxu1 %v9192_v23 }
 0x618   :  { %3481 = vmatpush1.msra.mxu0 %v9193_v32  ;;  %3514 = vmatprep.mubr.f32.mxu0 %v9194_v25 }
 0x619   :  { %3552 = vmatpush1.msra.mxu1 %v9195_v44  ;;  %3585 = vmatprep.mubr.f32.mxu1 %v9194_v25 }
 0x61a   :  { %4010 = vmatprep.subr.mxu0 %v5909_v13  ;;  %4081 = vmatprep.subr.mxu1 %v5910_v20 }
 0x6b9   :  { %v2956_v27 = vpop.f32.mrf.mxu0  ;;  %v3027_v24 = vpop.f32.mrf.mxu1 }
 0x6bb   :  { %v2958_v30 = vpop.f32.mrf.mxu0  ;;  %v3029_v29 = vpop.f32.mrf.mxu1 }
 0x6bc   :  { %v3036_v35 = vcombine.low %v2956_v27, %v2958_v30  ;;  %v3037_v47 = vcombine.high %v2956_v27, %v2958_v30  ;;  %v3038_v28 = vcombine.low %v3027_v24, %v3029_v29  ;;  %v3039_v41 = vcombine.high %v3027_v24, %v3029_v29 }
 0x6be   :  { %v3046_v1 = vrot.slane %v3036_v35, %v6446_v62  ;;  %v3053_v11 = vrot.slane %v3037_v47, %v6446_v62  ;;  %v3060_v0 = vrot.slane %v3038_v28, %v6446_v62  ;;  %v3067_v48 = vrot.slane %v3039_v41, %v6446_v62 }
 0x6c0   :  { %v3068_v53 = vcombine.low %v3046_v1, %v3060_v0  ;;  %v3069_v43 = vcombine.high %v3046_v1, %v3060_v0  ;;  %v3070_v58 = vcombine.low %v3053_v11, %v3067_v48  ;;  %v3071_v40 = vcombine.high %v3053_v11, %v3067_v48 }
 0x6c2   :  { %v3078_v5 = vrot.slane %v3068_v53, %v6446_v62  ;;  %v3085_v6 = vrot.slane %v3070_v58, %v6446_v62  ;;  %v3092_v18 = vrot.slane %v3069_v43, %v6446_v62  ;;  %v3099_v46 = vrot.slane %v3071_v40, %v6446_v62 }
 0x6c4   :  { %v3100_v21 = vcombine.high %v3078_v5, %v3078_v5  ;;  %v3101_v49 = vcombine.high %v3085_v6, %v3085_v6  ;;  %v3102_v15 = vcombine.high %v3092_v18, %v3092_v18  ;;  %v3103_v10 = vcombine.high %v3099_v46, %v3099_v46 }
 0x6c5   :  { %v8240_v26 = vadd.f32 %v4659_v17, %v3078_v5  ;;  %v8242_v61 = vadd.f32 %v4660_v2, %v3092_v18  ;;  %v8244_v33 = vadd.f32 %v4663_v4, %v3085_v6  ;;  %v8250_v22 = vadd.f32 %v4664_v8, %v3099_v46 }
 0x6c6   :  { %v8246_v36 = vadd.f32 %v4661_v12, %v3100_v21  ;;  %v8248_v54 = vadd.f32 %v4662_v7, %v3102_v15  ;;  %v8252_v34 = vadd.f32 %v4665_v31, %v3101_v49  ;;  %v8256_v3 = vadd.f32 %v4666_v16, %v3103_v10 }
 0x6c7   :  { %v4667_v57 = vmul.f32 -1.442695, %v8240_v26  ;;  %v4668_v37 = vmul.f32 -1.442695, %v8242_v61  ;;  %v4671_v60 = vmul.f32 -1.442695, %v8244_v33 }
 0x6c8   :  { %v4669_v39 = vmul.f32 -1.442695, %v8246_v36  ;;  %v4670_v9 = vmul.f32 -1.442695, %v8248_v54  ;;  %v3176_v14 = vrot.slane %v8240_v26, 1  ;;  %v3177_v38 = vrot.slane %v8242_v61, 1 }
 0x6c9   :  { %5397 = vpow2.f32 %v4667_v57  ;;  %v4672_v51 = vmul.f32 -1.442695, %v8250_v22  ;;  %v4673_v42 = vmul.f32 -1.442695, %v8252_v34  ;;  %v3178_v23 = vrot.slane %v8246_v36, 1 }
 0x6ca   :  { %5399 = vpow2.f32 %v4668_v37  ;;  %v4674_v32 = vmul.f32 -1.442695, %v8256_v3  ;;  %v3179_v44 = vrot.slane %v8248_v54, 1  ;;  %v3180_v13 = vrot.slane %v8244_v33, 1 }
 0x6cb   :  { %5401 = vpow2.f32 %v4669_v39  ;;  %v4675_v20 = vmul.f32 -1.442695, %v3176_v14  ;;  %v3181_v27 = vrot.slane %v8250_v22, 1  ;;  %v4676_v24 = vmul.f32 -1.442695, %v3177_v38 }
 0x6cc   :  { %5403 = vpow2.f32 %v4670_v9  ;;  %v3182_v30 = vrot.slane %v8252_v34, 1  ;;  %v4677_v29 = vmul.f32 -1.442695, %v3178_v23  ;;  %v3183_v35 = vrot.slane %v8256_v3, 1 }
 0x6cd   :  { %5405 = vpow2.f32 %v4671_v60  ;;  %v4678_v47 = vmul.f32 -1.442695, %v3179_v44  ;;  %v4679_v28 = vmul.f32 -1.442695, %v3180_v13  ;;  %v4680_v41 = vmul.f32 -1.442695, %v3181_v27 }
 0x6ce   :  { %5407 = vpow2.f32 %v4672_v51  ;;  %v4681_v1 = vmul.f32 -1.442695, %v3182_v30  ;;  %v4682_v11 = vmul.f32 -1.442695, %v3183_v35  ;;  %v3240_v23 = vrot.slane %v8240_v26, 2 }
 0x6cf   :  { %5409 = vpow2.f32 %v4673_v42  ;;  %v3241_v13 = vrot.slane %v8242_v61, 2  ;;  %v3242_v27 = vrot.slane %v8246_v36, 2  ;;  %v3243_v30 = vrot.slane %v8248_v54, 2 }
 0x6d0   :  { %5411 = vpow2.f32 %v4674_v32  ;;  %v3244_v35 = vrot.slane %v8244_v33, 2 }
 0x6d1   :  { %5413 = vpow2.f32 %v4675_v20 }
 0x6d2   :  { %5415 = vpow2.f32 %v4676_v24 }
 0x6d3   :  { %5417 = vpow2.f32 %v4677_v29 }
 0x6d4   :  { %5419 = vpow2.f32 %v4678_v47  ;;  %v3264_v47 = vrot.slane %v8240_v26, 3  ;;  %v3267_v26 = vrot.slane %v8248_v54, 3  ;;  %v3271_v54 = vrot.slane %v8256_v3, 3 }
 0x6d5   :  { %5421 = vpow2.f32 %v4679_v28 }
 0x6d6   :  { %v5398_v0 = vpop.eup %5397  ;;  %5423 = vpow2.f32 %v4680_v41  ;;  %v3245_v41 = vrot.slane %v8250_v22, 2 }
 0x6d7   :  { %v5400_v48 = vpop.eup %5399  ;;  %v3144_v53 = vadd.f32 1.0, %v5398_v0  ;;  %5425 = vpow2.f32 %v4681_v1  ;;  %v3265_v1 = vrot.slane %v8242_v61, 3  ;;  %v3246_v0 = vrot.slane %v8252_v34, 2 }
 0x6d8   :  { %v5402_v43 = vpop.eup %5401  ;;  %v3145_v58 = vadd.f32 1.0, %v5400_v48  ;;  %5427 = vpow2.f32 %v4682_v11  ;;  %v3266_v48 = vrot.slane %v8246_v36, 3  ;;  %v4683_v61 = vmul.f32 -1.442695, %v3264_v47 }
 0x6d9   :  { %v5404_v40 = vpop.eup %5403  ;;  %v3146_v17 = vadd.f32 1.0, %v5402_v43  ;;  %5429 = vrcp.f32 %v3144_v53  ;;  %v3247_v43 = vrot.slane %v8256_v3, 2  ;;  %v3270_v36 = vrot.slane %v8252_v34, 3 }
 0x6da   :  { %v5406_v2 = vpop.eup %5405  ;;  %v3147_v12 = vadd.f32 1.0, %v5404_v40  ;;  %5431 = vrcp.f32 %v3145_v58  ;;  %v3268_v40 = vrot.slane %v8244_v33, 3 }
 0x6db   :  { %v5408_v4 = vpop.eup %5407  ;;  %v3148_v5 = vadd.f32 1.0, %v5406_v2  ;;  %5433 = vrcp.f32 %v3146_v17  ;;  %v3269_v2 = vrot.slane %v8250_v22, 3  ;;  %v4689_v22 = vmul.f32 -1.442695, %v3270_v36 }
 0x6dc   :  { %v5410_v6 = vpop.eup %5409  ;;  %v3149_v18 = vadd.f32 1.0, %v5408_v4  ;;  %5435 = vrcp.f32 %v3147_v12  ;;  %v4684_v12 = vmul.f32 -1.442695, %v3265_v1 }
 0x6dd   :  { %v5412_v46 = vpop.eup %5411  ;;  %v3150_v7 = vadd.f32 1.0, %v5410_v6  ;;  %5437 = vrcp.f32 %v3148_v5  ;;  %v4685_v5 = vmul.f32 -1.442695, %v3266_v48 }
 0x6de   :  { %v5414_v8 = vpop.eup %5413  ;;  %v3151_v31 = vadd.f32 1.0, %v5412_v46  ;;  %5439 = vrcp.f32 %v3149_v18  ;;  %v4686_v18 = vmul.f32 -1.442695, %v3267_v26 }
 0x6df   :  { %v5416_v21 = vpop.eup %5415  ;;  %5441 = vrcp.f32 %v3150_v7  ;;  %v3216_v49 = vadd.f32 1.0, %v5414_v8  ;;  %v4687_v7 = vmul.f32 -1.442695, %v3268_v40  ;;  %v4688_v8 = vmul.f32 -1.442695, %v3269_v2 }
 0x6e0   :  { %v5418_v15 = vpop.eup %5417  ;;  %5443 = vrcp.f32 %v3151_v31  ;;  %v3217_v10 = vadd.f32 1.0, %v5416_v21 }
 0x6e1   :  { %v5420_v16 = vpop.eup %5419  ;;  %v3218_v57 = vadd.f32 1.0, %v5418_v15  ;;  %5445 = vrcp.f32 %v3216_v49  ;;  %v4690_v49 = vmul.f32 -1.442695, %v3271_v54 }
 0x6e2   :  { %v5422_v37 = vpop.eup %5421  ;;  %v3219_v39 = vadd.f32 1.0, %v5420_v16  ;;  %5447 = vrcp.f32 %v3217_v10 }
 0x6e3   :  { %v5424_v9 = vpop.eup %5423  ;;  %v3220_v60 = vadd.f32 1.0, %v5422_v37  ;;  %5449 = vrcp.f32 %v3218_v57 }
 0x6e4   :  { %v5426_v14 = vpop.eup %5425  ;;  %v3221_v51 = vadd.f32 1.0, %v5424_v9  ;;  %5451 = vrcp.f32 %v3219_v39 }
 0x6e5   :  { %v5428_v38 = vpop.eup %5427  ;;  %v3222_v42 = vadd.f32 1.0, %v5426_v14  ;;  %5453 = vrcp.f32 %v3220_v60 }
 0x6e6   :  { %v5430_v32 = vpop.eup %5429  ;;  %v3223_v44 = vadd.f32 1.0, %v5428_v38  ;;  %5455 = vrcp.f32 %v3221_v51 }
 0x6e7   :  { %v5432_v20 = vpop.eup %5431  ;;  %5457 = vrcp.f32 %v3222_v42 }
 0x6e8   :  { %v5434_v24 = vpop.eup %5433  ;;  %5459 = vrcp.f32 %v3223_v44 }
 0x6e9   :  { %v8276_v29 = vpop.eup %5435  ;;  %5461 = vtanh.f32 %v3240_v23 }
 0x6ea   :  { %v8280_v28 = vpop.eup %5437  ;;  %5463 = vtanh.f32 %v3241_v13 }
 0x6eb   :  { %v8284_v11 = vpop.eup %5439  ;;  %5465 = vtanh.f32 %v3242_v27 }
 0x6ec   :  { %v8288_v53 = vpop.eup %5441  ;;  %5467 = vtanh.f32 %v3243_v30 }
 0x6ed   :  { %v8292_v58 = vpop.eup %5443  ;;  %5469 = vtanh.f32 %v3244_v35 }
 0x6ee   :  { %v5446_v17 = vpop.eup %5445  ;;  %5471 = vtanh.f32 %v3245_v41 }
 0x6ef   :  { %v5448_v4 = vpop.eup %5447  ;;  %5473 = vtanh.f32 %v3246_v0  ;;  %v3328_v34 = vmul.f32 %v5446_v17, %v8076_v59 }
 0x6f0   :  { %v5450_v6 = vpop.eup %5449  ;;  %5475 = vtanh.f32 %v3247_v43  ;;  %v3329_v3 = vmul.f32 %v5448_v4, %v8080_v55 }
 0x6f1   :  { %v5452_v46 = vpop.eup %5451  ;;  %5477 = vpow2.f32 %v4683_v61  ;;  %v3330_v37 = vmul.f32 %v5450_v6, %v8083_v63 }
 0x6f2   :  { %v5454_v33 = vpop.eup %5453  ;;  %5479 = vpow2.f32 %v4684_v12  ;;  %v3331_v60 = vmul.f32 %v5452_v46, %v8087_v19 }
 0x6f3   :  { %v5456_v31 = vpop.eup %5455  ;;  %5481 = vpow2.f32 %v4685_v5  ;;  %v3332_v38 = vmul.f32 %v5454_v33, %v8090_v52 }
 0x6f4   :  { %v5458_v21 = vpop.eup %5457  ;;  %5483 = vpow2.f32 %v4686_v18  ;;  %v3333_v55 = vmul.f32 %v5456_v31, %v8093_v50 }
 0x6f5   :  { %v5460_v15 = vpop.eup %5459  ;;  %5485 = vpow2.f32 %v4687_v7 }
 0x6f6   :  { %v5462_v10 = vpop.eup %5461  ;;  %5487 = vpow2.f32 %v4688_v8  ;;  %v3335_v43 = vmul.f32 %v5460_v15, %v8104_v45 }
 0x6f7   :  { %v5464_v16 = vpop.eup %5463  ;;  %5489 = vpow2.f32 %v4689_v22  ;;  %v3336_v57 = vmul.f32 %v5462_v10, %v5430_v32 }
 0x6f8   :  { %v5466_v39 = vpop.eup %5465  ;;  %5491 = vpow2.f32 %v4690_v49  ;;  %v3337_v9 = vmul.f32 %v5464_v16, %v5432_v20 }
 0x6f9   :  { %v5468_v14 = vpop.eup %5467  ;;  %v3338_v51 = vmul.f32 %v5466_v39, %v5434_v24  ;;  %v8303_v42 = vadd.f32 %v3336_v57, %v3328_v34 }
 0x6fa   :  { %v5470_v59 = vpop.eup %5469  ;;  %v3339_v23 = vmul.f32 %v5468_v14, %v8276_v29  ;;  %v8307_v44 = vadd.f32 %v3337_v9, %v3329_v3 }
 0x6fb   :  { %v5472_v32 = vpop.eup %5471  ;;  %v3340_v63 = vmul.f32 %v5470_v59, %v8280_v28  ;;  %v8310_v13 = vadd.f32 %v3338_v51, %v3330_v37  ;;  %5493 = vtanh.f32 %v8303_v42 }
 0x6fc   :  { %v5474_v19 = vpop.eup %5473  ;;  %v3341_v20 = vmul.f32 %v5472_v32, %v8284_v11  ;;  %v8314_v52 = vadd.f32 %v3339_v23, %v3331_v60  ;;  %5495 = vtanh.f32 %v8307_v44  ;;  %v3334_v11 = vmul.f32 %v5458_v21, %v8102_v56 }
 0x6fd   :  { %v5476_v27 = vpop.eup %5475  ;;  %v8317_v24 = vadd.f32 %v3340_v63, %v3332_v38  ;;  %5497 = vtanh.f32 %v8310_v13  ;;  %v3342_v61 = vmul.f32 %v5474_v19, %v8288_v53 }
 0x6fe   :  { %v5478_v50 = vpop.eup %5477  ;;  %v8320_v30 = vadd.f32 %v3341_v20, %v3333_v55  ;;  %5499 = vtanh.f32 %v8314_v52  ;;  %v3343_v12 = vmul.f32 %v5476_v27, %v8292_v58 }
 0x6ff   :  { %v5480_v29 = vpop.eup %5479  ;;  %v3304_v35 = vadd.f32 1.0, %v5478_v50  ;;  %5501 = vtanh.f32 %v8317_v24  ;;  %v8329_v5 = vadd.f32 %v3342_v61, %v3334_v11  ;;  %v5915_v11 = vld [vmem:[%s8846_s1 + $0x1c0] sm:$0xff]  ;;  %v5921_v61 = vld [vmem:[%s8846_s1 + $0x188] sm:$0xff] }
 0x700   :  { %v5482_v47 = vpop.eup %5481  ;;  %v3305_v28 = vadd.f32 1.0, %v5480_v29  ;;  %5503 = vtanh.f32 %v8320_v30  ;;  %v8331_v6 = vadd.f32 %v3343_v12, %v3335_v43  ;;  %v5918_v43 = vld [vmem:[%s8846_s1 + $0x1b8] sm:$0xff]  ;;  %v5924_v12 = vld [vmem:[%s8846_s1 + $0x190] sm:$0xff] }
 0x701   :  { %v5484_v41 = vpop.eup %5483  ;;  %v3306_v1 = vadd.f32 1.0, %v5482_v47  ;;  %5505 = vrcp.f32 %v3304_v35  ;;  %v5911_v47 = vld [vmem:[%s8846_s1 + $0x1e0] sm:$0xff] }
 0x702   :  { %v5486_v0 = vpop.eup %5485  ;;  %v3307_v48 = vadd.f32 1.0, %v5484_v41  ;;  %5507 = vrcp.f32 %v3305_v28  ;;  %v5912_v28 = vld [vmem:[%s8846_s1 + $0x1f0] sm:$0xff]  ;;  %v5913_v41 = vld [vmem:[%s8846_s1 + $0x1c8] sm:$0xff] }
 0x703   :  { %v5488_v26 = vpop.eup %5487  ;;  %v3308_v40 = vadd.f32 1.0, %v5486_v0  ;;  %5509 = vrcp.f32 %v3306_v1  ;;  %v5914_v1 = vld [vmem:[%s8846_s1 + $0x1d8] sm:$0xff]  ;;  %v5916_v0 = vld [vmem:[%s8846_s1 + $0x1d0] sm:$0xff] }
 0x704   :  { %v5490_v17 = vpop.eup %5489  ;;  %v3309_v2 = vadd.f32 1.0, %v5488_v26  ;;  %5511 = vrcp.f32 %v3307_v48  ;;  %v5917_v48 = vld [vmem:[%s8846_s1 + $0x1a8] sm:$0xff]  ;;  %v5919_v26 = vld [vmem:[%s8846_s1 + $0x1a0] sm:$0xff] }
 0x705   :  { %v5492_v4 = vpop.eup %5491  ;;  %v3310_v36 = vadd.f32 1.0, %v5490_v17  ;;  %5513 = vrcp.f32 %v3308_v40  ;;  %v5920_v40 = vld [vmem:[%s8846_s1 + $0x1b0] sm:$0xff]  ;;  %v5922_v17 = vld [vmem:[%s8846_s1 + $0x198] sm:$0xff] }
 0x706   :  { %v3311_v56 = vadd.f32 1.0, %v5492_v4  ;;  %5515 = vrcp.f32 %v3309_v2  ;;  %v5923_v2 = vld [vmem:[%s8846_s1 + $0x180] sm:$0xff]  ;;  %v5925_v4 = vld [vmem:[%s8846_s1 + $0x168] sm:$0xff] }
 0x707   :  { %5517 = vrcp.f32 %v3310_v36  ;;  %v5926_v36 = vld [vmem:[%s8846_s1 + $0x178] sm:$0xff] }
 0x708   :  { %v5494_v45 = vpop.eup %5493  ;;  %5519 = vrcp.f32 %v3311_v56  ;;  %v5927_v56 = vld [vmem:[%s8846_s1 + $0x160] sm:$0xff] }
 0x709   :  { %v5496_v54 = vpop.eup %5495  ;;  %5521 = vtanh.f32 %v8329_v5 }
 0x70a   :  { %v5498_v53 = vpop.eup %5497  ;;  %5523 = vtanh.f32 %v8331_v6 }
 0x70b   :  { %v5500_v18 = vpop.eup %5499 }
 0x70c   :  { %v5502_v58 = vpop.eup %5501 }
 0x70d   :  { %v5504_v46 = vpop.eup %5503 }
 0x70e   :  { %v5506_v7 = vpop.eup %5505 }
 0x70f   :  { %v5508_v33 = vpop.eup %5507  ;;  %v3360_v8 = vmul.f32 %v5506_v7, %v5494_v45  ;;  %v5928_v45 = vld [vmem:[%s8846_s1 + $0x170] sm:$0xff]  ;;  %v5934_v7 = vld [vmem:[%s8846_s1 + $0x138] sm:$0xff] }
 0x710   :  { %v5510_v31 = vpop.eup %5509  ;;  %v3361_v22 = vmul.f32 %v5508_v33, %v5496_v54  ;;  %v5929_v54 = vld [vmem:[%s8846_s1 + $0x148] sm:$0xff]  ;;  %v5935_v33 = vld [vmem:[%s8846_s1 + $0x120] sm:$0xff] }
 0x711   :  { %v5512_v21 = vpop.eup %5511  ;;  %v3362_v49 = vmul.f32 %v5510_v31, %v5498_v53  ;;  %3368 = vst [vmem:[%s8848_s2 + $0x5] sm:$0x1] %v3360_v8  ;;  %v5930_v53 = vld [vmem:[%s8846_s1 + $0x158] sm:$0xff]  ;;  %v5937_v31 = vld [vmem:[%s8846_s1 + $0x108] sm:$0xff] }
 0x712   :  { %v5514_v15 = vpop.eup %5513  ;;  %v3363_v34 = vmul.f32 %v5512_v21, %v5500_v18  ;;  %3369 = vst [vmem:[%s8848_s2 + $0xd] sm:$0x1] %v3361_v22  ;;  %v3400_v37 = vcombine.low %v3360_v8, %v3361_v22  ;;  %v5931_v18 = vld [vmem:[%s8846_s1 + $0x140] sm:$0xff]  ;;  %v5936_v8 = vld [vmem:[%s8846_s1 + $0x130] sm:$0xff]  ;;  %v5938_v22 = vld [vmem:[%s8846_s1 + $0x118] sm:$0xff] }
 0x713   :  { %v5516_v10 = vpop.eup %5515  ;;  %v3364_v3 = vmul.f32 %v5514_v15, %v5502_v58  ;;  %3370 = vst [vmem:[%s8848_s2 + $0x15] sm:$0x1] %v3362_v49  ;;  %v5932_v58 = vld [vmem:[%s8846_s1 + $0x150] sm:$0xff]  ;;  %v5939_v21 = vld [vmem:[%s8846_s1 + $0x100] sm:$0xff]  ;;  %v5941_v15 = vld [vmem:[%s8846_s1 + $0xe8] sm:$0xff] }
 0x714   :  { %v5518_v16 = vpop.eup %5517  ;;  %v3365_v57 = vmul.f32 %v5516_v10, %v5504_v46  ;;  %3371 = vst [vmem:[%s8848_s2 + $0x1d] sm:$0x1] %v3363_v34  ;;  %v3401_v39 = vcombine.low %v3362_v49, %v3363_v34  ;;  %v3410_v55 = vrot.slane %v3400_v37, %v6446_v62  ;;  %v5933_v46 = vld [vmem:[%s8846_s1 + $0x128] sm:$0xff]  ;;  %v5940_v49 = vld [vmem:[%s8846_s1 + $0x110] sm:$0xff]  ;;  %v5942_v34 = vld [vmem:[%s8846_s1 + $0xf8] sm:$0xff] }
 0x715   :  { %v5520_v9 = vpop.eup %5519  ;;  %3372 = vst [vmem:[%s8848_s2 + $0x25] sm:$0x1] %v3364_v3  ;;  %v5943_v10 = vld [vmem:[%s8846_s1 + $0xe0] sm:$0xff] }
 0x716   :  { %v5522_v60 = vpop.eup %5521  ;;  %3373 = vst [vmem:[%s8848_s2 + $0x2d] sm:$0x1] %v3365_v57  ;;  %v3417_v14 = vrot.slane %v3401_v39, %v6446_v62  ;;  %v3402_v23 = vcombine.low %v3364_v3, %v3365_v57  ;;  %v5944_v3 = vld [vmem:[%s8846_s1 + $0xf0] sm:$0xff]  ;;  %v5946_v57 = vld [vmem:[%s8846_s1 + $0xd8] sm:$0xff]  ;;  %v5947_v37 = vld [vmem:[%s8846_s1 + $0xc0] sm:$0xff] }
 0x717   :  { %v5524_v51 = vpop.eup %5523  ;;  %v3366_v38 = vmul.f32 %v5522_v60, %v5518_v16  ;;  %v5945_v16 = vld [vmem:[%s8846_s1 + $0xc8] sm:$0xff]  ;;  %v5948_v39 = vld [vmem:[%s8846_s1 + $0xd0] sm:$0xff]  ;;  %v5950_v60 = vld [vmem:[%s8846_s1 + $0xb8] sm:$0xff] }
 0x718   :  { %v3367_v59 = vmul.f32 %v5524_v51, %v5520_v9  ;;  %v3432_v63 = vcombine.low %v3410_v55, %v3417_v14  ;;  %v3424_v19 = vrot.slane %v3402_v23, %v6446_v62  ;;  %v5949_v9 = vld [vmem:[%s8846_s1 + $0xa8] sm:$0xff]  ;;  %v5951_v14 = vld [vmem:[%s8846_s1 + $0xa0] sm:$0xff]  ;;  %v5952_v51 = vld [vmem:[%s8846_s1 + $0xb0] sm:$0xff] }
 0x719   :  { %3374 = vst [vmem:[%s8848_s2 + $0x35] sm:$0x1] %v3366_v38  ;;  %v5955_v23 = vld [vmem:[%s8846_s1 + $0x80] sm:$0xff]  ;;  %v5956_v55 = vld [vmem:[%s8846_s1 + $0x90] sm:$0xff] }
 0x71a   :  { %3375 = vst [vmem:[%s8848_s2 + $0x3d] sm:$0x1] %v3367_v59  ;;  %v3403_v32 = vcombine.low %v3366_v38, %v3367_v59  ;;  %v3440_v50 = vrot.slane %v3432_v63, %v6446_v62  ;;  %v5953_v38 = vld [vmem:[%s8846_s1 + $0x88] sm:$0xff]  ;;  %v5954_v59 = vld [vmem:[%s8846_s1 + $0x98] sm:$0xff] }
 0x71b   :  { %v5958_v63 = vld [vmem:[%s8846_s1 + $0x78] sm:$0xff] }
 0x71c   :  { %v3431_v20 = vrot.slane %v3403_v32, %v6446_v62  ;;  %v5957_v32 = vld [vmem:[%s8846_s1 + $0x68] sm:$0xff] }
 0x71e   :  { %v3433_v27 = vcombine.low %v3424_v19, %v3431_v20  ;;  %v5959_v19 = vld [vmem:[%s8846_s1 + $0x60] sm:$0xff]  ;;  %v5960_v20 = vld [vmem:[%s8846_s1 + $0x70] sm:$0xff] }
 0x720   :  { %v3447_v29 = vrot.slane %v3433_v27, %v6446_v62  ;;  %v5961_v27 = vld [vmem:[%s8846_s1 + $0x48] sm:$0xff] }
 0x722   :  { %v3448_v35 = vcombine.low %v3440_v50, %v3447_v29  ;;  %v5962_v50 = vld [vmem:[%s8846_s1 + $0x58] sm:$0xff]  ;;  %v5963_v29 = vld [vmem:[%s8846_s1 + $0x40] sm:$0xff] }
 0x724   :  { %3515 = vmatmul.mubr.f32.vlgmr.msra.gmra.mxu0 %v3448_v35  ;;  %3586 = vmatmul.mubr.f32.vlgmr.msra.gmra.mxu1 %v3448_v35  ;;  %v5964_v35 = vld [vmem:[%s8846_s1 + $0x50] sm:$0xff] }
 0x725   :  { %4011 = vmatpush1.msra.mxu0 %v5911_v47  ;;  %4082 = vmatpush1.msra.mxu1 %v5912_v28  ;;  %v5965_v47 = vld [vmem:[%s8846_s1 + $0x28] sm:$0xff]  ;;  %v5966_v28 = vld [vmem:[%s8846_s1 + $0x38] sm:$0xff] }
 0x726   :  { %4012 = vmatprep.subr.mxu0 %v5913_v41  ;;  %4083 = vmatprep.subr.mxu1 %v5914_v1  ;;  %v5967_v41 = vld [vmem:[%s8846_s1 + $0x20] sm:$0xff]  ;;  %v5968_v1 = vld [vmem:[%s8846_s1 + $0x30] sm:$0xff] }
 0x727   :  { %4013 = vmatpush1.msra.mxu0 %v5915_v11  ;;  %4084 = vmatpush1.msra.mxu1 %v5916_v0  ;;  %v5969_v11 = vld [vmem:[%s8846_s1 + $0x8] sm:$0xff]  ;;  %v5970_v0 = vld [vmem:[%s8846_s1 + $0x18] sm:$0xff] }
 0x728   :  { %4014 = vmatprep.subr.mxu0 %v5917_v48  ;;  %4085 = vmatprep.subr.mxu1 %v5918_v43  ;;  %v5971_v48 = vld [vmem:[%s8846_s1] sm:$0xff]  ;;  %v5972_v43 = vld [vmem:[%s8846_s1 + $0x10] sm:$0xff] }
 0x729   :  { %4015 = vmatpush1.msra.mxu0 %v5919_v26  ;;  %4086 = vmatpush1.msra.mxu1 %v5920_v40 }
 0x72a   :  { %4016 = vmatprep.subr.mxu0 %v5921_v61  ;;  %4087 = vmatprep.subr.mxu1 %v5922_v17 }
 0x72b   :  { %4017 = vmatpush1.msra.mxu0 %v5923_v2  ;;  %4088 = vmatpush1.msra.mxu1 %v5924_v12 }
 0x72c   :  { %4018 = vmatprep.subr.mxu0 %v5925_v4  ;;  %4089 = vmatprep.subr.mxu1 %v5926_v36 }
 0x72d   :  { %4019 = vmatpush1.msra.mxu0 %v5927_v56  ;;  %4090 = vmatpush1.msra.mxu1 %v5928_v45 }
 0x72e   :  { %4020 = vmatprep.subr.mxu0 %v5929_v54  ;;  %4091 = vmatprep.subr.mxu1 %v5930_v53 }
 0x72f   :  { %4021 = vmatpush1.msra.mxu0 %v5931_v18  ;;  %4092 = vmatpush1.msra.mxu1 %v5932_v58 }
 0x730   :  { %4022 = vmatprep.subr.mxu0 %v5933_v46  ;;  %4093 = vmatprep.subr.mxu1 %v5934_v7  ;;  %v4691_v7 = vld [vmem:[%s8847_s0 + $0x6] ss:$8 sm:$0xf] }
 0x731   :  { %4023 = vmatpush1.msra.mxu0 %v5935_v33  ;;  %4094 = vmatpush1.msra.mxu1 %v5936_v8  ;;  %v4692_v33 = vld [vmem:[%s8847_s0 + $0x26] ss:$8 sm:$0xf] }
 0x732   :  { %4024 = vmatprep.subr.mxu0 %v5937_v31  ;;  %4095 = vmatprep.subr.mxu1 %v5938_v22  ;;  %v4693_v8 = vld [vmem:[%s8847_s0 + $0x46] ss:$8 sm:$0xf] }
 0x733   :  { %4025 = vmatpush1.msra.mxu0 %v5939_v21  ;;  %4096 = vmatpush1.msra.mxu1 %v5940_v49  ;;  %v4695_v31 = vld [vmem:[%s8847_s0 + $0x86] ss:$8 sm:$0xf] }
 0x734   :  { %4026 = vmatprep.subr.mxu0 %v5941_v15  ;;  %4097 = vmatprep.subr.mxu1 %v5942_v34  ;;  %v4694_v34 = vld [vmem:[%s8847_s0 + $0x66] ss:$8 sm:$0xf] }
 0x735   :  { %4027 = vmatpush1.msra.mxu0 %v5943_v10  ;;  %4098 = vmatpush1.msra.mxu1 %v5944_v3  ;;  %v4696_v10 = vld [vmem:[%s8847_s0 + $0xa6] ss:$8 sm:$0xf] }
 0x736   :  { %4028 = vmatprep.subr.mxu0 %v5945_v16  ;;  %4099 = vmatprep.subr.mxu1 %v5946_v57  ;;  %v4697_v3 = vld [vmem:[%s8847_s0 + $0xc6] ss:$8 sm:$0xf] }
 0x737   :  { %4029 = vmatpush1.msra.mxu0 %v5947_v37  ;;  %4100 = vmatpush1.msra.mxu1 %v5948_v39 }
 0x738   :  { %4030 = vmatprep.subr.mxu0 %v5949_v9  ;;  %4101 = vmatprep.subr.mxu1 %v5950_v60  ;;  %v4698_v9 = vld [vmem:[%s8847_s0 + $0xe6] ss:$8 sm:$0xf] }
 0x739   :  { %4031 = vmatpush1.msra.mxu0 %v5951_v14  ;;  %4102 = vmatpush1.msra.mxu1 %v5952_v51 }
 0x73a   :  { %4032 = vmatprep.subr.mxu0 %v5953_v38  ;;  %4103 = vmatprep.subr.mxu1 %v5954_v59 }
 0x73b   :  { %4033 = vmatpush1.msra.mxu0 %v5955_v23  ;;  %4104 = vmatpush1.msra.mxu1 %v5956_v55 }
 0x73c   :  { %4034 = vmatprep.subr.mxu0 %v5957_v32  ;;  %4105 = vmatprep.subr.mxu1 %v5958_v63 }
 0x73d   :  { %4035 = vmatpush1.msra.mxu0 %v5959_v19  ;;  %4106 = vmatpush1.msra.mxu1 %v5960_v20 }
 0x73e   :  { %4036 = vmatprep.subr.mxu0 %v5961_v27  ;;  %4107 = vmatprep.subr.mxu1 %v5962_v50 }
 0x73f   :  { %4037 = vmatpush1.msra.mxu0 %v5963_v29  ;;  %4108 = vmatpush1.msra.mxu1 %v5964_v35 }
 0x740   :  { %4038 = vmatprep.subr.mxu0 %v5965_v47  ;;  %4109 = vmatprep.subr.mxu1 %v5966_v28 }
 0x741   :  { %4039 = vmatpush1.msra.mxu0 %v5967_v41  ;;  %4110 = vmatpush1.msra.mxu1 %v5968_v1 }
 0x742   :  { %4040 = vmatprep.subr.mxu0 %v5969_v11  ;;  %4111 = vmatprep.subr.mxu1 %v5970_v0 }
 0x743   :  { %4041 = vmatpush1.msra.mxu0 %v5971_v48  ;;  %4074 = vmatprep.mubr.f32.mxu0 %v9194_v25 }
 0x744   :  { %4112 = vmatpush1.msra.mxu1 %v5972_v43  ;;  %4145 = vmatprep.mubr.f32.mxu1 %v9194_v25 }
 0x7e4   :  { %v3516_v26 = vpop.f32.mrf.mxu0  ;;  %v3587_v40 = vpop.f32.mrf.mxu1 }
 0x7e6   :  { %v3518_v61 = vpop.f32.mrf.mxu0  ;;  %v3589_v17 = vpop.f32.mrf.mxu1 }
 0x7e7   :  { %v3596_v2 = vcombine.low %v3516_v26, %v3518_v61  ;;  %v3597_v12 = vcombine.high %v3516_v26, %v3518_v61  ;;  %v3598_v4 = vcombine.low %v3587_v40, %v3589_v17  ;;  %v3599_v36 = vcombine.high %v3587_v40, %v3589_v17 }
 0x7e9   :  { %v3606_v56 = vrot.slane %v3596_v2, %v6446_v62  ;;  %v3613_v45 = vrot.slane %v3597_v12, %v6446_v62  ;;  %v3620_v54 = vrot.slane %v3598_v4, %v6446_v62  ;;  %v3627_v53 = vrot.slane %v3599_v36, %v6446_v62 }
 0x7eb   :  { %v3628_v18 = vcombine.low %v3606_v56, %v3620_v54  ;;  %v3629_v58 = vcombine.high %v3606_v56, %v3620_v54  ;;  %v3630_v46 = vcombine.low %v3613_v45, %v3627_v53  ;;  %v3631_v25 = vcombine.high %v3613_v45, %v3627_v53 }
 0x7ed   :  { %v3638_v22 = vrot.slane %v3628_v18, %v6446_v62  ;;  %v3645_v21 = vrot.slane %v3630_v46, %v6446_v62  ;;  %v3652_v49 = vrot.slane %v3629_v58, %v6446_v62  ;;  %v3659_v15 = vrot.slane %v3631_v25, %v6446_v62 }
 0x7ef   :  { %v3660_v16 = vcombine.high %v3638_v22, %v3638_v22  ;;  %v3661_v57 = vcombine.high %v3645_v21, %v3645_v21  ;;  %v3662_v37 = vcombine.high %v3652_v49, %v3652_v49  ;;  %v3663_v39 = vcombine.high %v3659_v15, %v3659_v15 }
 0x7f0   :  { %v8585_v60 = vadd.f32 %v4691_v7, %v3638_v22  ;;  %v8587_v14 = vadd.f32 %v4692_v33, %v3652_v49  ;;  %v8589_v51 = vadd.f32 %v4695_v31, %v3645_v21  ;;  %v8595_v23 = vadd.f32 %v4696_v10, %v3659_v15 }
 0x7f1   :  { %v8591_v38 = vadd.f32 %v4693_v8, %v3660_v16  ;;  %v8593_v59 = vadd.f32 %v4694_v34, %v3662_v37  ;;  %v8597_v55 = vadd.f32 %v4697_v3, %v3661_v57  ;;  %v8601_v19 = vadd.f32 %v4698_v9, %v3663_v39 }
 0x7f2   :  { %v4699_v32 = vmul.f32 -1.442695, %v8585_v60  ;;  %v4700_v63 = vmul.f32 -1.442695, %v8587_v14  ;;  %v4703_v50 = vmul.f32 -1.442695, %v8589_v51 }
 0x7f3   :  { %v4701_v20 = vmul.f32 -1.442695, %v8591_v38  ;;  %v4702_v27 = vmul.f32 -1.442695, %v8593_v59  ;;  %v3736_v29 = vrot.slane %v8585_v60, 1  ;;  %v3737_v47 = vrot.slane %v8587_v14, 1 }
 0x7f4   :  { %5525 = vpow2.f32 %v4699_v32  ;;  %v4704_v35 = vmul.f32 -1.442695, %v8595_v23  ;;  %v4705_v28 = vmul.f32 -1.442695, %v8597_v55  ;;  %v3738_v41 = vrot.slane %v8591_v38, 1 }
 0x7f5   :  { %5527 = vpow2.f32 %v4700_v63  ;;  %v4706_v1 = vmul.f32 -1.442695, %v8601_v19  ;;  %v3739_v11 = vrot.slane %v8593_v59, 1  ;;  %v3740_v0 = vrot.slane %v8589_v51, 1 }
 0x7f6   :  { %5529 = vpow2.f32 %v4701_v20  ;;  %v4707_v48 = vmul.f32 -1.442695, %v3736_v29  ;;  %v3741_v43 = vrot.slane %v8595_v23, 1  ;;  %v4708_v26 = vmul.f32 -1.442695, %v3737_v47 }
 0x7f7   :  { %5531 = vpow2.f32 %v4702_v27  ;;  %v3742_v40 = vrot.slane %v8597_v55, 1  ;;  %v4709_v61 = vmul.f32 -1.442695, %v3738_v41  ;;  %v3743_v17 = vrot.slane %v8601_v19, 1 }
 0x7f8   :  { %5533 = vpow2.f32 %v4703_v50  ;;  %v4710_v2 = vmul.f32 -1.442695, %v3739_v11  ;;  %v4711_v12 = vmul.f32 -1.442695, %v3740_v0  ;;  %v4712_v4 = vmul.f32 -1.442695, %v3741_v43 }
 0x7f9   :  { %5535 = vpow2.f32 %v4704_v35  ;;  %v4713_v36 = vmul.f32 -1.442695, %v3742_v40  ;;  %v4714_v56 = vmul.f32 -1.442695, %v3743_v17  ;;  %v3801_v11 = vrot.slane %v8587_v14, 2 }
 0x7fa   :  { %5537 = vpow2.f32 %v4705_v28  ;;  %v3800_v28 = vrot.slane %v8585_v60, 2  ;;  %v3824_v17 = vrot.slane %v8585_v60, 3  ;;  %v3827_v60 = vrot.slane %v8593_v59, 3 }
 0x7fb   :  { %5539 = vpow2.f32 %v4706_v1 }
 0x7fc   :  { %5541 = vpow2.f32 %v4707_v48  ;;  %v3802_v48 = vrot.slane %v8591_v38, 2 }
 0x7fd   :  { %5543 = vpow2.f32 %v4708_v26  ;;  %v3803_v26 = vrot.slane %v8593_v59, 2  ;;  %v3831_v59 = vrot.slane %v8601_v19, 3 }
 0x7fe   :  { %5545 = vpow2.f32 %v4709_v61  ;;  %v3804_v61 = vrot.slane %v8589_v51, 2 }
 0x7ff   :  { %5547 = vpow2.f32 %v4710_v2 }
 0x800   :  { %5549 = vpow2.f32 %v4711_v12  ;;  %v3805_v12 = vrot.slane %v8595_v23, 2 }
 0x801   :  { %v5526_v45 = vpop.eup %5525  ;;  %5551 = vpow2.f32 %v4712_v4  ;;  %v3825_v4 = vrot.slane %v8587_v14, 3  ;;  %v4715_v14 = vmul.f32 -1.442695, %v3824_v17 }
 0x802   :  { %v5528_v54 = vpop.eup %5527  ;;  %v3704_v53 = vadd.f32 1.0, %v5526_v45  ;;  %5553 = vpow2.f32 %v4713_v36  ;;  %v3826_v45 = vrot.slane %v8591_v38, 3  ;;  %v3830_v38 = vrot.slane %v8597_v55, 3 }
 0x803   :  { %v5530_v18 = vpop.eup %5529  ;;  %v3705_v58 = vadd.f32 1.0, %v5528_v54  ;;  %5555 = vpow2.f32 %v4714_v56  ;;  %v3806_v56 = vrot.slane %v8597_v55, 2 }
 0x804   :  { %v5532_v46 = vpop.eup %5531  ;;  %v3706_v25 = vadd.f32 1.0, %v5530_v18  ;;  %5557 = vrcp.f32 %v3704_v53  ;;  %v3807_v53 = vrot.slane %v8601_v19, 2 }
 0x805   :  { %v5534_v7 = vpop.eup %5533  ;;  %v3707_v33 = vadd.f32 1.0, %v5532_v46  ;;  %5559 = vrcp.f32 %v3705_v58  ;;  %v3828_v58 = vrot.slane %v8589_v51, 3 }
 0x806   :  { %v5536_v8 = vpop.eup %5535  ;;  %v3708_v31 = vadd.f32 1.0, %v5534_v7  ;;  %5561 = vrcp.f32 %v3706_v25  ;;  %v3829_v25 = vrot.slane %v8595_v23, 3  ;;  %v4716_v7 = vmul.f32 -1.442695, %v3825_v4 }
 0x807   :  { %v5538_v22 = vpop.eup %5537  ;;  %v3709_v21 = vadd.f32 1.0, %v5536_v8  ;;  %5563 = vrcp.f32 %v3707_v33  ;;  %v4717_v8 = vmul.f32 -1.442695, %v3826_v45  ;;  %v4721_v23 = vmul.f32 -1.442695, %v3830_v38 }
 0x808   :  { %v5540_v49 = vpop.eup %5539  ;;  %v3710_v15 = vadd.f32 1.0, %v5538_v22  ;;  %5565 = vrcp.f32 %v3708_v31  ;;  %v4718_v22 = vmul.f32 -1.442695, %v3827_v60 }
 0x809   :  { %v5542_v34 = vpop.eup %5541  ;;  %v3711_v10 = vadd.f32 1.0, %v5540_v49  ;;  %5567 = vrcp.f32 %v3709_v21  ;;  %v4719_v49 = vmul.f32 -1.442695, %v3828_v58 }
 0x80a   :  { %v5544_v3 = vpop.eup %5543  ;;  %5569 = vrcp.f32 %v3710_v15  ;;  %v3776_v16 = vadd.f32 1.0, %v5542_v34  ;;  %v4720_v15 = vmul.f32 -1.442695, %v3829_v25 }
 0x80b   :  { %v5546_v57 = vpop.eup %5545  ;;  %5571 = vrcp.f32 %v3711_v10  ;;  %v3777_v37 = vadd.f32 1.0, %v5544_v3  ;;  %v4722_v3 = vmul.f32 -1.442695, %v3831_v59 }
 0x80c   :  { %v5548_v39 = vpop.eup %5547  ;;  %v3778_v9 = vadd.f32 1.0, %v5546_v57  ;;  %5573 = vrcp.f32 %v3776_v16 }
 0x80d   :  { %v5550_v32 = vpop.eup %5549  ;;  %v3779_v63 = vadd.f32 1.0, %v5548_v39  ;;  %5575 = vrcp.f32 %v3777_v37 }
 0x80e   :  { %v5552_v20 = vpop.eup %5551  ;;  %v3780_v27 = vadd.f32 1.0, %v5550_v32  ;;  %5577 = vrcp.f32 %v3778_v9 }
 0x80f   :  { %v5554_v50 = vpop.eup %5553  ;;  %v3781_v29 = vadd.f32 1.0, %v5552_v20  ;;  %5579 = vrcp.f32 %v3779_v63 }
 0x810   :  { %v5556_v35 = vpop.eup %5555  ;;  %v3782_v47 = vadd.f32 1.0, %v5554_v50  ;;  %5581 = vrcp.f32 %v3780_v27 }
 0x811   :  { %v5558_v41 = vpop.eup %5557  ;;  %v3783_v1 = vadd.f32 1.0, %v5556_v35  ;;  %5583 = vrcp.f32 %v3781_v29 }
 0x812   :  { %v5560_v0 = vpop.eup %5559  ;;  %5585 = vrcp.f32 %v3782_v47 }
 0x813   :  { %v5562_v43 = vpop.eup %5561  ;;  %5587 = vrcp.f32 %v3783_v1 }
 0x814   :  { %v8621_v40 = vpop.eup %5563  ;;  %5589 = vtanh.f32 %v3800_v28 }
 0x815   :  { %v8625_v2 = vpop.eup %5565  ;;  %5591 = vtanh.f32 %v3801_v11 }
 0x816   :  { %v8629_v36 = vpop.eup %5567  ;;  %5593 = vtanh.f32 %v3802_v48 }
 0x817   :  { %v8633_v54 = vpop.eup %5569  ;;  %5595 = vtanh.f32 %v3803_v26 }
 0x818   :  { %v8637_v18 = vpop.eup %5571  ;;  %5597 = vtanh.f32 %v3804_v61 }
 0x819   :  { %v5574_v46 = vpop.eup %5573  ;;  %5599 = vtanh.f32 %v3805_v12 }
 0x81a   :  { %v5576_v33 = vpop.eup %5575  ;;  %5601 = vtanh.f32 %v3806_v56  ;;  %v3888_v55 = vmul.f32 %v5574_v46, %v8303_v42 }
 0x81b   :  { %v5578_v31 = vpop.eup %5577  ;;  %5603 = vtanh.f32 %v3807_v53  ;;  %v3889_v19 = vmul.f32 %v5576_v33, %v8307_v44 }
 0x81c   :  { %v5580_v21 = vpop.eup %5579  ;;  %5605 = vpow2.f32 %v4715_v14  ;;  %v3890_v9 = vmul.f32 %v5578_v31, %v8310_v13 }
 0x81d   :  { %v5582_v51 = vpop.eup %5581  ;;  %5607 = vpow2.f32 %v4716_v7  ;;  %v3891_v20 = vmul.f32 %v5580_v21, %v8314_v52 }
 0x81e   :  { %v5584_v34 = vpop.eup %5583  ;;  %5609 = vpow2.f32 %v4717_v8  ;;  %v3892_v29 = vmul.f32 %v5582_v51, %v8317_v24 }
 0x81f   :  { %v5586_v10 = vpop.eup %5585  ;;  %5611 = vpow2.f32 %v4718_v22  ;;  %v3893_v44 = vmul.f32 %v5584_v34, %v8320_v30 }
 0x820   :  { %v5588_v16 = vpop.eup %5587  ;;  %5613 = vpow2.f32 %v4719_v49  ;;  %v3894_v4 = vmul.f32 %v5586_v10, %v8329_v5 }
 0x821   :  { %v5590_v57 = vpop.eup %5589  ;;  %5615 = vpow2.f32 %v4720_v15  ;;  %v3895_v45 = vmul.f32 %v5588_v16, %v8331_v6 }
 0x822   :  { %v5592_v37 = vpop.eup %5591  ;;  %5617 = vpow2.f32 %v4721_v23  ;;  %v3896_v39 = vmul.f32 %v5590_v57, %v5558_v41 }
 0x823   :  { %v5594_v32 = vpop.eup %5593  ;;  %5619 = vpow2.f32 %v4722_v3  ;;  %v3897_v63 = vmul.f32 %v5592_v37, %v5560_v0 }
 0x824   :  { %v5596_v27 = vpop.eup %5595  ;;  %v3898_v50 = vmul.f32 %v5594_v32, %v5562_v43  ;;  %v8648_v35 = vadd.f32 %v3896_v39, %v3888_v55 }
 0x825   :  { %v5598_v42 = vpop.eup %5597  ;;  %v3899_v47 = vmul.f32 %v5596_v27, %v8621_v40  ;;  %v8652_v28 = vadd.f32 %v3897_v63, %v3889_v19 }
 0x826   :  { %v5600_v41 = vpop.eup %5599  ;;  %v3900_v13 = vmul.f32 %v5598_v42, %v8625_v2  ;;  %v8655_v1 = vadd.f32 %v3898_v50, %v3890_v9  ;;  %5621 = vtanh.f32 %v8648_v35 }
 0x827   :  { %v5602_v52 = vpop.eup %5601  ;;  %v3901_v11 = vmul.f32 %v5600_v41, %v8629_v36  ;;  %v8659_v24 = vadd.f32 %v3899_v47, %v3891_v20  ;;  %5623 = vtanh.f32 %v8652_v28 }
 0x828   :  { %v5604_v0 = vpop.eup %5603  ;;  %v8662_v48 = vadd.f32 %v3900_v13, %v3892_v29  ;;  %5625 = vtanh.f32 %v8655_v1  ;;  %v3902_v58 = vmul.f32 %v5602_v52, %v8633_v54 }
 0x829   :  { %v5606_v30 = vpop.eup %5605  ;;  %v8665_v43 = vadd.f32 %v3901_v11, %v3893_v44  ;;  %5627 = vtanh.f32 %v8659_v24  ;;  %v3903_v25 = vmul.f32 %v5604_v0, %v8637_v18 }
 0x82a   :  { %v5608_v26 = vpop.eup %5607  ;;  %v3864_v40 = vadd.f32 1.0, %v5606_v30  ;;  %5629 = vtanh.f32 %v8662_v48  ;;  %v8674_v38 = vadd.f32 %v3902_v58, %v3894_v4 }
 0x82b   :  { %v5610_v61 = vpop.eup %5609  ;;  %v3865_v17 = vadd.f32 1.0, %v5608_v26  ;;  %5631 = vtanh.f32 %v8665_v43  ;;  %v8676_v8 = vadd.f32 %v3903_v25, %v3895_v45 }
 0x82c   :  { %v5612_v2 = vpop.eup %5611  ;;  %v3866_v12 = vadd.f32 1.0, %v5610_v61  ;;  %5633 = vrcp.f32 %v3864_v40 }
 0x82d   :  { %v5614_v36 = vpop.eup %5613  ;;  %v3867_v56 = vadd.f32 1.0, %v5612_v2  ;;  %5635 = vrcp.f32 %v3865_v17 }
 0x82e   :  { %v5616_v53 = vpop.eup %5615  ;;  %v3868_v60 = vadd.f32 1.0, %v5614_v36  ;;  %5637 = vrcp.f32 %v3866_v12 }
 0x82f   :  { %v5618_v14 = vpop.eup %5617  ;;  %v3869_v46 = vadd.f32 1.0, %v5616_v53  ;;  %5639 = vrcp.f32 %v3867_v56 }
 0x830   :  { %v5620_v7 = vpop.eup %5619  ;;  %v3870_v33 = vadd.f32 1.0, %v5618_v14  ;;  %5641 = vrcp.f32 %v3868_v60 }
 0x831   :  { %v3871_v5 = vadd.f32 1.0, %v5620_v7  ;;  %5643 = vrcp.f32 %v3869_v46 }
 0x832   :  { %5645 = vrcp.f32 %v3870_v33  ;;  %v4723_v33 = vld [vmem:[%s8847_s0 + $0x7] ss:$8 sm:$0xf] }
 0x833   :  { %v5622_v6 = vpop.eup %5621  ;;  %5647 = vrcp.f32 %v3871_v5  ;;  %v4724_v5 = vld [vmem:[%s8847_s0 + $0x27] ss:$8 sm:$0xf] }
 0x834   :  { %v5624_v31 = vpop.eup %5623  ;;  %5649 = vtanh.f32 %v8674_v38 }
 0x835   :  { %v5626_v54 = vpop.eup %5625  ;;  %5651 = vtanh.f32 %v8676_v8 }
 0x836   :  { %v5628_v59 = vpop.eup %5627 }
 0x837   :  { %v5630_v18 = vpop.eup %5629 }
 0x838   :  { %v5632_v22 = vpop.eup %5631 }
 0x839   :  { %v5634_v21 = vpop.eup %5633 }
 0x83a   :  { %v5636_v49 = vpop.eup %5635  ;;  %v3920_v51 = vmul.f32 %v5634_v21, %v5622_v6  ;;  %v4725_v6 = vld [vmem:[%s8847_s0 + $0x47] ss:$8 sm:$0xf] }
 0x83b   :  { %v5638_v15 = vpop.eup %5637  ;;  %v3921_v34 = vmul.f32 %v5636_v49, %v5624_v31  ;;  %v4727_v31 = vld [vmem:[%s8847_s0 + $0x87] ss:$8 sm:$0xf] }
 0x83c   :  { %v5640_v23 = vpop.eup %5639  ;;  %v3922_v10 = vmul.f32 %v5638_v15, %v5626_v54  ;;  %3928 = vst [vmem:[%s8848_s2 + $0x6] sm:$0x1] %v3920_v51  ;;  %v4726_v21 = vld [vmem:[%s8847_s0 + $0x67] ss:$8 sm:$0xf] }
 0x83d   :  { %v5642_v3 = vpop.eup %5641  ;;  %v3923_v16 = vmul.f32 %v5640_v23, %v5628_v59  ;;  %3929 = vst [vmem:[%s8848_s2 + $0xe] sm:$0x1] %v3921_v34  ;;  %v3960_v39 = vcombine.low %v3920_v51, %v3921_v34  ;;  %v4728_v49 = vld [vmem:[%s8847_s0 + $0xa7] ss:$8 sm:$0xf] }
 0x83e   :  { %v5644_v55 = vpop.eup %5643  ;;  %v3924_v57 = vmul.f32 %v5642_v3, %v5630_v18  ;;  %3930 = vst [vmem:[%s8848_s2 + $0x16] sm:$0x1] %v3922_v10  ;;  %v4729_v51 = vld [vmem:[%s8847_s0 + $0xc7] ss:$8 sm:$0xf] }
 0x83f   :  { %v5646_v19 = vpop.eup %5645  ;;  %v3925_v37 = vmul.f32 %v5644_v55, %v5632_v22  ;;  %3931 = vst [vmem:[%s8848_s2 + $0x1e] sm:$0x1] %v3923_v16  ;;  %v3961_v9 = vcombine.low %v3922_v10, %v3923_v16  ;;  %v3970_v47 = vrot.slane %v3960_v39, %v6446_v62 }
 0x840   :  { %v5648_v32 = vpop.eup %5647  ;;  %3932 = vst [vmem:[%s8848_s2 + $0x26] sm:$0x1] %v3924_v57 }
 0x841   :  { %v5650_v63 = vpop.eup %5649  ;;  %3933 = vst [vmem:[%s8848_s2 + $0x2e] sm:$0x1] %v3925_v37  ;;  %v3977_v20 = vrot.slane %v3961_v9, %v6446_v62  ;;  %v3962_v42 = vcombine.low %v3924_v57, %v3925_v37 }
 0x842   :  { %v5652_v27 = vpop.eup %5651  ;;  %v3926_v50 = vmul.f32 %v5650_v63, %v5646_v19 }
 0x843   :  { %v3927_v29 = vmul.f32 %v5652_v27, %v5648_v32  ;;  %v3992_v41 = vcombine.low %v3970_v47, %v3977_v20  ;;  %v3984_v13 = vrot.slane %v3962_v42, %v6446_v62 }
 0x844   :  { %3934 = vst [vmem:[%s8848_s2 + $0x36] sm:$0x1] %v3926_v50 }
 0x845   :  { %3935 = vst [vmem:[%s8848_s2 + $0x3e] sm:$0x1] %v3927_v29  ;;  %v3963_v44 = vcombine.low %v3926_v50, %v3927_v29  ;;  %v4000_v0 = vrot.slane %v3992_v41, %v6446_v62 }
 0x847   :  { %v3991_v52 = vrot.slane %v3963_v44, %v6446_v62 }
 0x849   :  { %v3993_v11 = vcombine.low %v3984_v13, %v3991_v52 }
 0x84b   :  { %v4007_v30 = vrot.slane %v3993_v11, %v6446_v62 }
 0x84d   :  { %v4008_v26 = vcombine.low %v4000_v0, %v4007_v30 }
 0x84f   :  { %4075 = vmatmul.mubr.f32.vlgmr.msra.gmra.mxu0 %v4008_v26  ;;  %4146 = vmatmul.mubr.f32.vlgmr.msra.gmra.mxu1 %v4008_v26 }
 0x90f   :  { %v4076_v40 = vpop.f32.mrf.mxu0  ;;  %v4147_v61 = vpop.f32.mrf.mxu1 }
 0x911   :  { %v4078_v17 = vpop.f32.mrf.mxu0  ;;  %v4149_v2 = vpop.f32.mrf.mxu1 }
 0x912   :  { %v4156_v12 = vcombine.low %v4076_v40, %v4078_v17  ;;  %v4157_v4 = vcombine.high %v4076_v40, %v4078_v17  ;;  %v4158_v36 = vcombine.low %v4147_v61, %v4149_v2  ;;  %v4159_v56 = vcombine.high %v4147_v61, %v4149_v2 }
 0x914   :  { %v4166_v45 = vrot.slane %v4156_v12, %v6446_v62  ;;  %v4173_v53 = vrot.slane %v4157_v4, %v6446_v62  ;;  %v4180_v60 = vrot.slane %v4158_v36, %v6446_v62  ;;  %v4187_v58 = vrot.slane %v4159_v56, %v6446_v62 }
 0x916   :  { %v4188_v14 = vcombine.low %v4166_v45, %v4180_v60  ;;  %v4189_v46 = vcombine.high %v4166_v45, %v4180_v60  ;;  %v4190_v25 = vcombine.low %v4173_v53, %v4187_v58  ;;  %v4191_v7 = vcombine.high %v4173_v53, %v4187_v58 }
 0x918   :  { %v4198_v54 = vrot.slane %v4188_v14, %v6446_v62  ;;  %v4205_v59 = vrot.slane %v4190_v25, %v6446_v62  ;;  %v4212_v18 = vrot.slane %v4189_v46, %v6446_v62  ;;  %v4219_v22 = vrot.slane %v4191_v7, %v6446_v62  ;;  %v4730_v62 = vld [vmem:[%s8847_s0 + $0xe7] ss:$8 sm:$0xf] }
 0x91a   :  { %v4220_v15 = vcombine.high %v4198_v54, %v4198_v54  ;;  %v4221_v34 = vcombine.high %v4205_v59, %v4205_v59  ;;  %v4222_v23 = vcombine.high %v4212_v18, %v4212_v18  ;;  %v4223_v10 = vcombine.high %v4219_v22, %v4219_v22 }
 0x91b   :  { %v8742_v3 = vadd.f32 %v4723_v33, %v4198_v54  ;;  %v8744_v16 = vadd.f32 %v4724_v5, %v4212_v18  ;;  %v8746_v55 = vadd.f32 %v4727_v31, %v4205_v59  ;;  %v8752_v37 = vadd.f32 %v4728_v49, %v4219_v22 }
 0x91c   :  { %v8748_v57 = vadd.f32 %v4725_v6, %v4220_v15  ;;  %v8750_v19 = vadd.f32 %v4726_v21, %v4222_v23  ;;  %v8754_v39 = vadd.f32 %v4729_v51, %v4221_v34  ;;  %v8758_v63 = vadd.f32 %v4730_v62, %v4223_v10 }
 0x91d   :  { %v4731_v9 = vmul.f32 -1.442695, %v8742_v3  ;;  %v4732_v32 = vmul.f32 -1.442695, %v8744_v16  ;;  %v4735_v50 = vmul.f32 -1.442695, %v8746_v55 }
 0x91e   :  { %v4733_v20 = vmul.f32 -1.442695, %v8748_v57  ;;  %v4734_v27 = vmul.f32 -1.442695, %v8750_v19  ;;  %v4296_v29 = vrot.slane %v8742_v3, 1  ;;  %v4297_v47 = vrot.slane %v8744_v16, 1 }
 0x91f   :  { %5653 = vpow2.f32 %v4731_v9  ;;  %v4736_v42 = vmul.f32 -1.442695, %v8752_v37  ;;  %v4737_v44 = vmul.f32 -1.442695, %v8754_v39  ;;  %v4298_v41 = vrot.slane %v8748_v57, 1 }
 0x920   :  { %5655 = vpow2.f32 %v4732_v32  ;;  %v4738_v13 = vmul.f32 -1.442695, %v8758_v63  ;;  %v4299_v52 = vrot.slane %v8750_v19, 1  ;;  %v4300_v11 = vrot.slane %v8746_v55, 1 }
 0x921   :  { %5657 = vpow2.f32 %v4733_v20  ;;  %v4739_v0 = vmul.f32 -1.442695, %v4296_v29  ;;  %v4301_v30 = vrot.slane %v8752_v37, 1  ;;  %v4740_v26 = vmul.f32 -1.442695, %v4297_v47 }
 0x922   :  { %5659 = vpow2.f32 %v4734_v27  ;;  %v4302_v40 = vrot.slane %v8754_v39, 1  ;;  %v4741_v61 = vmul.f32 -1.442695, %v4298_v41  ;;  %v4303_v17 = vrot.slane %v8758_v63, 1 }
 0x923   :  { %5661 = vpow2.f32 %v4735_v50  ;;  %v4742_v2 = vmul.f32 -1.442695, %v4299_v52  ;;  %v4743_v12 = vmul.f32 -1.442695, %v4300_v11  ;;  %v4744_v4 = vmul.f32 -1.442695, %v4301_v30 }
 0x924   :  { %5663 = vpow2.f32 %v4736_v42  ;;  %v4745_v36 = vmul.f32 -1.442695, %v4302_v40  ;;  %v4746_v56 = vmul.f32 -1.442695, %v4303_v17  ;;  %v4360_v47 = vrot.slane %v8742_v3, 2 }
 0x925   :  { %5665 = vpow2.f32 %v4737_v44  ;;  %v4362_v11 = vrot.slane %v8748_v57, 2  ;;  %v4363_v30 = vrot.slane %v8750_v19, 2  ;;  %v4364_v40 = vrot.slane %v8746_v55, 2 }
 0x926   :  { %5667 = vpow2.f32 %v4738_v13  ;;  %v4361_v13 = vrot.slane %v8744_v16, 2 }
 0x927   :  { %5669 = vpow2.f32 %v4739_v0 }
 0x928   :  { %5671 = vpow2.f32 %v4740_v26 }
 0x929   :  { %5673 = vpow2.f32 %v4741_v61  ;;  %v4384_v61 = vrot.slane %v8742_v3, 3  ;;  %v4387_v3 = vrot.slane %v8750_v19, 3  ;;  %v4391_v19 = vrot.slane %v8758_v63, 3 }
 0x92a   :  { %5675 = vpow2.f32 %v4742_v2  ;;  %v4365_v2 = vrot.slane %v8752_v37, 2 }
 0x92b   :  { %5677 = vpow2.f32 %v4743_v12  ;;  %v4385_v12 = vrot.slane %v8744_v16, 3  ;;  %v4747_v16 = vmul.f32 -1.442695, %v4384_v61 }
 0x92c   :  { %v5654_v45 = vpop.eup %5653  ;;  %5679 = vpow2.f32 %v4744_v4 }
 0x92d   :  { %v5656_v53 = vpop.eup %5655  ;;  %v4264_v60 = vadd.f32 1.0, %v5654_v45  ;;  %5681 = vpow2.f32 %v4745_v36  ;;  %v4366_v36 = vrot.slane %v8754_v39, 2 }
 0x92e   :  { %v5658_v58 = vpop.eup %5657  ;;  %v4265_v14 = vadd.f32 1.0, %v5656_v53  ;;  %5683 = vpow2.f32 %v4746_v56  ;;  %v4386_v56 = vrot.slane %v8748_v57, 3  ;;  %v4367_v53 = vrot.slane %v8758_v63, 2 }
 0x92f   :  { %v5660_v46 = vpop.eup %5659  ;;  %v4266_v25 = vadd.f32 1.0, %v5658_v58  ;;  %5685 = vrcp.f32 %v4264_v60  ;;  %v4388_v58 = vrot.slane %v8746_v55, 3  ;;  %v4390_v57 = vrot.slane %v8754_v39, 3 }
 0x930   :  { %v5662_v7 = vpop.eup %5661  ;;  %v4267_v33 = vadd.f32 1.0, %v5660_v46  ;;  %5687 = vrcp.f32 %v4265_v14  ;;  %v4389_v46 = vrot.slane %v8752_v37, 3 }
 0x931   :  { %v5664_v5 = vpop.eup %5663  ;;  %v4268_v6 = vadd.f32 1.0, %v5662_v7  ;;  %5689 = vrcp.f32 %v4266_v25  ;;  %v4748_v25 = vmul.f32 -1.442695, %v4385_v12  ;;  %v4753_v37 = vmul.f32 -1.442695, %v4390_v57 }
 0x932   :  { %v5666_v31 = vpop.eup %5665  ;;  %v4269_v54 = vadd.f32 1.0, %v5664_v5  ;;  %5691 = vrcp.f32 %v4267_v33  ;;  %v4749_v33 = vmul.f32 -1.442695, %v4386_v56 }
 0x933   :  { %v5668_v59 = vpop.eup %5667  ;;  %v4270_v18 = vadd.f32 1.0, %v5666_v31  ;;  %5693 = vrcp.f32 %v4268_v6  ;;  %v4750_v6 = vmul.f32 -1.442695, %v4387_v3 }
 0x934   :  { %v5670_v22 = vpop.eup %5669  ;;  %v4271_v21 = vadd.f32 1.0, %v5668_v59  ;;  %5695 = vrcp.f32 %v4269_v54  ;;  %v4751_v54 = vmul.f32 -1.442695, %v4388_v58  ;;  %v4752_v59 = vmul.f32 -1.442695, %v4389_v46 }
 0x935   :  { %v5672_v49 = vpop.eup %5671  ;;  %5697 = vrcp.f32 %v4270_v18  ;;  %v4336_v51 = vadd.f32 1.0, %v5670_v22 }
 0x936   :  { %v5674_v15 = vpop.eup %5673  ;;  %5699 = vrcp.f32 %v4271_v21  ;;  %v4337_v34 = vadd.f32 1.0, %v5672_v49  ;;  %v4754_v21 = vmul.f32 -1.442695, %v4391_v19 }
 0x937   :  { %v5676_v23 = vpop.eup %5675  ;;  %v4338_v10 = vadd.f32 1.0, %v5674_v15  ;;  %5701 = vrcp.f32 %v4336_v51 }
 0x938   :  { %v5678_v62 = vpop.eup %5677  ;;  %v4339_v9 = vadd.f32 1.0, %v5676_v23  ;;  %5703 = vrcp.f32 %v4337_v34 }
 0x939   :  { %v5680_v32 = vpop.eup %5679  ;;  %v4340_v20 = vadd.f32 1.0, %v5678_v62  ;;  %5705 = vrcp.f32 %v4338_v10 }
 0x93a   :  { %v5682_v27 = vpop.eup %5681  ;;  %v4341_v50 = vadd.f32 1.0, %v5680_v32  ;;  %5707 = vrcp.f32 %v4339_v9 }
 0x93b   :  { %v5684_v29 = vpop.eup %5683  ;;  %v4342_v42 = vadd.f32 1.0, %v5682_v27  ;;  %5709 = vrcp.f32 %v4340_v20 }
 0x93c   :  { %v8775_v44 = vpop.eup %5685  ;;  %v4343_v41 = vadd.f32 1.0, %v5684_v29  ;;  %5711 = vrcp.f32 %v4341_v50 }
 0x93d   :  { %v8778_v52 = vpop.eup %5687  ;;  %5713 = vrcp.f32 %v4342_v42 }
 0x93e   :  { %v8781_v0 = vpop.eup %5689  ;;  %5715 = vrcp.f32 %v4343_v41 }
 0x93f   :  { %v8784_v26 = vpop.eup %5691  ;;  %5717 = vtanh.f32 %v4360_v47 }
 0x940   :  { %v8788_v17 = vpop.eup %5693  ;;  %5719 = vtanh.f32 %v4361_v13 }
 0x941   :  { %v8792_v4 = vpop.eup %5695  ;;  %5721 = vtanh.f32 %v4362_v11 }
 0x942   :  { %v8796_v45 = vpop.eup %5697  ;;  %5723 = vtanh.f32 %v4363_v30 }
 0x943   :  { %v8800_v60 = vpop.eup %5699  ;;  %5725 = vtanh.f32 %v4364_v40 }
 0x944   :  { %v5702_v14 = vpop.eup %5701  ;;  %5727 = vtanh.f32 %v4365_v2 }
 0x945   :  { %v5704_v7 = vpop.eup %5703  ;;  %5729 = vtanh.f32 %v4366_v36  ;;  %v4448_v39 = vmul.f32 %v5702_v14, %v8648_v35 }
 0x946   :  { %v5706_v5 = vpop.eup %5705  ;;  %5731 = vtanh.f32 %v4367_v53  ;;  %v4449_v63 = vmul.f32 %v5704_v7, %v8652_v28 }
 0x947   :  { %v5708_v31 = vpop.eup %5707  ;;  %5733 = vpow2.f32 %v4747_v16  ;;  %v4450_v34 = vmul.f32 %v5706_v5, %v8655_v1 }
 0x948   :  { %v5710_v55 = vpop.eup %5709  ;;  %5735 = vpow2.f32 %v4748_v25  ;;  %v4451_v62 = vmul.f32 %v5708_v31, %v8659_v24 }
 0x949   :  { %v5712_v18 = vpop.eup %5711  ;;  %5737 = vpow2.f32 %v4749_v33  ;;  %v4452_v20 = vmul.f32 %v5710_v55, %v8662_v48 }
 0x94a   :  { %v5714_v22 = vpop.eup %5713  ;;  %5739 = vpow2.f32 %v4750_v6  ;;  %v4453_v28 = vmul.f32 %v5712_v18, %v8665_v43 }
 0x94b   :  { %v5716_v49 = vpop.eup %5715  ;;  %5741 = vpow2.f32 %v4751_v54  ;;  %v4454_v2 = vmul.f32 %v5714_v22, %v8674_v38 }
 0x94c   :  { %v5718_v51 = vpop.eup %5717  ;;  %5743 = vpow2.f32 %v4752_v59  ;;  %v4455_v36 = vmul.f32 %v5716_v49, %v8676_v8 }
 0x94d   :  { %v5720_v15 = vpop.eup %5719  ;;  %5745 = vpow2.f32 %v4753_v37  ;;  %v4456_v23 = vmul.f32 %v5718_v51, %v8775_v44 }
 0x94e   :  { %v5722_v10 = vpop.eup %5721  ;;  %5747 = vpow2.f32 %v4754_v21  ;;  %v4457_v9 = vmul.f32 %v5720_v15, %v8778_v52 }
 0x94f   :  { %v5724_v32 = vpop.eup %5723  ;;  %v4458_v35 = vmul.f32 %v5722_v10, %v8781_v0  ;;  %v4464_v27 = vadd.f32 %v4456_v23, %v4448_v39 }
 0x950   :  { %v5726_v50 = vpop.eup %5725  ;;  %v4459_v29 = vmul.f32 %v5724_v32, %v8784_v26  ;;  %v4465_v1 = vadd.f32 %v4457_v9, %v4449_v63 }
 0x951   :  { %v5728_v42 = vpop.eup %5727  ;;  %v4460_v47 = vmul.f32 %v5726_v50, %v8788_v17  ;;  %v4466_v44 = vadd.f32 %v4458_v35, %v4450_v34  ;;  %5749 = vtanh.f32 %v4464_v27 }
 0x952   :  { %v5730_v24 = vpop.eup %5729  ;;  %v4461_v41 = vmul.f32 %v5728_v42, %v8792_v4  ;;  %v4467_v13 = vadd.f32 %v4459_v29, %v4451_v62  ;;  %5751 = vtanh.f32 %v4465_v1 }
 0x953   :  { %v5732_v48 = vpop.eup %5731  ;;  %v4468_v52 = vadd.f32 %v4460_v47, %v4452_v20  ;;  %5753 = vtanh.f32 %v4466_v44  ;;  %v4462_v3 = vmul.f32 %v5730_v24, %v8796_v45 }
 0x954   :  { %v5734_v11 = vpop.eup %5733  ;;  %v4469_v0 = vadd.f32 %v4461_v41, %v4453_v28  ;;  %5755 = vtanh.f32 %v4467_v13  ;;  %v4463_v14 = vmul.f32 %v5732_v48, %v8800_v60 }
 0x955   :  { %v5736_v43 = vpop.eup %5735  ;;  %v4424_v30 = vadd.f32 1.0, %v5734_v11  ;;  %5757 = vtanh.f32 %v4468_v52  ;;  %v4470_v7 = vadd.f32 %v4462_v3, %v4454_v2 }
 0x956   :  { %v5738_v26 = vpop.eup %5737  ;;  %v4425_v40 = vadd.f32 1.0, %v5736_v43  ;;  %5759 = vtanh.f32 %v4469_v0  ;;  %v4471_v57 = vadd.f32 %v4463_v14, %v4455_v36 }
 0x957   :  { %v5740_v61 = vpop.eup %5739  ;;  %v4426_v17 = vadd.f32 1.0, %v5738_v26  ;;  %5761 = vrcp.f32 %v4424_v30 }
 0x958   :  { %v5742_v12 = vpop.eup %5741  ;;  %v4427_v4 = vadd.f32 1.0, %v5740_v61  ;;  %5763 = vrcp.f32 %v4425_v40 }
 0x959   :  { %v5744_v56 = vpop.eup %5743  ;;  %v4428_v53 = vadd.f32 1.0, %v5742_v12  ;;  %5765 = vrcp.f32 %v4426_v17 }
 0x95a   :  { %v5746_v58 = vpop.eup %5745  ;;  %v4429_v16 = vadd.f32 1.0, %v5744_v56  ;;  %5767 = vrcp.f32 %v4427_v4 }
 0x95b   :  { %v5748_v46 = vpop.eup %5747  ;;  %v4430_v25 = vadd.f32 1.0, %v5746_v58  ;;  %5769 = vrcp.f32 %v4428_v53 }
 0x95c   :  { %v4431_v38 = vadd.f32 1.0, %v5748_v46  ;;  %5771 = vrcp.f32 %v4429_v16 }
 0x95d   :  { %5773 = vrcp.f32 %v4430_v25 }
 0x95e   :  { %v5750_v33 = vpop.eup %5749  ;;  %5775 = vrcp.f32 %v4431_v38 }
 0x95f   :  { %v5752_v8 = vpop.eup %5751  ;;  %5777 = vtanh.f32 %v4470_v7 }
 0x960   :  { %v5754_v5 = vpop.eup %5753  ;;  %5779 = vtanh.f32 %v4471_v57 }
 0x961   :  { %v5756_v45 = vpop.eup %5755 }
 0x962   :  { %v5758_v19 = vpop.eup %5757 }
 0x963   :  { %v5760_v6 = vpop.eup %5759 }
 0x964   :  { %v5762_v31 = vpop.eup %5761 }
 0x965   :  { %v5764_v54 = vpop.eup %5763  ;;  %v4480_v60 = vmul.f32 %v5762_v31, %v5750_v33 }
 0x966   :  { %v5766_v55 = vpop.eup %5765  ;;  %v4481_v59 = vmul.f32 %v5764_v54, %v5752_v8 }
 0x967   :  { %v5768_v18 = vpop.eup %5767  ;;  %v4482_v37 = vmul.f32 %v5766_v55, %v5754_v5  ;;  %4488 = vst [vmem:[%s8848_s2 + $0x7] sm:$0x1] %v4480_v60 }
 0x968   :  { %v5770_v22 = vpop.eup %5769  ;;  %v4483_v21 = vmul.f32 %v5768_v18, %v5756_v45  ;;  %4489 = vst [vmem:[%s8848_s2 + $0xf] sm:$0x1] %v4481_v59 }
 0x969   :  { %v5772_v49 = vpop.eup %5771  ;;  %v4484_v39 = vmul.f32 %v5770_v22, %v5758_v19  ;;  %4490 = vst [vmem:[%s8848_s2 + $0x17] sm:$0x1] %v4482_v37 }
 0x96a   :  { %v5774_v51 = vpop.eup %5773  ;;  %v4485_v63 = vmul.f32 %v5772_v49, %v5760_v6  ;;  %4491 = vst [vmem:[%s8848_s2 + $0x1f] sm:$0x1] %v4483_v21 }
 0x96b   :  { %v5776_v15 = vpop.eup %5775  ;;  %4492 = vst [vmem:[%s8848_s2 + $0x27] sm:$0x1] %v4484_v39 }
 0x96c   :  { %v5778_v34 = vpop.eup %5777  ;;  %4493 = vst [vmem:[%s8848_s2 + $0x2f] sm:$0x1] %v4485_v63 }
 0x96d   :  { %v5780_v23 = vpop.eup %5779  ;;  %v4486_v10 = vmul.f32 %v5778_v34, %v5774_v51 }
 0x96e   :  { %v4487_v62 = vmul.f32 %v5780_v23, %v5776_v15 }
 0x96f   :  { %4494 = vst [vmem:[%s8848_s2 + $0x37] sm:$0x1] %v4486_v10 }
 0x970   :  { %4495 = vst [vmem:[%s8848_s2 + $0x3f] sm:$0x1] %v4487_v62 }

</bundles_post_ra>
